<compile_context>
chip_gen: v7x
topology: tpu7x:2x2x1
jax: 0.10.0
libtpu: 0.0.40
codegen_flags: <defaults>
</compile_context>

<pallas_src>
import jax
import jax.numpy as jnp
from jax.experimental import pallas as pl
from jax.experimental.pallas import tpu as pltpu


# ----------------------------------------------------------------------------- kernel
def _lfa_kernel(lse_ref, feat_ref,
                w1_ref, b1_ref,
                wl1_ref, bl1_ref, wsh1_ref, wsf1_ref, wmh1_ref, wmf1_ref, bm1_ref,
                wl2_ref, bl2_ref, wsh2_ref, wsf2_ref, wmh2_ref, wmf2_ref, bm2_ref,
                w2_ref, b2_ref, wsc_ref, bsc_ref,
                o_ref):
    f32 = jnp.float32
    bf16 = jnp.bfloat16

    tn = feat_ref.shape[0]
    k = lse_ref.shape[0] // tn

    lse = lse_ref[...]          # (TN*K, 10) bf16
    feat = feat_ref[...]        # (TN, d_in) bf16

    # mlp1: SharedMLP(d_in -> dh), no BN, LeakyReLU(0.2)
    x = jnp.dot(feat, w1_ref[...], preferred_element_type=f32) + b1_ref[...]
    x = jnp.where(x >= 0, x, 0.2 * x)                                   # (TN, dh) f32

    def lse_pool_stage(x_feat, wl_ref, bl_ref, wsh_ref, wsf_ref,
                       wmh_ref, wmf_ref, bm_ref):
        # x_feat: (TN, dh) f32 current per-point features.
        dh = x_feat.shape[-1]
        d = wsh_ref.shape[1]                    # = 2*dh (attention width)

        # LocalSpatialEncoding MLP (10 -> dh), BN folded, ReLU.
        h = jnp.dot(lse, wl_ref[...], preferred_element_type=f32) + bl_ref[...]
        h = jnp.maximum(h, 0.0)                                         # (TN*K, dh)

        # Attention scores for the virtual concat [h, feat]: split matmul.
        xb = x_feat.astype(bf16)
        s = jnp.dot(h.astype(bf16), wsh_ref[...], preferred_element_type=f32)
        s = s.reshape(tn, k, d)
        s = s + jnp.dot(xb, wsf_ref[...], preferred_element_type=f32)[:, None, :]

        # Softmax over the K neighbors (per channel).
        s = s - jnp.max(s, axis=1, keepdims=True)
        e = jnp.exp(s)
        attn = e * pl.reciprocal(jnp.sum(e, axis=1, keepdims=True), approx=True)

        # Attentive pooling, split halves (never materialize concat).
        h3 = h.reshape(tn, k, dh)
        pooled_h = jnp.sum(attn[:, :, :dh] * h3, axis=1)                # (TN, dh)
        pooled_f = x_feat * jnp.sum(attn[:, :, dh:], axis=1)            # (TN, dh)

        # Pooling MLP (d -> c_out), BN folded, ReLU — split matmul.
        y = (jnp.dot(pooled_h.astype(bf16), wmh_ref[...], preferred_element_type=f32)
             + jnp.dot(pooled_f.astype(bf16), wmf_ref[...], preferred_element_type=f32)
             + bm_ref[...])
        return jnp.maximum(y, 0.0)

    y1 = lse_pool_stage(x, wl1_ref, bl1_ref, wsh1_ref, wsf1_ref,
                        wmh1_ref, wmf1_ref, bm1_ref)                    # (TN, dh)
    y2 = lse_pool_stage(y1, wl2_ref, bl2_ref, wsh2_ref, wsf2_ref,
                        wmh2_ref, wmf2_ref, bm2_ref)                    # (TN, d_out)

    # lrelu( mlp2(y2) + shortcut(features) ), slope 0.01; shortcut BN folded.
    a = jnp.dot(y2.astype(bf16), w2_ref[...], preferred_element_type=f32) + b2_ref[...]
    sc = jnp.dot(feat, wsc_ref[...], preferred_element_type=f32) + bsc_ref[...]
    out = a + sc
    out = jnp.where(out >= 0, out, 0.01 * out)
    o_ref[...] = out.astype(o_ref.dtype)


# ----------------------------------------------------------------------------- wrapper
def _pick_tile(n, target=256):
    """Largest N-tile <= target that divides N and satisfies the sublane constraint."""
    if n <= target:
        return n
    for t in range(target, 7, -1):
        if n % t == 0 and t % 8 == 0:
            return t
    return n  # fallback: whole axis (block == full dim always legal)


def _fold_bn(w, b, scale, shift):
    # y = (x@w + b) * scale + shift  ==  x @ (w*scale) + (b*scale + shift)
    return w * scale, b * scale + shift


def prepare_params(p, d_out):
    """Fold eval-mode BN into matmul weights, split score/mlp weights, cast bf16."""
    bf = jnp.bfloat16
    dh = d_out // 2
    out = {"w1": p["mlp1_w"].astype(bf), "b1": p["mlp1_b"]}
    for i, (lse_k, pool_k) in enumerate((("lse1", "pool1"), ("lse2", "pool2")), start=1):
        wl, bl = _fold_bn(p[lse_k]["w"], p[lse_k]["b"],
                          p[lse_k]["scale"], p[lse_k]["shift"])
        wm, bm = _fold_bn(p[pool_k]["w_mlp"], p[pool_k]["b_mlp"],
                          p[pool_k]["scale"], p[pool_k]["shift"])
        ws = p[pool_k]["w_score"]
        out[f"wl{i}"] = wl.astype(bf)
        out[f"bl{i}"] = bl
        out[f"wsh{i}"] = ws[:dh].astype(bf)   # rows acting on the lse-mlp half
        out[f"wsf{i}"] = ws[dh:].astype(bf)   # rows acting on the feature half
        out[f"wmh{i}"] = wm[:dh].astype(bf)
        out[f"wmf{i}"] = wm[dh:].astype(bf)
        out[f"bm{i}"] = bm
    out["w2"] = p["mlp2_w"].astype(bf)
    out["b2"] = p["mlp2_b"]
    wsc, bsc = _fold_bn(p["sc_w"], p["sc_b"], p["sc_scale"], p["sc_shift"])
    out["wsc"] = wsc.astype(bf)
    out["bsc"] = bsc
    return out


_WEIGHT_ORDER = ("w1", "b1",
                 "wl1", "bl1", "wsh1", "wsf1", "wmh1", "wmf1", "bm1",
                 "wl2", "bl2", "wsh2", "wsf2", "wmh2", "wmf2", "bm2",
                 "w2", "b2", "wsc", "bsc")


def lfa_pallas(lse_flat, feat, pp, d_out, tile_n):
    B, NK, _ = lse_flat.shape
    _, N, d_in = feat.shape
    k = NK // N
    tn = tile_n
    assert N % tn == 0

    weights = [pp[name] for name in _WEIGHT_ORDER]

    def rep_spec(arr):
        nd = arr.ndim
        return pl.BlockSpec(arr.shape, lambda b, n, _nd=nd: (0,) * _nd)

    in_specs = [
        pl.BlockSpec((None, tn * k, 10), lambda b, n: (b, n, 0)),
        pl.BlockSpec((None, tn, d_in), lambda b, n: (b, n, 0)),
    ] + [rep_spec(w) for w in weights]

    out = pl.pallas_call(
        _lfa_kernel,
        out_shape=jax.ShapeDtypeStruct((B, N, 2 * d_out), jnp.float32),
        grid=(B, N // tn),
        in_specs=in_specs,
        out_specs=pl.BlockSpec((None, tn, 2 * d_out), lambda b, n: (b, n, 0)),
        compiler_params=pltpu.CompilerParams(
            dimension_semantics=("parallel", "parallel"),
            vmem_limit_bytes=48 * 1024 * 1024,
        ),
    )(lse_flat, feat, *weights)
    return out


# ----------------------------------------------------------------------------- JAX glue
def knn_self(pos, k, chunk=2048):
    # TODO(synk): data-dependent top-k neighbor selection has no clean Pallas
    # equivalent; kept in plain JAX but chunked over query points so the full
    # (B, N, N) distance matrix is never materialized.
    B, N, _ = pos.shape

    def chunk_idx(q):  # q: (B, C, 3)
        d2 = jnp.sum((q[:, :, None, :] - pos[:, None, :, :]) ** 2, axis=-1)
        _, idx = jax.lax.top_k(-d2, k)
        return idx

    if N <= chunk:
        return chunk_idx(pos)
    nchunks = (N + chunk - 1) // chunk
    parts = [chunk_idx(pos[:, i * chunk:(i + 1) * chunk]) for i in range(nchunks)]
    return jnp.concatenate(parts, axis=1)


def build_lse_input(pos, idx):
    # torch: cat((coords, neighbors, coords - neighbors, squared_dist), channel dim)
    neighbors = jax.vmap(lambda p, i: p[i])(pos, idx)                 # (B, N, K, 3)
    coords = jnp.broadcast_to(pos[:, :, None, :], neighbors.shape)    # (B, N, K, 3)
    diff = coords - neighbors
    sqdist = jnp.sum(diff * diff, axis=-1, keepdims=True)
    return jnp.concatenate([coords, neighbors, diff, sqdist], axis=-1)  # (B, N, K, 10)


def local_feature_aggregation(pos, features_nchw, params, k, tile_n=None):
    B, d_in, N, _ = features_nchw.shape
    d_out = params["pool2"]["w_mlp"].shape[1]
    feat = jnp.transpose(features_nchw[..., 0], (0, 2, 1))            # (B, N, d_in)

    idx = knn_self(pos, k)                                            # (B, N, K)
    lse_in = build_lse_input(pos, idx)                                # (B, N, K, 10)
    lse_flat = lse_in.reshape(B, N * k, 10).astype(jnp.bfloat16)
    feat_bf = feat.astype(jnp.bfloat16)

    pp = prepare_params(params, d_out)
    tn = tile_n or _pick_tile(N)

    out = lfa_pallas(lse_flat, feat_bf, pp, d_out, tn)                # (B, N, 2*d_out)
    return jnp.transpose(out, (0, 2, 1))[..., None]                   # (B, 2*d_out, N, 1)


# ----------------------------------------------------------------------------- params
def _conv_init(key, cin, cout):
    kw, kb = jax.random.split(key)
    w = jax.random.normal(kw, (cin, cout), jnp.float32) / jnp.sqrt(cin)
    b = 0.05 * jax.random.normal(kb, (1, cout), jnp.float32)
    return w, b


def _bn_init(key, c, eps=1e-6):
    # eps=1e-6 matches the reference SharedMLP(BatchNorm2d(..., eps=1e-06)).
    kg, kb = jax.random.split(key)
    gamma = 1.0 + 0.1 * jax.random.normal(kg, (1, c), jnp.float32)
    beta = 0.1 * jax.random.normal(kb, (1, c), jnp.float32)
    run_mean = jnp.zeros((1, c), jnp.float32)
    run_var = jnp.ones((1, c), jnp.float32)
    scale = gamma / jnp.sqrt(run_var + eps)
    shift = beta - run_mean * scale
    return scale, shift


def init_params(key, d_in, d_out):
    dh = d_out // 2
    ks = jax.random.split(key, 14)
    p = {}
    p["mlp1_w"], p["mlp1_b"] = _conv_init(ks[0], d_in, dh)

    w, b = _conv_init(ks[1], 10, dh)
    s, t = _bn_init(ks[2], dh)
    p["lse1"] = dict(w=w, b=b, scale=s, shift=t)

    w, b = _conv_init(ks[3], 10, dh)
    s, t = _bn_init(ks[4], dh)
    p["lse2"] = dict(w=w, b=b, scale=s, shift=t)

    wsc = jax.random.normal(ks[5], (d_out, d_out), jnp.float32) / jnp.sqrt(d_out)
    w, b = _conv_init(ks[6], d_out, dh)
    s, t = _bn_init(ks[7], dh)
    p["pool1"] = dict(w_score=wsc, w_mlp=w, b_mlp=b, scale=s, shift=t)

    wsc = jax.random.normal(ks[8], (d_out, d_out), jnp.float32) / jnp.sqrt(d_out)
    w, b = _conv_init(ks[9], d_out, d_out)
    s, t = _bn_init(ks[10], d_out)
    p["pool2"] = dict(w_score=wsc, w_mlp=w, b_mlp=b, scale=s, shift=t)

    p["mlp2_w"], p["mlp2_b"] = _conv_init(ks[11], d_out, 2 * d_out)
    p["sc_w"], p["sc_b"] = _conv_init(ks[12], d_in, 2 * d_out)
    p["sc_scale"], p["sc_shift"] = _bn_init(ks[13], 2 * d_out)
    return p


# ----------------------------------------------------------------------------- main
if __name__ == "__main__":
    B, N, K = 2, 16, 8
    d_in, d_out = 8, 32

    key = jax.random.PRNGKey(0)
    k_pos, k_feat, k_par = jax.random.split(key, 3)
    pos = jax.random.normal(k_pos, (B, N, 3), jnp.float32)               # (B, N, 3)
    features = jax.random.normal(k_feat, (B, d_in, N, 1), jnp.float32)   # NCHW like PyTorch

    params = init_params(k_par, d_in, d_out)

    out = local_feature_aggregation(pos, features, params, K)
    out = jax.block_until_ready(out)
    assert out.shape == (B, 2 * d_out, N, 1), out.shape
    assert bool(jnp.all(jnp.isfinite(out)))
    print("KERNEL_OK")
</pallas_src>

<mosaic_0001>
module attributes {stable_mosaic.version = 11 : i64} {
  func.func @_lfa_kernel(%arg0: i32, %arg1: i32, %arg2: memref<1x128x10xbf16, #tpu.memory_space<vmem>>, %arg3: memref<1x16x8xbf16, #tpu.memory_space<vmem>>, %arg4: memref<8x16xbf16, #tpu.memory_space<vmem>>, %arg5: memref<1x16xf32, #tpu.memory_space<vmem>>, %arg6: memref<10x16xbf16, #tpu.memory_space<vmem>>, %arg7: memref<1x16xf32, #tpu.memory_space<vmem>>, %arg8: memref<16x32xbf16, #tpu.memory_space<vmem>>, %arg9: memref<16x32xbf16, #tpu.memory_space<vmem>>, %arg10: memref<16x16xbf16, #tpu.memory_space<vmem>>, %arg11: memref<16x16xbf16, #tpu.memory_space<vmem>>, %arg12: memref<1x16xf32, #tpu.memory_space<vmem>>, %arg13: memref<10x16xbf16, #tpu.memory_space<vmem>>, %arg14: memref<1x16xf32, #tpu.memory_space<vmem>>, %arg15: memref<16x32xbf16, #tpu.memory_space<vmem>>, %arg16: memref<16x32xbf16, #tpu.memory_space<vmem>>, %arg17: memref<16x32xbf16, #tpu.memory_space<vmem>>, %arg18: memref<16x32xbf16, #tpu.memory_space<vmem>>, %arg19: memref<1x32xf32, #tpu.memory_space<vmem>>, %arg20: memref<32x64xbf16, #tpu.memory_space<vmem>>, %arg21: memref<1x64xf32, #tpu.memory_space<vmem>>, %arg22: memref<8x64xbf16, #tpu.memory_space<vmem>>, %arg23: memref<1x64xf32, #tpu.memory_space<vmem>>, %arg24: memref<1x16x64xf32, #tpu.memory_space<vmem>>) attributes {dimension_semantics = [#tpu.dimension_semantics<parallel>, #tpu.dimension_semantics<parallel>], iteration_bounds = array<i64: 2, 1>, scalar_prefetch = 0 : i64, scratch_operands = 0 : i64, tpu.core_type = #tpu.core_type<tc>, window_params = [{transform_indices = @transform_0, window_bounds = array<i64: 1, 128, 10>}, {transform_indices = @transform_1, window_bounds = array<i64: 1, 16, 8>}, {pipeline_mode = #tpu.pipeline_mode<synchronous>, transform_indices = @transform_2, window_bounds = array<i64: 8, 16>}, {pipeline_mode = #tpu.pipeline_mode<synchronous>, transform_indices = @transform_3, window_bounds = array<i64: 1, 16>}, {pipeline_mode = #tpu.pipeline_mode<synchronous>, transform_indices = @transform_4, window_bounds = array<i64: 10, 16>}, {pipeline_mode = #tpu.pipeline_mode<synchronous>, transform_indices = @transform_5, window_bounds = array<i64: 1, 16>}, {pipeline_mode = #tpu.pipeline_mode<synchronous>, transform_indices = @transform_6, window_bounds = array<i64: 16, 32>}, {pipeline_mode = #tpu.pipeline_mode<synchronous>, transform_indices = @transform_7, window_bounds = array<i64: 16, 32>}, {pipeline_mode = #tpu.pipeline_mode<synchronous>, transform_indices = @transform_8, window_bounds = array<i64: 16, 16>}, {pipeline_mode = #tpu.pipeline_mode<synchronous>, transform_indices = @transform_9, window_bounds = array<i64: 16, 16>}, {pipeline_mode = #tpu.pipeline_mode<synchronous>, transform_indices = @transform_10, window_bounds = array<i64: 1, 16>}, {pipeline_mode = #tpu.pipeline_mode<synchronous>, transform_indices = @transform_11, window_bounds = array<i64: 10, 16>}, {pipeline_mode = #tpu.pipeline_mode<synchronous>, transform_indices = @transform_12, window_bounds = array<i64: 1, 16>}, {pipeline_mode = #tpu.pipeline_mode<synchronous>, transform_indices = @transform_13, window_bounds = array<i64: 16, 32>}, {pipeline_mode = #tpu.pipeline_mode<synchronous>, transform_indices = @transform_14, window_bounds = array<i64: 16, 32>}, {pipeline_mode = #tpu.pipeline_mode<synchronous>, transform_indices = @transform_15, window_bounds = array<i64: 16, 32>}, {pipeline_mode = #tpu.pipeline_mode<synchronous>, transform_indices = @transform_16, window_bounds = array<i64: 16, 32>}, {pipeline_mode = #tpu.pipeline_mode<synchronous>, transform_indices = @transform_17, window_bounds = array<i64: 1, 32>}, {pipeline_mode = #tpu.pipeline_mode<synchronous>, transform_indices = @transform_18, window_bounds = array<i64: 32, 64>}, {pipeline_mode = #tpu.pipeline_mode<synchronous>, transform_indices = @transform_19, window_bounds = array<i64: 1, 64>}, {pipeline_mode = #tpu.pipeline_mode<synchronous>, transform_indices = @transform_20, window_bounds = array<i64: 8, 64>}, {pipeline_mode = #tpu.pipeline_mode<synchronous>, transform_indices = @transform_21, window_bounds = array<i64: 1, 64>}, {transform_indices = @transform_22, window_bounds = array<i64: 1, 16, 64>}]} {
    %c0 = arith.constant 0 : index
    %c0_0 = arith.constant 0 : index
    %c0_1 = arith.constant 0 : index
    %0 = vector.load %arg2[%c0, %c0_0, %c0_1] : memref<1x128x10xbf16, #tpu.memory_space<vmem>>, vector<1x128x10xbf16>
    %1 = vector.shape_cast %0 : vector<1x128x10xbf16> to vector<128x10xbf16>
    %c0_2 = arith.constant 0 : index
    %c0_3 = arith.constant 0 : index
    %c0_4 = arith.constant 0 : index
    %2 = vector.load %arg3[%c0_2, %c0_3, %c0_4] : memref<1x16x8xbf16, #tpu.memory_space<vmem>>, vector<1x16x8xbf16>
    %3 = vector.shape_cast %2 : vector<1x16x8xbf16> to vector<16x8xbf16>
    %c0_5 = arith.constant 0 : index
    %c0_6 = arith.constant 0 : index
    %4 = vector.load %arg4[%c0_5, %c0_6] : memref<8x16xbf16, #tpu.memory_space<vmem>>, vector<8x16xbf16>
    %cst = arith.constant dense<0.000000e+00> : vector<16x16xf32>
    %5 = tpu.matmul %3, %4, %cst {dimension_numbers = #tpu.dot_dimension_numbers<[1], [0], [0], [1], [0, 0, 1, 1], [], []>} : vector<16x8xbf16>, vector<8x16xbf16>, vector<16x16xf32> -> vector<16x16xf32>
    %c0_7 = arith.constant 0 : index
    %c0_8 = arith.constant 0 : index
    %6 = vector.load %arg5[%c0_7, %c0_8] : memref<1x16xf32, #tpu.memory_space<vmem>>, vector<1x16xf32>
    %7 = vector.broadcast %6 : vector<1x16xf32> to vector<16x16xf32>
    %8 = arith.addf %5, %7 : vector<16x16xf32>
    %cst_9 = arith.constant 0.000000e+00 : f32
    %9 = vector.broadcast %cst_9 : f32 to vector<16x16xf32>
    %10 = arith.cmpf oge, %8, %9 : vector<16x16xf32>
    %cst_10 = arith.constant 2.000000e-01 : f32
    %11 = vector.broadcast %cst_10 : f32 to vector<16x16xf32>
    %12 = arith.mulf %11, %8 : vector<16x16xf32>
    %13 = arith.select %10, %8, %12 : vector<16x16xi1>, vector<16x16xf32>
    %c0_11 = arith.constant 0 : index
    %c0_12 = arith.constant 0 : index
    %14 = vector.load %arg6[%c0_11, %c0_12] : memref<10x16xbf16, #tpu.memory_space<vmem>>, vector<10x16xbf16>
    %cst_13 = arith.constant dense<0.000000e+00> : vector<128x16xf32>
    %15 = tpu.matmul %1, %14, %cst_13 {dimension_numbers = #tpu.dot_dimension_numbers<[1], [0], [0], [1], [0, 0, 1, 1], [], []>} : vector<128x10xbf16>, vector<10x16xbf16>, vector<128x16xf32> -> vector<128x16xf32>
    %c0_14 = arith.constant 0 : index
    %c0_15 = arith.constant 0 : index
    %16 = vector.load %arg7[%c0_14, %c0_15] : memref<1x16xf32, #tpu.memory_space<vmem>>, vector<1x16xf32>
    %17 = vector.broadcast %16 : vector<1x16xf32> to vector<128x16xf32>
    %18 = arith.addf %15, %17 : vector<128x16xf32>
    %cst_16 = arith.constant 0.000000e+00 : f32
    %19 = vector.broadcast %cst_16 : f32 to vector<128x16xf32>
    %20 = arith.maximumf %18, %19 : vector<128x16xf32>
    %21 = arith.truncf %13 : vector<16x16xf32> to vector<16x16xbf16>
    %22 = arith.truncf %20 : vector<128x16xf32> to vector<128x16xbf16>
    %c0_17 = arith.constant 0 : index
    %c0_18 = arith.constant 0 : index
    %23 = vector.load %arg8[%c0_17, %c0_18] : memref<16x32xbf16, #tpu.memory_space<vmem>>, vector<16x32xbf16>
    %cst_19 = arith.constant dense<0.000000e+00> : vector<128x32xf32>
    %24 = tpu.matmul %22, %23, %cst_19 {dimension_numbers = #tpu.dot_dimension_numbers<[1], [0], [0], [1], [0, 0, 1, 1], [], []>} : vector<128x16xbf16>, vector<16x32xbf16>, vector<128x32xf32> -> vector<128x32xf32>
    %25 = vector.shape_cast %24 : vector<128x32xf32> to vector<16x8x32xf32>
    %c0_20 = arith.constant 0 : index
    %c0_21 = arith.constant 0 : index
    %26 = vector.load %arg9[%c0_20, %c0_21] : memref<16x32xbf16, #tpu.memory_space<vmem>>, vector<16x32xbf16>
    %cst_22 = arith.constant dense<0.000000e+00> : vector<16x32xf32>
    %27 = tpu.matmul %21, %26, %cst_22 {dimension_numbers = #tpu.dot_dimension_numbers<[1], [0], [0], [1], [0, 0, 1, 1], [], []>} : vector<16x16xbf16>, vector<16x32xbf16>, vector<16x32xf32> -> vector<16x32xf32>
    %28 = vector.shape_cast %27 : vector<16x32xf32> to vector<16x1x32xf32>
    %29 = vector.broadcast %28 : vector<16x1x32xf32> to vector<16x8x32xf32>
    %30 = arith.addf %25, %29 : vector<16x8x32xf32>
    %cst_23 = arith.constant dense<0xFF800000> : vector<16x32xf32>
    %31 = vector.multi_reduction <maximumf>, %30, %cst_23 [1] : vector<16x8x32xf32> to vector<16x32xf32>
    %32 = vector.shape_cast %31 : vector<16x32xf32> to vector<16x1x32xf32>
    %33 = vector.broadcast %32 : vector<16x1x32xf32> to vector<16x8x32xf32>
    %34 = arith.subf %30, %33 : vector<16x8x32xf32>
    %35 = math.exp %34 : vector<16x8x32xf32>
    %cst_24 = arith.constant dense<0.000000e+00> : vector<16x32xf32>
    %36 = vector.multi_reduction <add>, %35, %cst_24 [1] : vector<16x8x32xf32> to vector<16x32xf32>
    %37 = vector.shape_cast %36 : vector<16x32xf32> to vector<16x1x32xf32>
    %38 = tpu.reciprocal %37 {approx = true} : vector<16x1x32xf32> -> vector<16x1x32xf32>
    %39 = vector.broadcast %38 : vector<16x1x32xf32> to vector<16x8x32xf32>
    %40 = arith.mulf %35, %39 : vector<16x8x32xf32>
    %41 = vector.shape_cast %20 : vector<128x16xf32> to vector<16x8x16xf32>
    %42 = vector.extract_strided_slice %40 {offsets = [0, 0, 0], sizes = [16, 8, 16], strides = [1, 1, 1]} : vector<16x8x32xf32> to vector<16x8x16xf32>
    %43 = arith.mulf %42, %41 : vector<16x8x16xf32>
    %cst_25 = arith.constant dense<0.000000e+00> : vector<16x16xf32>
    %44 = vector.multi_reduction <add>, %43, %cst_25 [1] : vector<16x8x16xf32> to vector<16x16xf32>
    %45 = vector.extract_strided_slice %40 {offsets = [0, 0, 16], sizes = [16, 8, 16], strides = [1, 1, 1]} : vector<16x8x32xf32> to vector<16x8x16xf32>
    %cst_26 = arith.constant dense<0.000000e+00> : vector<16x16xf32>
    %46 = vector.multi_reduction <add>, %45, %cst_26 [1] : vector<16x8x16xf32> to vector<16x16xf32>
    %47 = arith.mulf %13, %46 : vector<16x16xf32>
    %48 = arith.truncf %44 : vector<16x16xf32> to vector<16x16xbf16>
    %c0_27 = arith.constant 0 : index
    %c0_28 = arith.constant 0 : index
    %49 = vector.load %arg10[%c0_27, %c0_28] : memref<16x16xbf16, #tpu.memory_space<vmem>>, vector<16x16xbf16>
    %cst_29 = arith.constant dense<0.000000e+00> : vector<16x16xf32>
    %50 = tpu.matmul %48, %49, %cst_29 {dimension_numbers = #tpu.dot_dimension_numbers<[1], [0], [0], [1], [0, 0, 1, 1], [], []>} : vector<16x16xbf16>, vector<16x16xbf16>, vector<16x16xf32> -> vector<16x16xf32>
    %51 = arith.truncf %47 : vector<16x16xf32> to vector<16x16xbf16>
    %c0_30 = arith.constant 0 : index
    %c0_31 = arith.constant 0 : index
    %52 = vector.load %arg11[%c0_30, %c0_31] : memref<16x16xbf16, #tpu.memory_space<vmem>>, vector<16x16xbf16>
    %cst_32 = arith.constant dense<0.000000e+00> : vector<16x16xf32>
    %53 = tpu.matmul %51, %52, %cst_32 {dimension_numbers = #tpu.dot_dimension_numbers<[1], [0], [0], [1], [0, 0, 1, 1], [], []>} : vector<16x16xbf16>, vector<16x16xbf16>, vector<16x16xf32> -> vector<16x16xf32>
    %54 = arith.addf %50, %53 : vector<16x16xf32>
    %c0_33 = arith.constant 0 : index
    %c0_34 = arith.constant 0 : index
    %55 = vector.load %arg12[%c0_33, %c0_34] : memref<1x16xf32, #tpu.memory_space<vmem>>, vector<1x16xf32>
    %56 = vector.broadcast %55 : vector<1x16xf32> to vector<16x16xf32>
    %57 = arith.addf %54, %56 : vector<16x16xf32>
    %cst_35 = arith.constant 0.000000e+00 : f32
    %58 = vector.broadcast %cst_35 : f32 to vector<16x16xf32>
    %59 = arith.maximumf %57, %58 : vector<16x16xf32>
    %c0_36 = arith.constant 0 : index
    %c0_37 = arith.constant 0 : index
    %60 = vector.load %arg13[%c0_36, %c0_37] : memref<10x16xbf16, #tpu.memory_space<vmem>>, vector<10x16xbf16>
    %cst_38 = arith.constant dense<0.000000e+00> : vector<128x16xf32>
    %61 = tpu.matmul %1, %60, %cst_38 {dimension_numbers = #tpu.dot_dimension_numbers<[1], [0], [0], [1], [0, 0, 1, 1], [], []>} : vector<128x10xbf16>, vector<10x16xbf16>, vector<128x16xf32> -> vector<128x16xf32>
    %c0_39 = arith.constant 0 : index
    %c0_40 = arith.constant 0 : index
    %62 = vector.load %arg14[%c0_39, %c0_40] : memref<1x16xf32, #tpu.memory_space<vmem>>, vector<1x16xf32>
    %63 = vector.broadcast %62 : vector<1x16xf32> to vector<128x16xf32>
    %64 = arith.addf %61, %63 : vector<128x16xf32>
    %cst_41 = arith.constant 0.000000e+00 : f32
    %65 = vector.broadcast %cst_41 : f32 to vector<128x16xf32>
    %66 = arith.maximumf %64, %65 : vector<128x16xf32>
    %67 = arith.truncf %59 : vector<16x16xf32> to vector<16x16xbf16>
    %68 = arith.truncf %66 : vector<128x16xf32> to vector<128x16xbf16>
    %c0_42 = arith.constant 0 : index
    %c0_43 = arith.constant 0 : index
    %69 = vector.load %arg15[%c0_42, %c0_43] : memref<16x32xbf16, #tpu.memory_space<vmem>>, vector<16x32xbf16>
    %cst_44 = arith.constant dense<0.000000e+00> : vector<128x32xf32>
    %70 = tpu.matmul %68, %69, %cst_44 {dimension_numbers = #tpu.dot_dimension_numbers<[1], [0], [0], [1], [0, 0, 1, 1], [], []>} : vector<128x16xbf16>, vector<16x32xbf16>, vector<128x32xf32> -> vector<128x32xf32>
    %71 = vector.shape_cast %70 : vector<128x32xf32> to vector<16x8x32xf32>
    %c0_45 = arith.constant 0 : index
    %c0_46 = arith.constant 0 : index
    %72 = vector.load %arg16[%c0_45, %c0_46] : memref<16x32xbf16, #tpu.memory_space<vmem>>, vector<16x32xbf16>
    %cst_47 = arith.constant dense<0.000000e+00> : vector<16x32xf32>
    %73 = tpu.matmul %67, %72, %cst_47 {dimension_numbers = #tpu.dot_dimension_numbers<[1], [0], [0], [1], [0, 0, 1, 1], [], []>} : vector<16x16xbf16>, vector<16x32xbf16>, vector<16x32xf32> -> vector<16x32xf32>
    %74 = vector.shape_cast %73 : vector<16x32xf32> to vector<16x1x32xf32>
    %75 = vector.broadcast %74 : vector<16x1x32xf32> to vector<16x8x32xf32>
    %76 = arith.addf %71, %75 : vector<16x8x32xf32>
    %cst_48 = arith.constant dense<0xFF800000> : vector<16x32xf32>
    %77 = vector.multi_reduction <maximumf>, %76, %cst_48 [1] : vector<16x8x32xf32> to vector<16x32xf32>
    %78 = vector.shape_cast %77 : vector<16x32xf32> to vector<16x1x32xf32>
    %79 = vector.broadcast %78 : vector<16x1x32xf32> to vector<16x8x32xf32>
    %80 = arith.subf %76, %79 : vector<16x8x32xf32>
    %81 = math.exp %80 : vector<16x8x32xf32>
    %cst_49 = arith.constant dense<0.000000e+00> : vector<16x32xf32>
    %82 = vector.multi_reduction <add>, %81, %cst_49 [1] : vector<16x8x32xf32> to vector<16x32xf32>
    %83 = vector.shape_cast %82 : vector<16x32xf32> to vector<16x1x32xf32>
    %84 = tpu.reciprocal %83 {approx = true} : vector<16x1x32xf32> -> vector<16x1x32xf32>
    %85 = vector.broadcast %84 : vector<16x1x32xf32> to vector<16x8x32xf32>
    %86 = arith.mulf %81, %85 : vector<16x8x32xf32>
    %87 = vector.shape_cast %66 : vector<128x16xf32> to vector<16x8x16xf32>
    %88 = vector.extract_strided_slice %86 {offsets = [0, 0, 0], sizes = [16, 8, 16], strides = [1, 1, 1]} : vector<16x8x32xf32> to vector<16x8x16xf32>
    %89 = arith.mulf %88, %87 : vector<16x8x16xf32>
    %cst_50 = arith.constant dense<0.000000e+00> : vector<16x16xf32>
    %90 = vector.multi_reduction <add>, %89, %cst_50 [1] : vector<16x8x16xf32> to vector<16x16xf32>
    %91 = vector.extract_strided_slice %86 {offsets = [0, 0, 16], sizes = [16, 8, 16], strides = [1, 1, 1]} : vector<16x8x32xf32> to vector<16x8x16xf32>
    %cst_51 = arith.constant dense<0.000000e+00> : vector<16x16xf32>
    %92 = vector.multi_reduction <add>, %91, %cst_51 [1] : vector<16x8x16xf32> to vector<16x16xf32>
    %93 = arith.mulf %59, %92 : vector<16x16xf32>
    %94 = arith.truncf %90 : vector<16x16xf32> to vector<16x16xbf16>
    %c0_52 = arith.constant 0 : index
    %c0_53 = arith.constant 0 : index
    %95 = vector.load %arg17[%c0_52, %c0_53] : memref<16x32xbf16, #tpu.memory_space<vmem>>, vector<16x32xbf16>
    %cst_54 = arith.constant dense<0.000000e+00> : vector<16x32xf32>
    %96 = tpu.matmul %94, %95, %cst_54 {dimension_numbers = #tpu.dot_dimension_numbers<[1], [0], [0], [1], [0, 0, 1, 1], [], []>} : vector<16x16xbf16>, vector<16x32xbf16>, vector<16x32xf32> -> vector<16x32xf32>
    %97 = arith.truncf %93 : vector<16x16xf32> to vector<16x16xbf16>
    %c0_55 = arith.constant 0 : index
    %c0_56 = arith.constant 0 : index
    %98 = vector.load %arg18[%c0_55, %c0_56] : memref<16x32xbf16, #tpu.memory_space<vmem>>, vector<16x32xbf16>
    %cst_57 = arith.constant dense<0.000000e+00> : vector<16x32xf32>
    %99 = tpu.matmul %97, %98, %cst_57 {dimension_numbers = #tpu.dot_dimension_numbers<[1], [0], [0], [1], [0, 0, 1, 1], [], []>} : vector<16x16xbf16>, vector<16x32xbf16>, vector<16x32xf32> -> vector<16x32xf32>
    %100 = arith.addf %96, %99 : vector<16x32xf32>
    %c0_58 = arith.constant 0 : index
    %c0_59 = arith.constant 0 : index
    %101 = vector.load %arg19[%c0_58, %c0_59] : memref<1x32xf32, #tpu.memory_space<vmem>>, vector<1x32xf32>
    %102 = vector.broadcast %101 : vector<1x32xf32> to vector<16x32xf32>
    %103 = arith.addf %100, %102 : vector<16x32xf32>
    %cst_60 = arith.constant 0.000000e+00 : f32
    %104 = vector.broadcast %cst_60 : f32 to vector<16x32xf32>
    %105 = arith.maximumf %103, %104 : vector<16x32xf32>
    %106 = arith.truncf %105 : vector<16x32xf32> to vector<16x32xbf16>
    %c0_61 = arith.constant 0 : index
    %c0_62 = arith.constant 0 : index
    %107 = vector.load %arg20[%c0_61, %c0_62] : memref<32x64xbf16, #tpu.memory_space<vmem>>, vector<32x64xbf16>
    %cst_63 = arith.constant dense<0.000000e+00> : vector<16x64xf32>
    %108 = tpu.matmul %106, %107, %cst_63 {dimension_numbers = #tpu.dot_dimension_numbers<[1], [0], [0], [1], [0, 0, 1, 1], [], []>} : vector<16x32xbf16>, vector<32x64xbf16>, vector<16x64xf32> -> vector<16x64xf32>
    %c0_64 = arith.constant 0 : index
    %c0_65 = arith.constant 0 : index
    %109 = vector.load %arg21[%c0_64, %c0_65] : memref<1x64xf32, #tpu.memory_space<vmem>>, vector<1x64xf32>
    %110 = vector.broadcast %109 : vector<1x64xf32> to vector<16x64xf32>
    %111 = arith.addf %108, %110 : vector<16x64xf32>
    %c0_66 = arith.constant 0 : index
    %c0_67 = arith.constant 0 : index
    %112 = vector.load %arg22[%c0_66, %c0_67] : memref<8x64xbf16, #tpu.memory_space<vmem>>, vector<8x64xbf16>
    %cst_68 = arith.constant dense<0.000000e+00> : vector<16x64xf32>
    %113 = tpu.matmul %3, %112, %cst_68 {dimension_numbers = #tpu.dot_dimension_numbers<[1], [0], [0], [1], [0, 0, 1, 1], [], []>} : vector<16x8xbf16>, vector<8x64xbf16>, vector<16x64xf32> -> vector<16x64xf32>
    %c0_69 = arith.constant 0 : index
    %c0_70 = arith.constant 0 : index
    %114 = vector.load %arg23[%c0_69, %c0_70] : memref<1x64xf32, #tpu.memory_space<vmem>>, vector<1x64xf32>
    %115 = vector.broadcast %114 : vector<1x64xf32> to vector<16x64xf32>
    %116 = arith.addf %113, %115 : vector<16x64xf32>
    %117 = arith.addf %111, %116 : vector<16x64xf32>
    %cst_71 = arith.constant 0.000000e+00 : f32
    %118 = vector.broadcast %cst_71 : f32 to vector<16x64xf32>
    %119 = arith.cmpf oge, %117, %118 : vector<16x64xf32>
    %cst_72 = arith.constant 0.00999999977 : f32
    %120 = vector.broadcast %cst_72 : f32 to vector<16x64xf32>
    %121 = arith.mulf %120, %117 : vector<16x64xf32>
    %122 = arith.select %119, %117, %121 : vector<16x64xi1>, vector<16x64xf32>
    %c0_73 = arith.constant 0 : index
    %c0_74 = arith.constant 0 : index
    %c0_75 = arith.constant 0 : index
    %123 = vector.load %arg24[%c0_73, %c0_74, %c0_75] : memref<1x16x64xf32, #tpu.memory_space<vmem>>, vector<1x16x64xf32>
    %124 = vector.shape_cast %123 : vector<1x16x64xf32> to vector<16x64xf32>
    %125 = vector.shape_cast %122 : vector<16x64xf32> to vector<1x16x64xf32>
    tpu.vector_store %arg24[%c0_73, %c0_74, %c0_75], %125 {strides = array<i32>} : memref<1x16x64xf32, #tpu.memory_space<vmem>>, vector<1x16x64xf32>,
    return
  }
  func.func @transform_0(%arg0: i32, %arg1: i32) -> (i32, i32, i32) {
    %c0_i32 = arith.constant 0 : i32
    %c0_i32_0 = arith.constant 0 : i32
    return %arg0, %arg1, %c0_i32 : i32, i32, i32
  }
  func.func @transform_1(%arg0: i32, %arg1: i32) -> (i32, i32, i32) {
    %c0_i32 = arith.constant 0 : i32
    %c0_i32_0 = arith.constant 0 : i32
    return %arg0, %arg1, %c0_i32 : i32, i32, i32
  }
  func.func @transform_2(%arg0: i32, %arg1: i32) -> (i32, i32) {
    %c0_i32 = arith.constant 0 : i32
    %c0_i32_0 = arith.constant 0 : i32
    %c0_i32_1 = arith.constant 0 : i32
    return %c0_i32, %c0_i32_0 : i32, i32
  }
  func.func @transform_3(%arg0: i32, %arg1: i32) -> (i32, i32) {
    %c0_i32 = arith.constant 0 : i32
    %c0_i32_0 = arith.constant 0 : i32
    %c0_i32_1 = arith.constant 0 : i32
    return %c0_i32, %c0_i32_0 : i32, i32
  }
  func.func @transform_4(%arg0: i32, %arg1: i32) -> (i32, i32) {
    %c0_i32 = arith.constant 0 : i32
    %c0_i32_0 = arith.constant 0 : i32
    %c0_i32_1 = arith.constant 0 : i32
    return %c0_i32, %c0_i32_0 : i32, i32
  }
  func.func @transform_5(%arg0: i32, %arg1: i32) -> (i32, i32) {
    %c0_i32 = arith.constant 0 : i32
    %c0_i32_0 = arith.constant 0 : i32
    %c0_i32_1 = arith.constant 0 : i32
    return %c0_i32, %c0_i32_0 : i32, i32
  }
  func.func @transform_6(%arg0: i32, %arg1: i32) -> (i32, i32) {
    %c0_i32 = arith.constant 0 : i32
    %c0_i32_0 = arith.constant 0 : i32
    %c0_i32_1 = arith.constant 0 : i32
    return %c0_i32, %c0_i32_0 : i32, i32
  }
  func.func @transform_7(%arg0: i32, %arg1: i32) -> (i32, i32) {
    %c0_i32 = arith.constant 0 : i32
    %c0_i32_0 = arith.constant 0 : i32
    %c0_i32_1 = arith.constant 0 : i32
    return %c0_i32, %c0_i32_0 : i32, i32
  }
  func.func @transform_8(%arg0: i32, %arg1: i32) -> (i32, i32) {
    %c0_i32 = arith.constant 0 : i32
    %c0_i32_0 = arith.constant 0 : i32
    %c0_i32_1 = arith.constant 0 : i32
    return %c0_i32, %c0_i32_0 : i32, i32
  }
  func.func @transform_9(%arg0: i32, %arg1: i32) -> (i32, i32) {
    %c0_i32 = arith.constant 0 : i32
    %c0_i32_0 = arith.constant 0 : i32
    %c0_i32_1 = arith.constant 0 : i32
    return %c0_i32, %c0_i32_0 : i32, i32
  }
  func.func @transform_10(%arg0: i32, %arg1: i32) -> (i32, i32) {
    %c0_i32 = arith.constant 0 : i32
    %c0_i32_0 = arith.constant 0 : i32
    %c0_i32_1 = arith.constant 0 : i32
    return %c0_i32, %c0_i32_0 : i32, i32
  }
  func.func @transform_11(%arg0: i32, %arg1: i32) -> (i32, i32) {
    %c0_i32 = arith.constant 0 : i32
    %c0_i32_0 = arith.constant 0 : i32
    %c0_i32_1 = arith.constant 0 : i32
    return %c0_i32, %c0_i32_0 : i32, i32
  }
  func.func @transform_12(%arg0: i32, %arg1: i32) -> (i32, i32) {
    %c0_i32 = arith.constant 0 : i32
    %c0_i32_0 = arith.constant 0 : i32
    %c0_i32_1 = arith.constant 0 : i32
    return %c0_i32, %c0_i32_0 : i32, i32
  }
  func.func @transform_13(%arg0: i32, %arg1: i32) -> (i32, i32) {
    %c0_i32 = arith.constant 0 : i32
    %c0_i32_0 = arith.constant 0 : i32
    %c0_i32_1 = arith.constant 0 : i32
    return %c0_i32, %c0_i32_0 : i32, i32
  }
  func.func @transform_14(%arg0: i32, %arg1: i32) -> (i32, i32) {
    %c0_i32 = arith.constant 0 : i32
    %c0_i32_0 = arith.constant 0 : i32
    %c0_i32_1 = arith.constant 0 : i32
    return %c0_i32, %c0_i32_0 : i32, i32
  }
  func.func @transform_15(%arg0: i32, %arg1: i32) -> (i32, i32) {
    %c0_i32 = arith.constant 0 : i32
    %c0_i32_0 = arith.constant 0 : i32
    %c0_i32_1 = arith.constant 0 : i32
    return %c0_i32, %c0_i32_0 : i32, i32
  }
  func.func @transform_16(%arg0: i32, %arg1: i32) -> (i32, i32) {
    %c0_i32 = arith.constant 0 : i32
    %c0_i32_0 = arith.constant 0 : i32
    %c0_i32_1 = arith.constant 0 : i32
    return %c0_i32, %c0_i32_0 : i32, i32
  }
  func.func @transform_17(%arg0: i32, %arg1: i32) -> (i32, i32) {
    %c0_i32 = arith.constant 0 : i32
    %c0_i32_0 = arith.constant 0 : i32
    %c0_i32_1 = arith.constant 0 : i32
    return %c0_i32, %c0_i32_0 : i32, i32
  }
  func.func @transform_18(%arg0: i32, %arg1: i32) -> (i32, i32) {
    %c0_i32 = arith.constant 0 : i32
    %c0_i32_0 = arith.constant 0 : i32
    %c0_i32_1 = arith.constant 0 : i32
    return %c0_i32, %c0_i32_0 : i32, i32
  }
  func.func @transform_19(%arg0: i32, %arg1: i32) -> (i32, i32) {
    %c0_i32 = arith.constant 0 : i32
    %c0_i32_0 = arith.constant 0 : i32
    %c0_i32_1 = arith.constant 0 : i32
    return %c0_i32, %c0_i32_0 : i32, i32
  }
  func.func @transform_20(%arg0: i32, %arg1: i32) -> (i32, i32) {
    %c0_i32 = arith.constant 0 : i32
    %c0_i32_0 = arith.constant 0 : i32
    %c0_i32_1 = arith.constant 0 : i32
    return %c0_i32, %c0_i32_0 : i32, i32
  }
  func.func @transform_21(%arg0: i32, %arg1: i32) -> (i32, i32) {
    %c0_i32 = arith.constant 0 : i32
    %c0_i32_0 = arith.constant 0 : i32
    %c0_i32_1 = arith.constant 0 : i32
    return %c0_i32, %c0_i32_0 : i32, i32
  }
  func.func @transform_22(%arg0: i32, %arg1: i32) -> (i32, i32, i32) {
    %c0_i32 = arith.constant 0 : i32
    %c0_i32_0 = arith.constant 0 : i32
    return %arg0, %arg1, %c0_i32 : i32, i32, i32
  }
}

</mosaic_0001>

<bundles_post_ra>
// kernel: tpu_custom_call.1
= control target key start
LH: loop header
LB: loop body
LE: loop exit
PB: predicated region body
PF: predicated region fallthrough
CT: control target
= control target key end

     0   :  { %s5840_s0 = inlined_call_operand.vmem [shape: bf16[2,128,10], index: 0, kind: input, shape index: {}]   ;;  %s5841_s1 = inlined_call_operand.vmem [shape: bf16[2,16,8], index: 1, kind: input, shape index: {}]   ;;  %s5842_s2 = inlined_call_operand.vmem [shape: bf16[8,16], index: 2, kind: input, shape index: {}]   ;;  %s5843_s3 = inlined_call_operand.vmem [shape: f32[1,16], index: 3, kind: input, shape index: {}]   ;;  %s5844_s4 = inlined_call_operand.vmem [shape: bf16[10,16], index: 4, kind: input, shape index: {}]   ;;  %s5845_s5 = inlined_call_operand.vmem [shape: f32[1,16], index: 5, kind: input, shape index: {}]   ;;  %s5846_s6 = inlined_call_operand.vmem [shape: bf16[16,32], index: 6, kind: input, shape index: {}]   ;;  %s5847_s7 = inlined_call_operand.vmem [shape: bf16[16,32], index: 7, kind: input, shape index: {}]   ;;  %s5848_s8 = inlined_call_operand.vmem [shape: bf16[16,16], index: 8, kind: input, shape index: {}]   ;;  %s5849_s9 = inlined_call_operand.vmem [shape: bf16[16,16], index: 9, kind: input, shape index: {}]   ;;  %s5850_s10 = inlined_call_operand.vmem [shape: f32[1,16], index: 10, kind: input, shape index: {}]   ;;  %s5851_s11 = inlined_call_operand.vmem [shape: bf16[10,16], index: 11, kind: input, shape index: {}]   ;;  %s5852_s12 = inlined_call_operand.vmem [shape: f32[1,16], index: 12, kind: input, shape index: {}]   ;;  %s5853_s13 = inlined_call_operand.vmem [shape: bf16[16,32], index: 13, kind: input, shape index: {}]   ;;  %s5854_s14 = inlined_call_operand.vmem [shape: bf16[16,32], index: 14, kind: input, shape index: {}]   ;;  %s5855_s15 = inlined_call_operand.vmem [shape: bf16[16,32], index: 15, kind: input, shape index: {}]   ;;  %s5856_s16 = inlined_call_operand.vmem [shape: bf16[16,32], index: 16, kind: input, shape index: {}]   ;;  %s5857_s17 = inlined_call_operand.vmem [shape: f32[1,32], index: 17, kind: input, shape index: {}]   ;;  %s5858_s18 = inlined_call_operand.vmem [shape: bf16[32,64], index: 18, kind: input, shape index: {}]   ;;  %s5859_s19 = inlined_call_operand.vmem [shape: f32[1,64], index: 19, kind: input, shape index: {}]   ;;  %s5860_s20 = inlined_call_operand.vmem [shape: bf16[8,64], index: 20, kind: input, shape index: {}]   ;;  %s5861_s21 = inlined_call_operand.vmem [shape: f32[1,64], index: 21, kind: input, shape index: {}]   ;;  %s5862_s22 = inlined_call_operand.hbm [shape: f32[2,16,64], index: 22, kind: output, shape index: {}]  }
   0x1   :  { %5913 = sst [smem:[#allocation16_spill]] %s5840_s0 }
   0x2   :  { %5914 = sst [smem:[#allocation17_spill]] %s5841_s1 }
   0x3   :  { %5915 = sst [smem:[#allocation18_spill]] %s5842_s2 }
   0x4   :  { %5916 = sst [smem:[#allocation19_spill]] %s5843_s3 }
   0x5   :  { %5917 = sst [smem:[#allocation20_spill]] %s5844_s4 }
   0x6   :  { %5918 = sst [smem:[#allocation21_spill]] %s5845_s5 }
   0x7   :  { %5919 = sst [smem:[#allocation22_spill]] %s5846_s6 }
   0x8   :  { %5920 = sst [smem:[#allocation23_spill]] %s5862_s22 }
   0x9   :  { %27 = vsyncpa [#allocation3], 0 }
   0xa   :  { %29 = vsyncpa [#allocation3 + $0x1], 0  ;;  %s4411_s3 = smov 0   ;;  %s4413_s28 = smov 0  }
   0xb   :  { %s4415_s29 = smov 0   ;;  %s4417_s30 = smov 0  }
   0xc   :  { %s4419_s4 = smov 0   ;;  %s4421_s0 = smov 0  }
   0xd LB: > { %5921 = sst [smem:[#allocation5_spill]] %s4267_s3  ;;  %s3710_s23 = sadd.s32 4294967295, %s4287_s0   ;;  %s4287_s0 = sphi %s4421_s0, %s35_s0   ;;  %s4283_s4 = sphi %s4419_s4, %s5998_s4   ;;  %s4279_s30 = sphi %s4417_s30, %s5997_s30   ;;  %s4275_s29 = sphi %s4415_s29, %s5996_s29   ;;  %s4271_s28 = sphi %s4413_s28, %s6000_s28   ;;  %s4267_s3 = sphi %s4411_s3, %s5999_s3  }
   0xe   : > { %5922 = sst [smem:[#allocation6_spill]] %s4275_s29  ;;  %s3711_s1 = sadd.s32 4294967294, %s4287_s0  }
   0xf   : > { %5923 = sst [smem:[#allocation7_spill]] %s4283_s4  ;;  %s47_s5 = sadd.s32 1, %s4283_s4 }
  0x10   : > { %5924 = sst [smem:[#allocation8_spill]] %s4287_s0  ;;  %s532_s24 = sadd.s32 1, %s4275_s29 }
  0x11   : > { %p49_p0 = scmp.ge.s32.totalorder %s47_s5, 2  ;;  %p542_p1 = scmp.ne.s32.totalorder %s4275_s29, %s4271_s28 }
  0x12   : > { %p543_p2 = scmp.eq.s32.totalorder %s3710_s23, 1  ;;  %p548_p3 = scmp.ne.s32.totalorder %s4271_s28, %s4267_s3 }
  0x13   : > { %s6002_s5 = smov (%p49_p0, %s47_s5), 0  ;;  %p549_p5 = scmp.eq.s32.totalorder %s3711_s1, 1 }
  0x14   : > { %5925 = sst [smem:[#allocation9_spill]] %s6002_s5  ;;  %p4451_p4 = por %p543_p2, %p542_p1 }
  0x15   : > { %s527_s25 = ssub.s32 %s4283_s4, %s6002_s5  ;;  %p3714_p6 = scmp.ge.s32.totalorder %s4287_s0, 1 }
  0x16   : > { %p530_p7 = scmp.eq.s32.totalorder %s527_s25, 0  ;;  %p4458_p8 = por %p549_p5, %p548_p3 }
  0x17   : > { %p653_p9 = scmp.lt.s32.totalorder %s4287_s0, 3 }
  0x18   : > { %s5927_s26 = scalar_select %p4458_p8, 1, 0 }
  0x19   : > { %s4464_s2 = scalar_select %p530_p7, %s4275_s29, %s532_s24  }
  0x1a   : > { %5928 = sst [smem:[#allocation10_spill]] %s5927_s26  ;;  %p654_p10 = pnand %p3714_p6, %p653_p9 }
  0x1b   : > { %5929 = sst [smem:[#allocation11_spill]] %s4464_s2 }
  0x1c   : > { %657 = sbr.rel (%p654_p10) target bundleno = 1964 (0x7ac), region = 108 }
  0x23   : > { %s5930_s3 = sld [smem:[#allocation18_spill]]  ;;  %vm785_vm0 = vcmask 1043456   ;;  %v5871_v1 = vmov 0.0   ;;  %s5931_s5 = sld [smem:[#allocation20_spill]]  ;;  %vm915_vm1 = vcmask 1044480   ;;  %vm4290_vm2 = vmmov 0  }
  0x24   : > { %3852 = vmatprep.subr.bf16.mxu0 %v5871_v1  ;;  %p729_p11 = scmp.lt.s32.totalorder %s4279_s30, 1  ;;  %3854 = vmatprep.mubr.msk.bf16.mxu0 %vm4290_vm2, %v5871_v1  ;;  %vm781_vm3 = vcmask 64512   ;;  %s5933_s29 = sld [smem:[#allocation17_spill]]  ;;  %v4061_v5 = vld [vmem:[%s5847_s7] sm:$0xff]   ;;  %vm890_vm4 = vcmask 80896   ;;  %vm1049_vm7 = vcmask 130048  }
  0x25   : > { %s5934_s4 = sld [smem:[#allocation22_spill]]  ;;  %s5936_s23 = sld [smem:[#allocation21_spill]]  ;;  %vm1419_vm8 = vcmask 261120   ;;  %vm1852_vm9 = vcmask 261248   ;;  %vm1981_vm10 = vcmask 1041409   ;;  %vm1983_vm11 = vcmask 1042434  }
  0x26   : > { %vm1985_vm12 = vcmask 1043459   ;;  %vm1987_vm13 = vcmask 1044484   ;;  %vm1989_vm14 = vcmask 1045509   ;;  %vm1991_vm15 = vcmask 1046534   ;;  %s4293_s2 = smov [#allocation2]  }
  0x29   : > { %v768_v0 = vld [vmem:[%s5930_s3] sm:$0xf]  ;;  %s730_s3 = scalar_select %p729_p11, %s4279_s30, 1 }
  0x2a   : > { %v787_v2 = vsel %vm785_vm0, %v768_v0, 0  ;;  %v4051_v3 = vld [vmem:[%s5931_s5] sm:$0x1f]   ;;  %s5932_s5 = sld [smem:[#allocation16_spill]] }
  0x2b   : > { %3853 = vmatpush3.bf16.msra.mxu0 %v787_v2  ;;  %3988 = vmatprep.subr.msk.bf16.mxu1 %vm915_vm1, %v4051_v3  ;;  %v917_v4 = vsel %vm915_vm1, %v4051_v3, 0  ;;  %s3794_s24 = sshll.u32 %s730_s3, 6  ;;  %s3795_s27 = sshll.u32 %s730_s3, 3  ;;  %v4062_v15 = vld [vmem:[%s5934_s4] sm:$0xff]  }
  0x2c   : > { %3859 = vmatpush3.bf16.msra.mxu1 %v917_v4  ;;  %s4489_s26 = scalar_lea.vmem %s5933_s29, %s3795_s27  ;;  %3876 = vmatprep.subr.bf16.mxu0 %v4062_v15  ;;  %s5935_s3 = sld [smem:[#allocation19_spill]]  ;;  %v4525_v20 = vld [vmem:[%s5936_s23] ss:$0 sm:$0xff] }
  0x2d   : > { %3894 = vmatprep.subr.bf16.mxu1 %v5871_v1  ;;  %v4052_v6 = vld [vmem:[%s4489_s26] sm:$0xff]   ;;  %s4292_s4 = smov 112   ;;  %s725_s29 = sand.u32 1, %s4271_s28  }
  0x2e   : > { %3855 = vmatmul.mubr.msk.bf16.vlgmr.msra.gmra.mrb[0].mxu0 %vm781_vm3, %v4052_v6 }
  0x2f   : > { %3877 = vmatpush3.bf16.msra.mxu0 %v4062_v15 }
  0x30   : > { %s4484_s25 = scalar_lea.vmem %s5932_s5, %s3794_s24  ;;  %3900 = vmatprep.subr.bf16.mxu0 %v5871_v1  ;;  %s3715_s24 = sshll.u32 %s725_s29, 4 }
  0x31   : > { %v4053_v7 = vld [vmem:[%s4484_s25] sm:$0xff]   ;;  %v4054_v8 = vld [vmem:[%s4484_s25 + $0x8] sm:$0xff]   ;;  %v4055_v9 = vld [vmem:[%s4484_s25 + $0x10] sm:$0xff]   ;;  %s727_s27 = scalar_lea.vmem [#allocation2], %s3715_s24  ;;  %s5991_s5 = sld [smem:[#allocation23_spill]] }
  0x32   : > { %3860 = vmatprep.mubr.msk.bf16.mxu1 %vm890_vm4, %v4053_v7  ;;  %v4056_v10 = vld [vmem:[%s4484_s25 + $0x18] sm:$0xff]   ;;  %v4057_v11 = vld [vmem:[%s4484_s25 + $0x20] sm:$0xff]   ;;  %v4058_v12 = vld [vmem:[%s4484_s25 + $0x28] sm:$0xff]   ;;  %s3613_s23 = sshll.u32 %s727_s27, 4  ;;  %s5792_s23 = int_to_ptr.vmem [resolvable:$true] %s3613_s23 }
  0x33   : > { %3861 = vmatmul.mubr.msk.bf16.vlgmr.msra.gmra.mrb[0].mxu1 %vm890_vm4, %v4054_v8  ;;  %v4059_v13 = vld [vmem:[%s4484_s25 + $0x30] sm:$0xff]   ;;  %v4060_v14 = vld [vmem:[%s4484_s25 + $0x38] sm:$0xff]   ;;  %v3720_v16 = vld [vmem:[%s5935_s3] ss:$0 sm:$0xff]  ;;  %s4209_s0 = scalar_lea.vmem %s5792_s23, 256  ;;  %s4213_s3 = sshll.u32 %s4293_s2, 4  ;;  %s4214_s3 = int_to_ptr.vmem [resolvable:$false] %s4213_s3 }
  0x34   : > { %3864 = vmatprep.mubr.msk.bf16.mxu1 %vm890_vm4, %v4055_v9  ;;  %3895 = vmatpush3.bf16.msra.mxu1 %v4061_v5  ;;  %p4210_p12 = scmp.ne.s32.totalorder %s5792_s23, %s4209_s0  ;;  %p4216_p1 = scmp.lt.s32.totalorder %s5792_s23, %s4214_s3 }
  0x35   : > { %3906 = vmatprep.subr.bf16.mxu1 %v5871_v1 }
  0x36   : > { %p4211_p13 = pnand %p4210_p12, %p4451_p4 }
  0x38   : > { %p4212_p0 = pneg %p4211_p13 }
  0x3b   : > { %3865 = vmatmul.mubr.msk.bf16.gmra.mrb[4].mxu1 %vm890_vm4, %v4056_v10 }
  0x3c   : > { %3868 = vmatprep.mubr.msk.bf16.mxu1 %vm890_vm4, %v4057_v11 }
  0x43   : > { %3869 = vmatmul.mubr.msk.bf16.gmra.mrb[8].mxu1 %vm890_vm4, %v4058_v12 }
  0x44   : > { %3872 = vmatprep.mubr.msk.bf16.mxu1 %vm890_vm4, %v4059_v13 }
  0x4b   : > { %3873 = vmatmul.mubr.msk.bf16.gmra.mrb[12].mxu1 %vm890_vm4, %v4060_v14 }
  0x4c   : > { %3896 = vmatprep.mubr.msk.bf16.mxu1 %vm4290_vm2, %v5871_v1 }
 0x101   : > { %v823_v17 = vpop.f32.mrb[0].mxu0 }
 0x102   : > { %v824_v18 = vadd.f32 %v3720_v16, %v823_v17  ;;  %v3856_v19 = vpop.f32.mrb[1].mxu0 }
 0x103   : > { %v826_v22 = vpop.f32.mrb[2].mxu0 }
 0x104   : > { %vm830_vm5 = vcmp.ge.f32.partialorder %v824_v18, 0.0  ;;  %v832_v23 = vmul.f32 0.2, %v824_v18  ;;  %v827_v24 = vadd.f32 %v3720_v16, %v826_v22  ;;  %v3857_v26 = vpop.f32.mrb[3].mxu0 }
 0x106   : > { %v3862_v21 = vpop.f32.mrb[0].mxu1  ;;  %v4530_v29 = vsel %vm830_vm5, %v824_v18, %v832_v23  ;;  %vm831_vm6 = vcmp.ge.f32.partialorder %v827_v24, 0.0  ;;  %v833_v31 = vmul.f32 0.2, %v827_v24  ;;  %vm1993_vm5 = vcmask 1047559  }
 0x107   : > { %v953_v25 = vpop.f32.mrb[1].mxu1  ;;  %5937 = vst [vmem:[#allocation12_spill] sm:$0xff] %v4530_v29  ;;  %v4533_v30 = vadd.f32 %v3862_v21, %v4525_v20 }
 0x108   : > { %v4528_v27 = vadd.f32 %v4525_v20, %v953_v25  ;;  %v3863_v28 = vpop.f32.mrb[2].mxu1  ;;  %v4541_v35 = vsel %vm831_vm6, %v827_v24, %v833_v31  ;;  %v1229_v24 = vlaneseq }
 0x109   : > { %v956_v32 = vpop.f32.mrb[3].mxu1  ;;  %v4536_v33 = vadd.f32 %v3863_v28, %v4525_v20  ;;  %5938 = vst [vmem:[#allocation13_spill] sm:$0xff] %v4541_v35  ;;  %v1032_v36 = vpack.c.bf16 %v4541_v35, %v4530_v29  ;;  %v5887_v40 = vmax.f32 %v4533_v30, 0.0 }
 0x10a   : > { %v4539_v34 = vadd.f32 %v4525_v20, %v956_v32  ;;  %v5888_v37 = vmax.f32 %v4528_v27, 0.0  ;;  %v1230_v26 = vshrl.u32 %v1229_v24, 7 }
 0x10b   : > { %v5885_v38 = vmax.f32 %v4536_v33, 0.0  ;;  %3897 = vmatmul.mubr.msk.bf16.vlgmr.msra.gmra.mrb[16].mxu1 %vm1049_vm7, %v1032_v36 }
 0x10c   : > { %v5886_v39 = vmax.f32 %v4539_v34, 0.0  ;;  %3908 = vmatprep.mubr.msk.bf16.mxu1 %vm4290_vm2, %v5871_v1 }
 0x10d   : > { %v1034_v43 = vpack.c.bf16 %v5885_v38, %v5887_v40 }
 0x10e   : > { %v1033_v41 = vpack.c.bf16 %v5886_v39, %v5888_v37  ;;  %v3866_v42 = vpop.f32.mrb[4].mxu1 }
 0x10f   : > { %v969_v44 = vpop.f32.mrb[5].mxu1  ;;  %v4565_v47 = vadd.f32 %v3866_v42, %v4525_v20  ;;  %v4645_v42 = vsub.s32 0, %v1230_v26 }
 0x110   : > { %v4561_v45 = vadd.f32 %v4525_v20, %v969_v44  ;;  %v3867_v46 = vpop.f32.mrb[6].mxu1  ;;  %3878 = vmatprep.mubr.msk.bf16.mxu0 %vm1049_vm7, %v1033_v41 }
 0x111   : > { %v4568_v48 = vadd.f32 %v3867_v46, %v4525_v20  ;;  %v972_v49 = vpop.f32.mrb[7].mxu1  ;;  %3879 = vmatmul.mubr.msk.bf16.vlgmr.msra.gmra.mrb[4].mxu0 %vm1049_vm7, %v1034_v43  ;;  %v5882_v54 = vmax.f32 %v4565_v47, 0.0 }
 0x112   : > { %v4572_v50 = vadd.f32 %v4525_v20, %v972_v49  ;;  %v5884_v52 = vmax.f32 %v4561_v45, 0.0 }
 0x113   : > { %v5881_v51 = vmax.f32 %v4568_v48, 0.0 }
 0x114   : > { %v5883_v53 = vmax.f32 %v4572_v50, 0.0 }
 0x115   : > { %v1036_v57 = vpack.c.bf16 %v5881_v51, %v5882_v54 }
 0x116   : > { %v1035_v55 = vpack.c.bf16 %v5883_v53, %v5884_v52  ;;  %v3870_v56 = vpop.f32.mrb[8].mxu1 }
 0x117   : > { %v985_v58 = vpop.f32.mrb[9].mxu1  ;;  %v4591_v61 = vadd.f32 %v3870_v56, %v4525_v20 }
 0x118   : > { %v4587_v59 = vadd.f32 %v4525_v20, %v985_v58  ;;  %v3871_v60 = vpop.f32.mrb[10].mxu1  ;;  %3882 = vmatprep.mubr.msk.bf16.mxu0 %vm1049_vm7, %v1035_v55 }
 0x119   : > { %v4594_v62 = vadd.f32 %v3871_v60, %v4525_v20  ;;  %v988_v63 = vpop.f32.mrb[11].mxu1  ;;  %3883 = vmatmul.mubr.msk.bf16.gmra.mrb[8].mxu0 %vm1049_vm7, %v1036_v57  ;;  %v5880_v5 = vmax.f32 %v4591_v61, 0.0 }
 0x11a   : > { %v4598_v0 = vadd.f32 %v4525_v20, %v988_v63  ;;  %v5879_v3 = vmax.f32 %v4587_v59, 0.0 }
 0x11b   : > { %v5877_v2 = vmax.f32 %v4594_v62, 0.0 }
 0x11c   : > { %v5878_v4 = vmax.f32 %v4598_v0, 0.0 }
 0x11d   : > { %v1038_v8 = vpack.c.bf16 %v5877_v2, %v5880_v5 }
 0x11e   : > { %v1037_v6 = vpack.c.bf16 %v5878_v4, %v5879_v3  ;;  %v3874_v7 = vpop.f32.mrb[12].mxu1 }
 0x11f   : > { %v1001_v9 = vpop.f32.mrb[13].mxu1  ;;  %v4617_v12 = vadd.f32 %v3874_v7, %v4525_v20 }
 0x120   : > { %v4613_v10 = vadd.f32 %v4525_v20, %v1001_v9  ;;  %v3875_v11 = vpop.f32.mrb[14].mxu1  ;;  %3886 = vmatprep.mubr.msk.bf16.mxu0 %vm1049_vm7, %v1037_v6 }
 0x121   : > { %v4620_v13 = vadd.f32 %v3875_v11, %v4525_v20  ;;  %v1004_v14 = vpop.f32.mrb[15].mxu1  ;;  %3887 = vmatmul.mubr.msk.bf16.gmra.mrb[12].mxu0 %vm1049_vm7, %v1038_v8  ;;  %v5876_v19 = vmax.f32 %v4617_v12, 0.0 }
 0x122   : > { %v4624_v15 = vadd.f32 %v4525_v20, %v1004_v14  ;;  %v5875_v17 = vmax.f32 %v4613_v10, 0.0  ;;  %v4291_v20 = vmov 1966171168  }
 0x123   : > { %5939 = vst [vmem:[#allocation14_spill] sm:$0xff] %v4620_v13  ;;  %v5874_v16 = vmax.f32 %v4620_v13, 0.0  ;;  %v1227_v23 = vunpack.c.l.s4 %v4291_v20 }
 0x124   : > { %5940 = vst [vmem:[#allocation15_spill] sm:$0xff] %v4624_v15  ;;  %v5873_v18 = vmax.f32 %v4624_v15, 0.0 }
 0x125   : > { %v1040_v22 = vpack.c.bf16 %v5874_v16, %v5876_v19  ;;  %v1228_v25 = vunpack.c.0.s8 %v1227_v23 }
 0x126   : > { %v1039_v21 = vpack.c.bf16 %v5873_v18, %v5875_v17 }
 0x127   : > { %v4642_v28 = vsub.s32 %v1228_v25, %v1230_v26 }
 0x128   : > { %3890 = vmatprep.mubr.msk.bf16.mxu0 %vm1049_vm7, %v1039_v21 }
 0x129   : > { %3891 = vmatmul.mubr.msk.bf16.gmra.mrb[16].mxu0 %vm1049_vm7, %v1040_v22 }
 0x12a   : > { %3902 = vmatprep.mubr.msk.bf16.mxu0 %vm4290_vm2, %v5871_v1 }
 0x1de   : > { %v1216_v31 = vpop.f32.mrb[16].mxu1 }
 0x1df   : > { %v1225_v32 = vcombine.high %v1216_v31, %v1216_v31  ;;  %v1232_v36 = vrot.slane %v1216_v31, %v4642_v28  ;;  %v3898_v41 = vpop.f32.mrb[17].mxu1 }
 0x1e0   : > { %v1219_v43 = vpop.f32.mrb[18].mxu1 }
 0x1e1   : > { %v1239_v44 = vrot.slane %v1225_v32, %v4642_v28  ;;  %v1240_v46 = vcombine.high %v1232_v36, %v1232_v36  ;;  %v1248_v49 = vrot.slane %v1232_v36, %v4642_v28  ;;  %v1274_v56 = vcombine.high %v1219_v43, %v1219_v43  ;;  %v3899_v57 = vpop.f32.mrb[19].mxu1 }
 0x1e2   : > { %v1281_v60 = vrot.slane %v1219_v43, %v4642_v28 }
 0x1e3   : > { %v1241_v63 = vcombine.high %v1239_v44, %v1239_v44  ;;  %v1255_v6 = vrot.slane %v1239_v44, %v4642_v28  ;;  %v1262_v7 = vrot.slane %v1240_v46, %v4642_v28  ;;  %v1270_v8 = vcombine.high %v1248_v49, %v1248_v49 }
 0x1e4   : > { %v3880_v55 = vpop.f32.mrb[4].mxu0  ;;  %v1326_v11 = vrot.slane %v1248_v49, %v4645_v42  ;;  %v4654_v21 = vrot.slane %v1274_v56, %v4642_v28  ;;  %v1289_v22 = vcombine.high %v1281_v60, %v1281_v60  ;;  %v4657_v20 = vrot.slane %v1281_v60, %v4642_v28 }
 0x1e5   : > { %v1108_v58 = vpop.f32.mrb[5].mxu0  ;;  %v1334_v23 = vrot.slane %v1270_v8, %v4645_v42  ;;  %v1272_v24 = vcombine.high %v1262_v7, %v1262_v7  ;;  %v1330_v25 = vrot.slane %v1262_v7, %v4645_v42  ;;  %v1271_v26 = vcombine.high %v1255_v6, %v1255_v6 }
 0x1e6   : > { %v3881_v9 = vpop.f32.mrb[6].mxu0  ;;  %v4661_v31 = vadd.f32 %v1326_v11, %v1108_v58  ;;  %v4665_v32 = vrot.slane %v4654_v21, %v4642_v28  ;;  %v4668_v36 = vrot.slane %v1289_v22, %v4642_v28  ;;  %v1342_v56 = vrot.slane %v1255_v6, %v4645_v42 }
 0x1e7   : > { %v1111_v14 = vpop.f32.mrb[7].mxu0  ;;  %v4670_v41 = vadd.f32 %v3880_v55, %v1334_v23  ;;  %v1338_v43 = vrot.slane %v1272_v24, %v4645_v42  ;;  %v1350_v46 = vrot.slane %v1271_v26, %v4645_v42  ;;  %v1269_v57 = vrot.slane %v1241_v63, %v4642_v28 }
 0x1e8   : > { %v4673_v44 = vadd.f32 %v1330_v25, %v1111_v14  ;;  %v1420_v49 = vsel %vm1419_vm8, %v4661_v31, -inf }
 0x1e9   : > { %v1434_v55 = vsel %vm1419_vm8, %v4670_v41, -inf  ;;  %v1421_v60 = vrot.slane %v1420_v49, 4  ;;  %v4684_v7 = vadd.f32 %v3881_v9, %v1338_v43  ;;  %v1273_v24 = vcombine.high %v1269_v57, %v1269_v57 }
 0x1ea   : > { %v1427_v8 = vsel %vm1419_vm8, %v4673_v44, -inf  ;;  %v1435_v14 = vrot.slane %v1434_v55, 4  ;;  %v1346_v9 = vrot.slane %v1269_v57, %v4645_v42 }
 0x1eb   : > { %v1428_v22 = vrot.slane %v1427_v8, 4  ;;  %v1422_v63 = vmax.f32 %v1420_v49, %v1421_v60  ;;  %v1441_v25 = vsel %vm1419_vm8, %v4684_v7, -inf  ;;  %v1354_v60 = vrot.slane %v1273_v24, %v4645_v42 }
 0x1ec   : > { %v3884_v11 = vpop.f32.mrb[8].mxu0  ;;  %v1436_v43 = vmax.f32 %v1434_v55, %v1435_v14  ;;  %v1442_v18 = vrot.slane %v1441_v25, 4 }
 0x1ed   : > { %v4688_v23 = vadd.f32 %v3884_v11, %v1350_v46  ;;  %v1124_v6 = vpop.f32.mrb[9].mxu0  ;;  %v1429_v16 = vmax.f32 %v1427_v8, %v1428_v22  ;;  %v1423_v46 = vrot.slane %v1422_v63, 2 }
 0x1ee   : > { %v4692_v26 = vadd.f32 %v1342_v56, %v1124_v6  ;;  %v3885_v1 = vpop.f32.mrb[10].mxu0  ;;  %v1437_v2 = vrot.slane %v1436_v43, 2  ;;  %v1443_v56 = vmax.f32 %v1441_v25, %v1442_v18 }
 0x1ef   : > { %v1462_v17 = vsel %vm1419_vm8, %v4688_v23, -inf  ;;  %v1127_v19 = vpop.f32.mrb[11].mxu0  ;;  %v1430_v6 = vrot.slane %v1429_v16, 2  ;;  %v1424_v3 = vmax.f32 %v1422_v63, %v1423_v46  ;;  %v4700_v55 = vadd.f32 %v3885_v1, %v1354_v60 }
 0x1f0   : > { %v1463_v11 = vrot.slane %v1462_v17, 4  ;;  %v1448_v49 = vsel %vm1419_vm8, %v4692_v26, -inf  ;;  %v4702_v8 = vadd.f32 %v1346_v9, %v1127_v19  ;;  %v1438_v14 = vmax.f32 %v1436_v43, %v1437_v2 }
 0x1f1   : > { %v1449_v4 = vrot.slane %v1448_v49, 4  ;;  %v1444_v22 = vrot.slane %v1443_v56, 2  ;;  %v1431_v5 = vmax.f32 %v1429_v16, %v1430_v6  ;;  %v1425_v54 = vrot.slane %v1424_v3, 1 }
 0x1f2   : > { %v1464_v57 = vmax.f32 %v1462_v17, %v1463_v11  ;;  %v1469_v52 = vsel %vm1419_vm8, %v4700_v55, -inf  ;;  %v1455_v18 = vsel %vm1419_vm8, %v4702_v8, -inf  ;;  %v1439_v25 = vrot.slane %v1438_v14, 1 }
 0x1f3   : > { %v1450_v51 = vmax.f32 %v1448_v49, %v1449_v4  ;;  %v1445_v63 = vmax.f32 %v1443_v56, %v1444_v22  ;;  %v1432_v17 = vrot.slane %v1431_v5, 1  ;;  %v1426_v19 = vmax.f32 %v1424_v3, %v1425_v54 }
 0x1f4   : > { %v1465_v53 = vrot.slane %v1464_v57, 2  ;;  %v3888_v24 = vpop.f32.mrb[12].mxu0  ;;  %v1470_v2 = vrot.slane %v1469_v52, 4  ;;  %v1456_v43 = vrot.slane %v1455_v18, 4  ;;  %v1440_v4 = vmax.f32 %v1438_v14, %v1439_v25 }
 0x1f5   : > { %v1451_v1 = vrot.slane %v1450_v51, 2  ;;  %v1140_v46 = vpop.f32.mrb[13].mxu0  ;;  %v1446_v11 = vrot.slane %v1445_v63, 1  ;;  %v1433_v49 = vmax.f32 %v1431_v5, %v1432_v17  ;;  %v1532_v38 = vsub.f32 %v4661_v31, %v1426_v19 }
 0x1f6   : > { %v1466_v9 = vmax.f32 %v1464_v57, %v1465_v53  ;;  %v3889_v16 = vpop.f32.mrb[14].mxu0  ;;  %v1471_v40 = vmax.f32 %v1469_v52, %v1470_v2  ;;  %v1457_v37 = vmax.f32 %v1455_v18, %v1456_v43  ;;  %v1534_v56 = vsub.f32 %v4670_v41, %v1440_v4 }
 0x1f7   : > { %v1452_v60 = vmax.f32 %v1450_v51, %v1451_v1  ;;  %v1143_v6 = vpop.f32.mrb[15].mxu0  ;;  %v1447_v22 = vmax.f32 %v1445_v63, %v1446_v11  ;;  %v1533_v58 = vsub.f32 %v4673_v44, %v1433_v49  ;;  %v1548_v53 = vmul.f32 1.442695, %v1532_v38 }
 0x1f8   : > { %v1467_v39 = vrot.slane %v1466_v9, 1  ;;  %v1472_v57 = vrot.slane %v1471_v40, 2  ;;  %v1458_v35 = vrot.slane %v1457_v37, 2  ;;  %v1552_v14 = vmul.f32 1.442695, %v1534_v56 }
 0x1f9   : > { %v1453_v54 = vrot.slane %v1452_v60, 1  ;;  %v1535_v5 = vsub.f32 %v4684_v7, %v1447_v22  ;;  %v1550_v51 = vmul.f32 1.442695, %v1533_v58  ;;  %4072 = vpow2.f32 %v1548_v53 }
 0x1fa   : > { %v1468_v3 = vmax.f32 %v1466_v9, %v1467_v39  ;;  %v1473_v52 = vmax.f32 %v1471_v40, %v1472_v57  ;;  %v1459_v18 = vmax.f32 %v1457_v37, %v1458_v35  ;;  %4074 = vpow2.f32 %v1552_v14 }
 0x1fb   : > { %v1454_v25 = vmax.f32 %v1452_v60, %v1453_v54  ;;  %v1554_v41 = vmul.f32 1.442695, %v1535_v5  ;;  %v5941_v38 = vcombine.high %v4657_v20, %v4657_v20  ;;  %4076 = vpow2.f32 %v1550_v51 }
 0x1fc   : > { %v1538_v31 = vsub.f32 %v4688_v23, %v1468_v3  ;;  %v3892_v17 = vpop.f32.mrb[16].mxu0  ;;  %v1474_v58 = vrot.slane %v1473_v52, 1  ;;  %v1460_v1 = vrot.slane %v1459_v18, 1  ;;  %v1358_v37 = vrot.slane %v4657_v20, %v4645_v42 }
 0x1fd   : > { %v1536_v44 = vsub.f32 %v4692_v26, %v1454_v25  ;;  %v1366_v39 = vrot.slane %v5941_v38, %v4645_v42  ;;  %v1156_v63 = vpop.f32.mrb[17].mxu0  ;;  %4078 = vpow2.f32 %v1554_v41  ;;  %v1321_v2 = vcombine.high %v4668_v36, %v4668_v36 }
 0x1fe   : > { %v1560_v7 = vmul.f32 1.442695, %v1538_v31  ;;  %v4718_v19 = vpop.f32.mrb[18].mxu0  ;;  %v1475_v26 = vmax.f32 %v1473_v52, %v1474_v58  ;;  %v1461_v9 = vmax.f32 %v1459_v18, %v1460_v1  ;;  %v4730_v4 = vadd.f32 %v1358_v37, %v1140_v46 }
 0x1ff   : > { %v1556_v40 = vmul.f32 1.442695, %v1536_v44  ;;  %v4720_v35 = vadd.f32 %v3888_v24, %v1366_v39  ;;  %v4724_v23 = vpop.f32.mrb[19].mxu0  ;;  %v1362_v24 = vrot.slane %v4668_v36, %v4645_v42  ;;  %v1370_v60 = vrot.slane %v1321_v2, %v4645_v42 }
 0x200   : > { %4080 = vpow2.f32 %v1560_v7  ;;  %v1539_v11 = vsub.f32 %v4700_v55, %v1475_v26  ;;  %v1537_v20 = vsub.f32 %v4702_v8, %v1461_v9  ;;  %v1476_v56 = vsel %vm1419_vm8, %v4730_v4, -inf }
 0x201   : > { %4082 = vpow2.f32 %v1556_v40  ;;  %v1490_v43 = vsel %vm1419_vm8, %v4720_v35, -inf  ;;  %v4739_v22 = vadd.f32 %v1362_v24, %v1143_v6  ;;  %v1320_v54 = vcombine.high %v4665_v32, %v4665_v32 }
 0x202   : > { %v1491_v49 = vrot.slane %v1490_v43, 4  ;;  %v1374_v46 = vrot.slane %v4665_v32, %v4645_v42  ;;  %v1562_v53 = vmul.f32 1.442695, %v1539_v11  ;;  %v1558_v36 = vmul.f32 1.442695, %v1537_v20 }
 0x203   : > { %v1477_v55 = vrot.slane %v1476_v56, 4  ;;  %v4745_v57 = vadd.f32 %v3889_v16, %v1370_v60  ;;  %v1483_v8 = vsel %vm1419_vm8, %v4739_v22, -inf  ;;  %v1382_v14 = vrot.slane %v1320_v54, %v4645_v42  ;;  %v4752_v6 = vpop.eup %4072 }
 0x204   : > { %v1492_v3 = vmax.f32 %v1490_v43, %v1491_v49  ;;  %v4750_v5 = vadd.f32 %v1374_v46, %v1156_v63  ;;  %4084 = vpow2.f32 %v1562_v53  ;;  %v1484_v31 = vrot.slane %v1483_v8, 4  ;;  %v4754_v32 = vpop.eup %4074 }
 0x205   : > { %v1478_v25 = vmax.f32 %v1476_v56, %v1477_v55  ;;  %v1580_v52 = vsel %vm1419_vm8, %v4752_v6, 0.0  ;;  %4086 = vpow2.f32 %v1558_v36  ;;  %v4760_v16 = vsel %vm1419_vm8, %v4745_v57, -inf  ;;  %v4764_v41 = vpop.eup %4076  ;;  %v4063_v36 = vld [vmem:[%s5848_s8] sm:$0xff]  }
 0x206   : > { %v1493_v51 = vrot.slane %v1492_v3, 2  ;;  %v4762_v18 = vadd.f32 %v3892_v17, %v1382_v14  ;;  %v1594_v44 = vsel %vm1419_vm8, %v4754_v32, 0.0  ;;  %v1581_v38 = vrot.slane %v1580_v52, 4  ;;  %3907 = vmatpush3.bf16.msra.mxu1 %v4063_v36 }
 0x207   : > { %v1479_v63 = vrot.slane %v1478_v25, 2  ;;  %v4768_v7 = vpop.eup %4078  ;;  %v1595_v58 = vrot.slane %v1594_v44, 4  ;;  %v1587_v1 = vsel %vm1419_vm8, %v4764_v41, 0.0  ;;  %v4773_v37 = vmax.f32 %v1483_v8, %v1484_v31 }
 0x208   : > { %v1494_v39 = vmax.f32 %v1492_v3, %v1493_v51  ;;  %v1582_v26 = vadd.f32 %v1581_v38, %v1580_v52  ;;  %v1601_v9 = vsel %vm1419_vm8, %v4768_v7, 0.0  ;;  %v1588_v2 = vrot.slane %v1587_v1, 4 }
 0x209   : > { %v1596_v11 = vadd.f32 %v1595_v58, %v1594_v44  ;;  %v1602_v20 = vrot.slane %v1601_v9, 4  ;;  %v1480_v60 = vmax.f32 %v1478_v25, %v1479_v63 }
 0x20a   : > { %v4775_v17 = vpop.eup %4080  ;;  %v1495_v43 = vrot.slane %v1494_v39, 1  ;;  %v1583_v56 = vrot.slane %v1582_v26, 2  ;;  %v1589_v54 = vadd.f32 %v1588_v2, %v1587_v1 }
 0x20b   : > { %v4779_v24 = vpop.eup %4082  ;;  %v1622_v49 = vsel %vm1419_vm8, %v4775_v17, 0.0  ;;  %v1597_v3 = vrot.slane %v1596_v11, 2  ;;  %v1603_v55 = vadd.f32 %v1602_v20, %v1601_v9  ;;  %v1481_v44 = vrot.slane %v1480_v60, 1 }
 0x20c   : > { %v1623_v46 = vrot.slane %v1622_v49, 4  ;;  %v1608_v53 = vsel %vm1419_vm8, %v4779_v24, 0.0  ;;  %v1496_v14 = vmax.f32 %v1494_v39, %v1495_v43  ;;  %v1584_v51 = vadd.f32 %v1583_v56, %v1582_v26 }
 0x20d   : > { %v1609_v8 = vrot.slane %v1608_v53, 4  ;;  %v1590_v31 = vrot.slane %v1589_v54, 2  ;;  %v1598_v25 = vadd.f32 %v1597_v3, %v1596_v11  ;;  %v1604_v38 = vrot.slane %v1603_v55, 2 }
 0x20e   : > { %v1624_v52 = vadd.f32 %v1623_v46, %v1622_v49  ;;  %v1542_v58 = vsub.f32 %v4720_v35, %v1496_v14  ;;  %v4789_v1 = vpop.eup %4084  ;;  %v1585_v2 = vrot.slane %v1584_v51, 1  ;;  %v1482_v15 = vmax.f32 %v1480_v60, %v1481_v44 }
 0x20f   : > { %v1610_v63 = vadd.f32 %v1609_v8, %v1608_v53  ;;  %v1591_v40 = vadd.f32 %v1590_v31, %v1589_v54  ;;  %v4791_v13 = vpop.eup %4086  ;;  %v1599_v9 = vrot.slane %v1598_v25, 1  ;;  %v1605_v39 = vadd.f32 %v1604_v38, %v1603_v55  ;;  %v4064_v55 = vld [vmem:[%s5849_s9] sm:$0xff]  }
 0x210   : > { %v1625_v29 = vrot.slane %v1624_v52, 2  ;;  %v1629_v43 = vsel %vm1419_vm8, %v4789_v1, 0.0  ;;  %v1586_v20 = vadd.f32 %v1585_v2, %v1584_v51  ;;  %v1615_v54 = vsel %vm1419_vm8, %v4791_v13, 0.0  ;;  %3901 = vmatpush3.bf16.msra.mxu0 %v4064_v55 }
 0x211   : > { %v1611_v26 = vrot.slane %v1610_v63, 2  ;;  %v1592_v11 = vrot.slane %v1591_v40, 1  ;;  %v1630_v56 = vrot.slane %v1629_v43, 4  ;;  %v1600_v46 = vadd.f32 %v1599_v9, %v1598_v25 }
 0x212   : > { %v1626_v49 = vadd.f32 %v1625_v29, %v1624_v52  ;;  %v1606_v35 = vrot.slane %v1605_v39, 1  ;;  %4088 = vrcp.f32 %v1586_v20  ;;  %v1616_v51 = vrot.slane %v1615_v54, 4 }
 0x213   : > { %v1612_v53 = vadd.f32 %v1611_v26, %v1610_v63  ;;  %v1593_v60 = vadd.f32 %v1592_v11, %v1591_v40  ;;  %v1631_v3 = vadd.f32 %v1630_v56, %v1629_v43  ;;  %4090 = vrcp.f32 %v1600_v46 }
 0x214   : > { %v1627_v36 = vrot.slane %v1626_v49, 1  ;;  %v1607_v8 = vadd.f32 %v1606_v35, %v1605_v39  ;;  %v1617_v52 = vadd.f32 %v1616_v51, %v1615_v54  ;;  %v1540_v44 = vsub.f32 %v4730_v4, %v1482_v15 }
 0x215   : > { %v1613_v14 = vrot.slane %v1612_v53, 1  ;;  %4092 = vrcp.f32 %v1593_v60  ;;  %v1632_v29 = vrot.slane %v1631_v3, 2  ;;  %v5942_v38 = vrot.slane %v4760_v16, 4 }
 0x216   : > { %4094 = vrcp.f32 %v1607_v8  ;;  %v1628_v31 = vadd.f32 %v1627_v36, %v1626_v49  ;;  %v1486_v2 = vrot.slane %v4773_v37, 2  ;;  %v1290_v9 = vcombine.high %v4654_v21, %v4654_v21 }
 0x217   : > { %v1614_v25 = vadd.f32 %v1613_v14, %v1612_v53  ;;  %v1633_v40 = vadd.f32 %v1632_v29, %v1631_v3  ;;  %v1499_v63 = vmax.f32 %v4760_v16, %v5942_v38  ;;  %v1618_v39 = vrot.slane %v1617_v52, 2 }
 0x218   : > { %v1568_v26 = vmul.f32 1.442695, %v1542_v58  ;;  %v1518_v43 = vsel %vm1419_vm8, %v4762_v18, -inf  ;;  %v1564_v11 = vmul.f32 1.442695, %v1540_v44  ;;  %v1487_v15 = vmax.f32 %v4773_v37, %v1486_v2 }
 0x219   : > { %v1634_v20 = vrot.slane %v1633_v40, 1  ;;  %v1500_v49 = vrot.slane %v1499_v63, 2  ;;  %4096 = vrcp.f32 %v1628_v31  ;;  %v1619_v4 = vadd.f32 %v1618_v39, %v1617_v52 }
 0x21a   : > { %v1519_v56 = vrot.slane %v1518_v43, 4  ;;  %v1504_v16 = vsel %vm1419_vm8, %v4750_v5, -inf  ;;  %4098 = vrcp.f32 %v1614_v25  ;;  %v1488_v21 = vrot.slane %v1487_v15, 1 }
 0x21b   : > { %v1635_v46 = vadd.f32 %v1634_v20, %v1633_v40  ;;  %v1501_v35 = vmax.f32 %v1499_v63, %v1500_v49  ;;  %v1620_v53 = vrot.slane %v1619_v4, 1  ;;  %4100 = vpow2.f32 %v1568_v26 }
 0x21c   : > { %v4089_v58 = vpop.eup %4088  ;;  %4102 = vpow2.f32 %v1564_v11  ;;  %v1505_v54 = vrot.slane %v1504_v16, 4  ;;  %v4813_v3 = vmax.f32 %v1518_v43, %v1519_v56  ;;  %v4816_v55 = vrot.slane %v1290_v9, %v4642_v28 }
 0x21d   : > { %v4091_v60 = vpop.eup %4090  ;;  %v1708_v36 = vmul.f32 %v4089_v58, %v4752_v6  ;;  %v1621_v37 = vadd.f32 %v1620_v53, %v1619_v4  ;;  %4104 = vrcp.f32 %v1635_v46  ;;  %v1502_v51 = vrot.slane %v1501_v35, 1 }
 0x21e   : > { %v1710_v14 = vmul.f32 %v4091_v60, %v4754_v32  ;;  %v4819_v29 = vmax.f32 %v1487_v15, %v1488_v21  ;;  %v5943_v52 = vmax.f32 %v4528_v27, 0.0  ;;  %v5944_v40 = vmax.f32 %v4533_v30, 0.0 }
 0x21f   : > { %v4093_v8 = vpop.eup %4092  ;;  %v1853_v25 = vsel %vm1852_vm9, %v1708_v36, 0.0  ;;  %4106 = vrcp.f32 %v1621_v37  ;;  %v5945_v39 = vmax.f32 %v4539_v34, 0.0  ;;  %v1521_v27 = vrot.slane %v4813_v3, 2 }
 0x220   : > { %v4095_v31 = vpop.eup %4094  ;;  %v1724_v44 = vmul.f32 %v1708_v36, %v5943_v52  ;;  %v1709_v6 = vmul.f32 %v4093_v8, %v4764_v41  ;;  %v1726_v38 = vmul.f32 %v1710_v14, %v5944_v40  ;;  %v1867_v63 = vsel %vm1852_vm9, %v1710_v14, 0.0 }
 0x221   : > { %v1854_v2 = vrot.slane %v1853_v25, 4  ;;  %v1711_v32 = vmul.f32 %v4095_v31, %v4768_v7  ;;  %v4833_v43 = vmax.f32 %v1504_v16, %v1505_v54  ;;  %v1868_v20 = vrot.slane %v1867_v63, 4 }
 0x222   : > { %v1740_v9 = vsel %vm1049_vm7, %v1724_v44, 0.0  ;;  %v1725_v26 = vmul.f32 %v1709_v6, %v5945_v39  ;;  %v1754_v41 = vsel %vm1049_vm7, %v1726_v38, 0.0  ;;  %v5946_v30 = vmax.f32 %v4536_v33, 0.0 }
 0x223   : > { %v1741_v11 = vrot.slane %v1740_v9, 4  ;;  %v4838_v15 = vpop.eup %4096  ;;  %v1755_v4 = vrot.slane %v1754_v41, 4  ;;  %v1860_v56 = vsel %vm1852_vm9, %v1709_v6, 0.0  ;;  %v1322_v34 = vcombine.high %v4816_v55, %v4816_v55 }
 0x224   : > { %v1727_v49 = vmul.f32 %v1711_v32, %v5946_v30  ;;  %v1747_v7 = vsel %vm1049_vm7, %v1725_v26, 0.0  ;;  %v4099_v46 = vpop.eup %4098  ;;  %v1855_v21 = vadd.f32 %v1854_v2, %v1853_v25  ;;  %v4845_v58 = vmax.f32 %v1501_v35, %v1502_v51 }
 0x225   : > { %v1742_v16 = vadd.f32 %v1741_v11, %v1740_v9  ;;  %v4847_v54 = vpop.eup %4100  ;;  %v1756_v33 = vadd.f32 %v1755_v4, %v1754_v41  ;;  %v1748_v36 = vrot.slane %v1747_v7, 4  ;;  %v1541_v37 = vsub.f32 %v4739_v22, %v4819_v29 }
 0x226   : > { %v1761_v53 = vsel %vm1049_vm7, %v1727_v49, 0.0  ;;  %v4851_v8 = vpop.eup %4102  ;;  %v4853_v14 = vadd.f32 %v1868_v20, %v1867_v63  ;;  %v1861_v52 = vrot.slane %v1860_v56, 4  ;;  %v1507_v44 = vrot.slane %v4833_v43, 2 }
 0x227   : > { %v1762_v60 = vrot.slane %v1761_v53, 4  ;;  %v1743_v31 = vrot.slane %v1742_v16, 2  ;;  %v1757_v25 = vrot.slane %v1756_v33, 2  ;;  %v1749_v35 = vadd.f32 %v1748_v36, %v1747_v7  ;;  %v4857_v40 = vpop.eup %4104 }
 0x228   : > { %v1712_v51 = vmul.f32 %v4099_v46, %v4779_v24  ;;  %v1856_v2 = vrot.slane %v1855_v21, 2  ;;  %v1874_v9 = vsel %vm1852_vm9, %v1711_v32, 0.0  ;;  %v1862_v22 = vadd.f32 %v1861_v52, %v1860_v56 }
 0x229   : > { %v1763_v6 = vadd.f32 %v1762_v60, %v1761_v53  ;;  %v1744_v38 = vadd.f32 %v1743_v31, %v1742_v16  ;;  %v4107_v29 = vpop.eup %4106  ;;  %v1758_v39 = vadd.f32 %v1757_v25, %v1756_v33  ;;  %v1750_v26 = vrot.slane %v1749_v35, 2 }
 0x22a   : > { %v5947_v41 = vmax.f32 %v4561_v45, 0.0  ;;  %v4863_v30 = vmul.f32 %v4107_v29, %v4791_v13  ;;  %v1650_v24 = vsel %vm1419_vm8, %v4847_v54, 0.0  ;;  %v1636_v49 = vsel %vm1419_vm8, %v4851_v8, 0.0 }
 0x22b   : > { %v1764_v63 = vrot.slane %v1763_v6, 2  ;;  %v1745_v11 = vrot.slane %v1744_v38, 1  ;;  %v1759_v4 = vrot.slane %v1758_v39, 1  ;;  %v1751_v7 = vadd.f32 %v1750_v26, %v1749_v35 }
 0x22c   : > { %v1728_v20 = vmul.f32 %v1712_v51, %v5947_v41  ;;  %v1875_v16 = vrot.slane %v1874_v9, 4  ;;  %v1863_v53 = vrot.slane %v1862_v22, 2  ;;  %v4871_v13 = vsel %vm1852_vm9, %v1712_v51, 0.0 }
 0x22d   : > { %v1765_v32 = vadd.f32 %v1764_v63, %v1763_v6  ;;  %v1746_v46 = vadd.f32 %v1745_v11, %v1744_v38  ;;  %v1760_v33 = vadd.f32 %v1759_v4, %v1758_v39  ;;  %v5948_v36 = vmax.f32 %v4572_v50, 0.0 }
 0x22e   : > { %v1768_v56 = vsel %vm1049_vm7, %v1728_v20, 0.0  ;;  %v1752_v52 = vrot.slane %v1751_v7, 1  ;;  %v1651_v29 = vrot.slane %v1650_v24, 4  ;;  %v1637_v6 = vrot.slane %v1636_v49, 4 }
 0x22f   : > { %v1769_v45 = vrot.slane %v1768_v56, 4  ;;  %v1766_v60 = vrot.slane %v1765_v32, 1  ;;  %v1729_v31 = vmul.f32 %v4863_v30, %v5948_v36  ;;  %v2012_v63 = vpack.c.bf16 %v1760_v33, %v1760_v33 }
 0x230   : > { %v2010_v38 = vpack.c.bf16 %v1746_v46, %v1746_v46  ;;  %v4878_v41 = vadd.f32 %v1856_v2, %v1855_v21  ;;  %v1652_v51 = vadd.f32 %v1651_v29, %v1650_v24  ;;  %v4880_v11 = vadd.f32 %v1875_v16, %v1874_v9 }
 0x231   : > { %v1770_v25 = vadd.f32 %v1769_v45, %v1768_v56  ;;  %v1775_v26 = vsel %vm1049_vm7, %v1729_v31, 0.0  ;;  %v4882_v50 = vadd.f32 %v1863_v53, %v1862_v22  ;;  %v1882_v4 = vrot.slane %v4871_v13, 4 }
 0x232   : > { %v1776_v20 = vrot.slane %v1775_v26, 4  ;;  %v1638_v56 = vadd.f32 %v1637_v6, %v1636_v49  ;;  %v1767_v45 = vadd.f32 %v1766_v60, %v1765_v32  ;;  %v4885_v36 = vadd.f32 %v1752_v52, %v1751_v7 }
 0x233   : > { %v1771_v39 = vrot.slane %v1770_v25, 2  ;;  %v1653_v35 = vrot.slane %v1652_v51, 2  ;;  %v1543_v46 = vsub.f32 %v4745_v57, %v4845_v58  ;;  %v4889_v33 = vunpack.c.l.b16 %v2012_v63 }
 0x234   : > { %v4891_v21 = vunpack.c.l.b16 %v2010_v38  ;;  %v1639_v2 = vrot.slane %v1638_v56, 2  ;;  %v1566_v24 = vmul.f32 1.442695, %v1541_v37  ;;  %v1777_v16 = vadd.f32 %v1776_v20, %v1775_v26 }
 0x235   : > { %v1772_v9 = vadd.f32 %v1771_v39, %v1770_v25  ;;  %v1654_v22 = vadd.f32 %v1653_v35, %v1652_v51  ;;  %v1570_v53 = vmul.f32 1.442695, %v1543_v46  ;;  %v1522_v49 = vmax.f32 %v4813_v3, %v1521_v27 }
 0x236   : > { %v1640_v31 = vadd.f32 %v1639_v2, %v1638_v56  ;;  %4108 = vpow2.f32 %v1566_v24  ;;  %v1508_v32 = vmax.f32 %v4833_v43, %v1507_v44  ;;  %v2013_v7 = vpack.c.bf16 %v1767_v45, %v1767_v45 }
 0x237   : > { %v2011_v57 = vpack.c.bf16 %v4885_v36, %v4885_v36  ;;  %v1655_v58 = vrot.slane %v1654_v22, 1  ;;  %4110 = vpow2.f32 %v1570_v53  ;;  %v1523_v37 = vrot.slane %v1522_v49, 1 }
 0x238   : > { %v1641_v60 = vrot.slane %v1640_v31, 1  ;;  %v1509_v52 = vrot.slane %v1508_v32, 1  ;;  %v1386_v25 = vrot.slane %v1322_v34, %v4645_v42  ;;  %v1773_v29 = vrot.slane %v1772_v9, 1 }
 0x239   : > { %v1778_v6 = vrot.slane %v1777_v16, 2  ;;  %v1656_v35 = vadd.f32 %v1655_v58, %v1654_v22  ;;  %v1378_v3 = vrot.slane %v4816_v55, %v4645_v42  ;;  %v1524_v43 = vmax.f32 %v1522_v49, %v1523_v37 }
 0x23a   : > { %v1642_v27 = vadd.f32 %v1641_v60, %v1640_v31  ;;  %v1510_v44 = vmax.f32 %v1508_v32, %v1509_v52  ;;  %v4906_v63 = vadd.f32 %v4718_v19, %v1386_v25  ;;  %v4913_v26 = vmul.f32 %v4838_v15, %v4775_v17 }
 0x23b   : > { %4112 = vrcp.f32 %v1656_v35  ;;  %v4909_v38 = vadd.f32 %v1378_v3, %v4724_v23  ;;  %v4917_v34 = vmul.f32 %v4857_v40, %v4789_v1  ;;  %v1546_v55 = vsub.f32 %v4762_v18, %v1524_v43 }
 0x23c   : > { %4114 = vrcp.f32 %v1642_v27  ;;  %v1544_v39 = vsub.f32 %v4750_v5, %v1510_v44  ;;  %v1525_v19 = vsel %vm1419_vm8, %v4906_v63, -inf  ;;  %v5949_v51 = vmax.f32 %v4565_v47, 0.0 }
 0x23d   : > { %v1526_v20 = vrot.slane %v1525_v19, 4  ;;  %v1511_v23 = vsel %vm1419_vm8, %v4909_v38, -inf  ;;  %v5950_v15 = vmax.f32 %v4568_v48, 0.0  ;;  %v4931_v40 = vunpack.c.l.b16 %v2013_v7 }
 0x23e   : > { %v1730_v17 = vmul.f32 %v4913_v26, %v5949_v51  ;;  %v1576_v18 = vmul.f32 1.442695, %v1546_v55  ;;  %v1572_v56 = vmul.f32 1.442695, %v1544_v39  ;;  %v1512_v5 = vrot.slane %v1511_v23, 4 }
 0x23f   : > { %v1731_v1 = vmul.f32 %v4917_v34, %v5950_v15  ;;  %v4933_v45 = vadd.f32 %v1773_v29, %v1772_v9  ;;  %v1527_v36 = vmax.f32 %v1525_v19, %v1526_v20  ;;  %v4939_v47 = vadd.f32 %v1778_v6, %v1777_v16 }
 0x240   : > { %v1782_v46 = vsel %vm1049_vm7, %v1730_v17, 0.0  ;;  %v4937_v24 = vpop.eup %4108  ;;  %4116 = vpow2.f32 %v1576_v18  ;;  %v1513_v48 = vmax.f32 %v1511_v23, %v1512_v5  ;;  %v1858_v49 = vrot.slane %v4878_v41, 1 }
 0x241   : > { %v1789_v2 = vsel %vm1049_vm7, %v1731_v1, 0.0  ;;  %v1783_v22 = vrot.slane %v1782_v46, 4  ;;  %v4941_v53 = vpop.eup %4110  ;;  %v1643_v31 = vsel %vm1419_vm8, %v4937_v24, 0.0  ;;  %4118 = vpow2.f32 %v1572_v56 }
 0x242   : > { %v1528_v9 = vrot.slane %v1527_v36, 2  ;;  %v1657_v32 = vsel %vm1419_vm8, %v4941_v53, 0.0  ;;  %v1644_v7 = vrot.slane %v1643_v31, 4  ;;  %v1514_v58 = vrot.slane %v1513_v48, 2 }
 0x243   : > { %v1790_v60 = vrot.slane %v1789_v2, 4  ;;  %v4948_v16 = vunpack.c.l.b16 %v2011_v57  ;;  %v1658_v37 = vrot.slane %v1657_v32, 4  ;;  %v1865_v25 = vrot.slane %v4882_v50, 1 }
 0x244   : > { %v1529_v52 = vmax.f32 %v1527_v36, %v1528_v9  ;;  %v2014_v29 = vpack.c.bf16 %v4933_v45, %v4933_v45  ;;  %v1645_v6 = vadd.f32 %v1644_v7, %v1643_v31  ;;  %v1515_v35 = vmax.f32 %v1513_v48, %v1514_v58 }
 0x245   : > { %v4953_v3 = vadd.f32 %v1783_v22, %v1782_v46  ;;  %v4113_v27 = vpop.eup %4112  ;;  %v1780_v43 = vrot.slane %v4939_v47, 1  ;;  %v1659_v44 = vadd.f32 %v1658_v37, %v1657_v32  ;;  %v4957_v39 = vadd.f32 %v1858_v49, %v4878_v41 }
 0x246   : > { %v1530_v55 = vrot.slane %v1529_v52, 1  ;;  %v4115_v57 = vpop.eup %4114  ;;  %v1718_v19 = vmul.f32 %v4113_v27, %v4847_v54  ;;  %v1646_v20 = vrot.slane %v1645_v6, 2  ;;  %v1516_v23 = vrot.slane %v1515_v35, 1 }
 0x247   : > { %v4960_v51 = vadd.f32 %v1790_v60, %v1789_v2  ;;  %v1716_v17 = vmul.f32 %v4115_v57, %v4851_v8  ;;  %v1660_v15 = vrot.slane %v1659_v44, 2  ;;  %v4964_v18 = vadd.f32 %v1865_v25, %v4882_v50 }
 0x248   : > { %v1531_v1 = vmax.f32 %v1529_v52, %v1530_v55  ;;  %v5951_v56 = vmax.f32 %v4591_v61, 0.0  ;;  %v1647_v36 = vadd.f32 %v1646_v20, %v1645_v6  ;;  %v1785_v41 = vrot.slane %v4953_v3, 2 }
 0x249   : > { %v5952_v54 = vrot.slane %v4853_v14, 2  ;;  %v1923_v2 = vsel %vm1852_vm9, %v1718_v19, 0.0  ;;  %v5953_v8 = vmax.f32 %v4587_v59, 0.0  ;;  %v1909_v22 = vsel %vm1852_vm9, %v1716_v17, 0.0 }
 0x24a   : > { %v1734_v5 = vmul.f32 %v1718_v19, %v5951_v56  ;;  %v1661_v50 = vadd.f32 %v1660_v15, %v1659_v44  ;;  %v4978_v31 = vpop.eup %4116  ;;  %v1910_v9 = vrot.slane %v1909_v22, 4  ;;  %v1648_v49 = vrot.slane %v1647_v36, 1 }
 0x24b   : > { %v4972_v46 = vadd.f32 %v5952_v54, %v4853_v14  ;;  %v1732_v48 = vmul.f32 %v1716_v17, %v5953_v8  ;;  %v1517_v32 = vmax.f32 %v1515_v35, %v1516_v23  ;;  %v4981_v7 = vpop.eup %4118  ;;  %v1547_v37 = vsub.f32 %v4906_v63, %v1531_v1 }
 0x24c   : > { %v1810_v61 = vsel %vm1049_vm7, %v1734_v5, 0.0  ;;  %v1662_v60 = vrot.slane %v1661_v50, 1  ;;  %v1911_v52 = vadd.f32 %v1910_v9, %v1909_v22  ;;  %v1649_v25 = vadd.f32 %v1648_v49, %v1647_v36 }
 0x24d   : > { %v1811_v58 = vrot.slane %v1810_v61, 4  ;;  %v1796_v14 = vsel %vm1049_vm7, %v1732_v48, 0.0  ;;  %v1678_v6 = vsel %vm1419_vm8, %v4978_v31, 0.0  ;;  %v1924_v44 = vrot.slane %v1923_v2, 4 }
 0x24e   : > { %v1797_v59 = vrot.slane %v1796_v14, 4  ;;  %v1663_v55 = vadd.f32 %v1662_v60, %v1661_v50  ;;  %v1679_v57 = vrot.slane %v1678_v6, 4  ;;  %v1912_v35 = vrot.slane %v1911_v52, 2 }
 0x24f   : > { %v1812_v27 = vadd.f32 %v1811_v58, %v1810_v61  ;;  %4120 = vrcp.f32 %v1649_v25  ;;  %v1664_v20 = vsel %vm1419_vm8, %v4981_v7, 0.0  ;;  %v1578_v1 = vmul.f32 1.442695, %v1547_v37 }
 0x250   : > { %v1798_v19 = vadd.f32 %v1797_v59, %v1796_v14  ;;  %4122 = vrcp.f32 %v1663_v55  ;;  %v1680_v17 = vadd.f32 %v1679_v57, %v1678_v6  ;;  %v1665_v63 = vrot.slane %v1664_v20, 4 }
 0x251   : > { %v1813_v23 = vrot.slane %v1812_v27, 2  ;;  %v1545_v56 = vsub.f32 %v4909_v38, %v1517_v32  ;;  %v1877_v5 = vrot.slane %v4880_v11, 2  ;;  %v1792_v48 = vrot.slane %v4960_v51, 2 }
 0x252   : > { %v1799_v15 = vrot.slane %v1798_v19, 2  ;;  %v1681_v54 = vrot.slane %v1680_v17, 2  ;;  %v1666_v8 = vadd.f32 %v1665_v63, %v1664_v20  ;;  %v4992_v22 = vadd.f32 %v1924_v44, %v1923_v2 }
 0x253   : > { %v1814_v36 = vadd.f32 %v1813_v23, %v1812_v27  ;;  %4124 = vpow2.f32 %v1578_v1  ;;  %v1574_v61 = vmul.f32 1.442695, %v1545_v56  ;;  %v4994_v49 = vadd.f32 %v1912_v35, %v1911_v52 }
 0x254   : > { %v1800_v50 = vadd.f32 %v1799_v15, %v1798_v19  ;;  %v1682_v58 = vadd.f32 %v1681_v54, %v1680_v17  ;;  %v1667_v14 = vrot.slane %v1666_v8, 2  ;;  %v1878_v38 = vadd.f32 %v1877_v5, %v4880_v11 }
 0x255   : > { %v1815_v9 = vrot.slane %v1814_v36, 1  ;;  %4126 = vpow2.f32 %v1574_v61  ;;  %v1883_v32 = vadd.f32 %v1882_v4, %v4871_v13  ;;  %v1872_v2 = vrot.slane %v4972_v46, 1 }
 0x256   : > { %v1801_v60 = vrot.slane %v1800_v50, 1  ;;  %v1683_v37 = vrot.slane %v1682_v58, 1  ;;  %v1668_v59 = vadd.f32 %v1667_v14, %v1666_v8  ;;  %v1888_v25 = vsel %vm1852_vm9, %v4863_v30, 0.0 }
 0x257   : > { %v1816_v6 = vadd.f32 %v1815_v9, %v1814_v36  ;;  %v5006_v27 = vadd.f32 %v1785_v41, %v4953_v3  ;;  %v1889_v44 = vrot.slane %v1888_v25, 4  ;;  %v5009_v57 = vadd.f32 %v1792_v48, %v4960_v51 }
 0x258   : > { %v5003_v52 = vadd.f32 %v1801_v60, %v1800_v50  ;;  %v1684_v55 = vadd.f32 %v1683_v37, %v1682_v58  ;;  %v1669_v11 = vrot.slane %v1668_v59, 1  ;;  %v1884_v13 = vrot.slane %v1883_v32, 2 }
 0x259   : > { %v4121_v4 = vpop.eup %4120  ;;  %v1926_v19 = vrot.slane %v4992_v22, 2  ;;  %v1914_v35 = vrot.slane %v4994_v49, 1  ;;  %v1879_v20 = vrot.slane %v1878_v38, 1  ;;  %v1890_v30 = vadd.f32 %v1889_v44, %v1888_v25 }
 0x25a   : > { %v4123_v23 = vpop.eup %4122  ;;  %v1717_v17 = vmul.f32 %v4121_v4, %v4937_v24  ;;  %4128 = vrcp.f32 %v1684_v55  ;;  %v1670_v3 = vadd.f32 %v1669_v11, %v1668_v59  ;;  %v5015_v41 = vadd.f32 %v1872_v2, %v4972_v46 }
 0x25b   : > { %v2020_v63 = vpack.c.bf16 %v1816_v6, %v1816_v6  ;;  %v2018_v51 = vpack.c.bf16 %v5003_v52, %v5003_v52  ;;  %v1719_v15 = vmul.f32 %v4123_v23, %v4941_v53  ;;  %v1895_v1 = vsel %vm1852_vm9, %v4913_v26, 0.0 }
 0x25c   : > { %v5954_v56 = vmax.f32 %v4598_v0, 0.0  ;;  %v1916_v36 = vsel %vm1852_vm9, %v1717_v17, 0.0  ;;  %4130 = vrcp.f32 %v1670_v3  ;;  %v1885_v24 = vadd.f32 %v1884_v13, %v1883_v32 }
 0x25d   : > { %v5025_v54 = vpop.eup %4124  ;;  %v5955_v46 = vmax.f32 %v4594_v62, 0.0  ;;  %v1917_v48 = vrot.slane %v1916_v36, 4  ;;  %v5029_v50 = vadd.f32 %v1879_v20, %v1878_v38  ;;  %v1891_v61 = vrot.slane %v1890_v30, 2 }
 0x25e   : > { %v1733_v5 = vmul.f32 %v1717_v17, %v5954_v56  ;;  %v1930_v53 = vsel %vm1852_vm9, %v1719_v15, 0.0  ;;  %v1685_v0 = vsel %vm1419_vm8, %v5025_v54, 0.0  ;;  %v1896_v9 = vrot.slane %v1895_v1, 4 }
 0x25f   : > { %v1735_v8 = vmul.f32 %v1719_v15, %v5955_v46  ;;  %v5035_v58 = vpop.eup %4126  ;;  %v1918_v32 = vadd.f32 %v1917_v48, %v1916_v36  ;;  %v1686_v62 = vrot.slane %v1685_v0, 4  ;;  %v5038_v37 = vunpack.c.l.b16 %v2020_v63 }
 0x260   : > { %v1803_v26 = vsel %vm1049_vm7, %v1733_v5, 0.0  ;;  %v1671_v59 = vsel %vm1419_vm8, %v5035_v58, 0.0  ;;  %v1886_v2 = vrot.slane %v1885_v24, 1  ;;  %v1892_v55 = vadd.f32 %v1891_v61, %v1890_v30 }
 0x261   : > { %v1817_v14 = vsel %vm1049_vm7, %v1735_v8, 0.0  ;;  %v1804_v60 = vrot.slane %v1803_v26, 4  ;;  %v1687_v6 = vadd.f32 %v1686_v62, %v1685_v0  ;;  %v1672_v44 = vrot.slane %v1671_v59, 4 }
 0x262   : > { %v1818_v38 = vrot.slane %v1817_v14, 4  ;;  %v1931_v13 = vrot.slane %v1930_v53, 4  ;;  %v1897_v4 = vadd.f32 %v1896_v9, %v1895_v1  ;;  %v1902_v20 = vsel %vm1852_vm9, %v4917_v34, 0.0 }
 0x263   : > { %v1805_v25 = vadd.f32 %v1804_v60, %v1803_v26  ;;  %v1919_v17 = vrot.slane %v1918_v32, 2  ;;  %v1688_v3 = vrot.slane %v1687_v6, 2  ;;  %v1673_v63 = vadd.f32 %v1672_v44, %v1671_v59 }
 0x264   : > { %v1819_v11 = vadd.f32 %v1818_v38, %v1817_v14  ;;  %v4129_v15 = vpop.eup %4128  ;;  %v1898_v5 = vrot.slane %v1897_v4, 2  ;;  %v1903_v36 = vrot.slane %v1902_v20, 4  ;;  %v1982_v46 = vsel %vm1981_vm10, %v4964_v18, %v4957_v39 }
 0x265   : > { %v1806_v23 = vrot.slane %v1805_v25, 2  ;;  %v5048_v30 = vmul.f32 %v4129_v15, %v4978_v31  ;;  %v1689_v1 = vadd.f32 %v1688_v3, %v1687_v6  ;;  %v1893_v48 = vrot.slane %v1892_v55, 1 }
 0x266   : > { %v1820_v56 = vrot.slane %v1819_v11, 2  ;;  %v4131_v61 = vpop.eup %4130  ;;  %v1674_v26 = vrot.slane %v1673_v63, 2  ;;  %v1899_v0 = vadd.f32 %v1898_v5, %v1897_v4  ;;  %v1904_v9 = vadd.f32 %v1903_v36, %v1902_v20 }
 0x267   : > { %v1807_v8 = vadd.f32 %v1806_v23, %v1805_v25  ;;  %v1920_v14 = vadd.f32 %v1919_v17, %v1918_v32  ;;  %v5956_v60 = vmax.f32 %v4617_v12, 0.0  ;;  %v1720_v38 = vmul.f32 %v4131_v61, %v4981_v7 }
 0x268   : > { %v1821_v34 = vadd.f32 %v1820_v56, %v1819_v11  ;;  %v1690_v59 = vrot.slane %v1689_v1, 1  ;;  %v1932_v39 = vadd.f32 %v1931_v13, %v1930_v53  ;;  %v1675_v25 = vadd.f32 %v1674_v26, %v1673_v63 }
 0x269   : > { %v1738_v62 = vmul.f32 %v5048_v30, %v5956_v60  ;;  %v1808_v18 = vrot.slane %v1807_v8, 1  ;;  %v1887_v31 = vadd.f32 %v1886_v2, %v1885_v24  ;;  %v5957_v11 = vmax.f32 %v4613_v10, 0.0 }
 0x26a   : > { %v1822_v44 = vrot.slane %v1821_v34, 1  ;;  %v1905_v4 = vrot.slane %v1904_v9, 2  ;;  %v1691_v32 = vadd.f32 %v1690_v59, %v1689_v1  ;;  %v1894_v17 = vadd.f32 %v1893_v48, %v1892_v55 }
 0x26b   : > { %v1838_v6 = vsel %vm1049_vm7, %v1738_v62, 0.0  ;;  %v1736_v23 = vmul.f32 %v1720_v38, %v5957_v11  ;;  %v1900_v12 = vrot.slane %v1899_v0, 1  ;;  %v1921_v3 = vrot.slane %v1920_v14, 1 }
 0x26c   : > { %v1839_v20 = vrot.slane %v1838_v6, 4  ;;  %v1937_v7 = vsel %vm1852_vm9, %v1720_v38, 0.0  ;;  %v1676_v53 = vrot.slane %v1675_v25, 1  ;;  %v5059_v13 = vadd.f32 %v1808_v18, %v1807_v8 }
 0x26d   : > { %v1824_v15 = vsel %vm1049_vm7, %v1736_v23, 0.0  ;;  %4132 = vrcp.f32 %v1691_v32  ;;  %v5061_v63 = vadd.f32 %v1822_v44, %v1821_v34  ;;  %v1906_v56 = vadd.f32 %v1905_v4, %v1904_v9 }
 0x26e   : > { %v1840_v24 = vadd.f32 %v1839_v20, %v1838_v6  ;;  %v1825_v2 = vrot.slane %v1824_v15, 4  ;;  %v1677_v10 = vadd.f32 %v1676_v53, %v1675_v25  ;;  %v1938_v36 = vrot.slane %v1937_v7, 4 }
 0x26f   : > { %v1901_v55 = vadd.f32 %v1900_v12, %v1899_v0  ;;  %v1984_v1 = vsel %vm1983_vm11, %v5015_v41, %v1982_v46  ;;  %v1907_v48 = vrot.slane %v1906_v56, 1  ;;  %v1915_v41 = vadd.f32 %v1914_v35, %v4994_v49 }
 0x270   : > { %v1826_v5 = vadd.f32 %v1825_v2, %v1824_v15  ;;  %4134 = vrcp.f32 %v1677_v10  ;;  %v1841_v8 = vrot.slane %v1840_v24, 2  ;;  %v1986_v26 = vsel %vm1985_vm12, %v5029_v50, %v1984_v1  ;;  %v5958_v15 = vld [vmem:[#allocation14_spill] sm:$0xff] }
 0x271   : > { %v1908_v34 = vadd.f32 %v1907_v48, %v1906_v56  ;;  %v1988_v9 = vsel %vm1987_vm13, %v1887_v31, %v1986_v26  ;;  %v1922_v46 = vadd.f32 %v1921_v3, %v1920_v14  ;;  %v1927_v50 = vadd.f32 %v1926_v19, %v4992_v22  ;;  %v5960_v48 = vld [vmem:[#allocation15_spill] sm:$0xff] }
 0x272   : > { %v1827_v61 = vrot.slane %v1826_v5, 2  ;;  %v1990_v0 = vsel %vm1989_vm14, %v1894_v17, %v1988_v9  ;;  %v1933_v38 = vrot.slane %v1932_v39, 2  ;;  %v1939_v59 = vadd.f32 %v1938_v36, %v1937_v7 }
 0x273   : > { %v1992_v62 = vsel %vm1991_vm15, %v1901_v55, %v1990_v0  ;;  %v1951_v31 = vsel %vm1852_vm9, %v5048_v30, 0.0  ;;  %v1995_v44 = vsel %vm1981_vm10, %v1922_v46, %v1915_v41  ;;  %v1928_v49 = vrot.slane %v1927_v50, 1 }
 0x274   : > { %v1828_v60 = vadd.f32 %v1827_v61, %v1826_v5  ;;  %v1994_v25 = vsel %vm1993_vm5, %v1908_v34, %v1992_v62  ;;  %v1934_v35 = vadd.f32 %v1933_v38, %v1932_v39  ;;  %v1940_v14 = vrot.slane %v1939_v59, 2 }
 0x275   : > { %2002 = vrot.lane.b32.xlu0 %v1994_v25, %s4292_s4  ;;  %v1952_v6 = vrot.slane %v1951_v31, 4  ;;  %v5084_v22 = vunpack.c.l.b16 %v2018_v51  ;;  %v2021_v19 = vpack.c.bf16 %v5061_v63, %v5061_v63  ;;  %v2019_v30 = vpack.c.bf16 %v5059_v13, %v5059_v13 }
 0x276   : > { %v1829_v18 = vrot.slane %v1828_v60, 1  ;;  %v1842_v23 = vadd.f32 %v1841_v8, %v1840_v24  ;;  %v1935_v32 = vrot.slane %v1934_v35, 1  ;;  %v1941_v39 = vadd.f32 %v1940_v14, %v1939_v59 }
 0x277   : > { %v4133_v11 = vpop.eup %4132  ;;  %v1929_v17 = vadd.f32 %v1928_v49, %v1927_v50  ;;  %v1953_v12 = vadd.f32 %v1952_v6, %v1951_v31  ;;  %v1787_v3 = vrot.slane %v5006_v27, 1  ;;  %v1794_v52 = vrot.slane %v5009_v57, 1 }
 0x278   : > { %v1830_v4 = vadd.f32 %v1829_v18, %v1828_v60  ;;  %v1723_v20 = vmul.f32 %v4133_v11, %v5025_v54  ;;  %v5959_v7 = vmax.f32 %v5958_v15, 0.0  ;;  %v1936_v2 = vadd.f32 %v1935_v32, %v1934_v35  ;;  %v4065_v11 = vld [vmem:[%s5851_s11] sm:$0x1f]  }
 0x279   : > { %v1942_v63 = vrot.slane %v1941_v39, 1  ;;  %v1954_v10 = vrot.slane %v1953_v12, 2  ;;  %v1996_v56 = vsel %vm1983_vm11, %v1929_v17, %v1995_v44  ;;  %v1781_v1 = vadd.f32 %v1780_v43, %v4939_v47  ;;  %3989 = vmatprep.subr.msk.bf16.mxu0 %vm915_vm1, %v4065_v11 }
 0x27a   : > { %v4135_v51 = vpop.eup %4134  ;;  %v1739_v53 = vmul.f32 %v1723_v20, %v5959_v7  ;;  %v1958_v13 = vsel %vm1852_vm9, %v1723_v20, 0.0  ;;  %v1997_v55 = vsel %vm1985_vm12, %v1936_v2, %v1996_v56  ;;  %v5961_v8 = vmax.f32 %v5960_v48, 0.0 }
 0x27b   : > { %v1721_v24 = vmul.f32 %v4135_v51, %v5035_v58  ;;  %v1959_v54 = vrot.slane %v1958_v13, 4  ;;  %v1943_v36 = vadd.f32 %v1942_v63, %v1941_v39  ;;  %v1788_v58 = vadd.f32 %v1787_v3, %v5006_v27 }
 0x27c   : > { %v1845_v5 = vsel %vm1049_vm7, %v1739_v53, 0.0  ;;  %v1843_v41 = vrot.slane %v1842_v23, 1  ;;  %v1955_v50 = vadd.f32 %v1954_v10, %v1953_v12  ;;  %v1795_v38 = vadd.f32 %v1794_v52, %v5009_v57 }
 0x27d   : > { %v1737_v61 = vmul.f32 %v1721_v24, %v5961_v8  ;;  %v1846_v26 = vrot.slane %v1845_v5, 4  ;;  %v1944_v34 = vsel %vm1852_vm9, %v1721_v24, 0.0  ;;  %v1960_v60 = vadd.f32 %v1959_v54, %v1958_v13 }
 0x27e   : > { %v1945_v9 = vrot.slane %v1944_v34, 4  ;;  %v1998_v0 = vsel %vm1987_vm13, %v1943_v36, %v1997_v55  ;;  %v2015_v18 = vpack.c.bf16 %v1781_v1, %v1781_v1  ;;  %v2108_v25 = vunpack.c.l.b16 %v2021_v19 }
 0x27f   : > { %v1831_v46 = vsel %vm1049_vm7, %v1737_v61, 0.0  ;;  %v1847_v62 = vadd.f32 %v1846_v26, %v1845_v5  ;;  %v1961_v59 = vrot.slane %v1960_v60, 2  ;;  %v2106_v31 = vunpack.c.l.b16 %v2019_v30 }
 0x280   : > { %v1832_v47 = vrot.slane %v1831_v46, 4  ;;  %v1946_v43 = vadd.f32 %v1945_v9, %v1944_v34  ;;  %v2022_v44 = vpack.c.bf16 %v1830_v4, %v1830_v4  ;;  %v1844_v6 = vadd.f32 %v1843_v41, %v1842_v23 }
 0x281   : > { %v1848_v49 = vrot.slane %v1847_v62, 2  ;;  %v1962_v14 = vadd.f32 %v1961_v59, %v1960_v60  ;;  %v1956_v32 = vrot.slane %v1955_v50, 1  ;;  %v2016_v39 = vpack.c.bf16 %v1788_v58, %v1788_v58 }
 0x282   : > { %v1833_v27 = vadd.f32 %v1832_v47, %v1831_v46  ;;  %v1947_v35 = vrot.slane %v1946_v43, 2  ;;  %v2017_v57 = vpack.c.bf16 %v1795_v38, %v1795_v38  ;;  %v2101_v19 = vunpack.c.l.b16 %v2014_v29  ;;  %v5963_v47 = vld [vmem:[#allocation13_spill] sm:$0xff] }
 0x283   : > { %v1849_v20 = vadd.f32 %v1848_v49, %v1847_v62  ;;  %v2102_v30 = vunpack.c.l.b16 %v2015_v18  ;;  %v2109_v3 = vunpack.c.l.b16 %v2022_v44  ;;  %v2113_v23 = vsel %vm1981_vm10, %v4948_v16, %v4891_v21  ;;  %v4066_v44 = vld [vmem:[%s5854_s14] sm:$0xff]   ;;  %v4201_v49 = vld [vmem:[%s4484_s25 + $0x8] sm:$0xff]  }
 0x284   : > { %v1834_v17 = vrot.slane %v1833_v27, 2  ;;  %v1948_v12 = vadd.f32 %v1947_v35, %v1946_v43  ;;  %v2120_v52 = vsel %vm1981_vm10, %v2106_v31, %v5084_v22  ;;  %v1963_v7 = vrot.slane %v1962_v14, 1  ;;  %v4203_v35 = vld [vmem:[%s4484_s25 + $0x18] sm:$0xff]  }
 0x285   : > { %v1850_v4 = vrot.slane %v1849_v20, 1  ;;  %v2114_v53 = vsel %vm1983_vm11, %v4889_v33, %v2113_v23  ;;  %v2103_v29 = vunpack.c.l.b16 %v2016_v39  ;;  %v2121_v63 = vsel %vm1983_vm11, %v5038_v37, %v2120_v52 }
 0x286   : > { %v1835_v51 = vadd.f32 %v1834_v17, %v1833_v27  ;;  %v1949_v15 = vrot.slane %v1948_v12, 1  ;;  %v2115_v2 = vsel %vm1985_vm12, %v4931_v40, %v2114_v53  ;;  %v2122_v16 = vsel %vm1985_vm12, %v2108_v25, %v2121_v63  ;;  %v4200_v25 = vld [vmem:[%s4484_s25] sm:$0xff]   ;;  %v4202_v27 = vld [vmem:[%s4484_s25 + $0x10] sm:$0xff]  }
 0x287   : > { %v1851_v45 = vadd.f32 %v1850_v4, %v1849_v20  ;;  %v2116_v21 = vsel %vm1987_vm13, %v2101_v19, %v2115_v2  ;;  %v1957_v22 = vadd.f32 %v1956_v32, %v1955_v50  ;;  %v2104_v10 = vunpack.c.l.b16 %v2017_v57  ;;  %v5962_v50 = vld [vmem:[#allocation12_spill] sm:$0xff]  ;;  %v4207_v20 = vld [vmem:[%s4484_s25 + $0x38] sm:$0xff]  }
 0x288   : > { %v1836_v13 = vrot.slane %v1835_v51, 1  ;;  %v1950_v24 = vadd.f32 %v1949_v15, %v1948_v12  ;;  %v2117_v54 = vsel %vm1989_vm14, %v2102_v30, %v2116_v21  ;;  %v2123_v33 = vsel %vm1987_vm13, %v2109_v3, %v2122_v16  ;;  %v4067_v32 = vld [vmem:[%s5853_s13] sm:$0xff]  }
 0x289   : > { %v1964_v56 = vadd.f32 %v1963_v7, %v1962_v14  ;;  %v2118_v40 = vsel %vm1991_vm15, %v2103_v29, %v2117_v54  ;;  %v2024_v55 = vpack.c.bf16 %v1844_v6, %v1844_v6  ;;  %v2025_v61 = vpack.c.bf16 %v1851_v45, %v1851_v45  ;;  %v4204_v14 = vld [vmem:[%s4484_s25 + $0x20] sm:$0xff]   ;;  %v4205_v6 = vld [vmem:[%s4484_s25 + $0x28] sm:$0xff]   ;;  %3930 = vmatprep.subr.bf16.mxu1 %v4067_v32 }
 0x28a   : > { %v1999_v5 = vsel %vm1989_vm14, %v1950_v24, %v1998_v0  ;;  %v1837_v36 = vadd.f32 %v1836_v13, %v1835_v51  ;;  %v2119_v1 = vsel %vm1993_vm5, %v2104_v10, %v2118_v40  ;;  %v2204_v18 = vsel %vm915_vm1, %v4065_v11, 0  ;;  %v4206_v11 = vld [vmem:[%s4484_s25 + $0x30] sm:$0xff]   ;;  %v3756_v30 = vld [vmem:[%s5850_s10] ss:$0 sm:$0xff] }
 0x28b   : > { %v2000_v37 = vsel %vm1991_vm15, %v1957_v22, %v1999_v5  ;;  %v2111_v34 = vunpack.c.l.b16 %v2024_v55  ;;  %v2112_v58 = vunpack.c.l.b16 %v2025_v61  ;;  %v5964_v31 = vmov 0.0   ;;  %v3757_v29 = vld [vmem:[%s5852_s12] ss:$0 sm:$0xff] }
 0x28c   : > { %v2001_v48 = vsel %vm1993_vm5, %v1964_v56, %v2000_v37  ;;  %v2023_v8 = vpack.c.bf16 %v1837_v36, %v1837_v36  ;;  %vm3594_vm1 = vcmask 523264  }
 0x28d   : > { %2004 = vrot.lane.b32.xlu0 %v2001_v48, %s4292_s4 }
 0x28e   : > { %v2110_v26 = vunpack.c.l.b16 %v2023_v8 }
 0x290   : > { %v2124_v9 = vsel %vm1989_vm14, %v2110_v26, %v2123_v33 }
 0x291   : > { %v2125_v60 = vsel %vm1991_vm15, %v2111_v34, %v2124_v9 }
 0x292   : > { %v2126_v0 = vsel %vm1993_vm5, %v2112_v58, %v2125_v60 }
 0x293   : > { %v2127_v41 = vpack.c.b16 %v2126_v0, %v2119_v1 }
 0x295   : > { %3909 = vmatmul.mubr.msk.bf16.vlgmr.msra.gmra.mrb[20].mxu1 %vm1049_vm7, %v2127_v41 }
 0x296   : > { %3931 = vmatpush3.bf16.msra.mxu1 %v4067_v32 }
 0x297   : > { %3954 = vmatprep.subr.bf16.mxu1 %v5964_v31 }
 0x2e7   : > { %v2003_v46 = vpop.permute.xlu0 %2002 }
 0x2e8   : > { %v2008_v38 = vmul.f32 %v2003_v46, %v5962_v50 }
 0x2ff   : > { %v2005_v62 = vpop.permute.xlu0 %2004 }
 0x300   : > { %v2009_v43 = vmul.f32 %v2005_v62, %v5963_v47 }
 0x302   : > { %v2028_v59 = vpack.c.bf16 %v2009_v43, %v2008_v38 }
 0x304   : > { %3903 = vmatmul.mubr.msk.bf16.vlgmr.msra.gmra.mrb[20].mxu0 %vm1049_vm7, %v2028_v59 }
 0x305   : > { %3913 = vmatpush3.bf16.msra.mxu0 %v2204_v18  ;;  %3914 = vmatprep.mubr.msk.bf16.mxu0 %vm890_vm4, %v4200_v25 }
 0x306   : > { %3948 = vmatprep.subr.bf16.mxu0 %v5964_v31 }
 0x30c   : > { %3915 = vmatmul.mubr.msk.bf16.vlgmr.msra.gmra.mrb[24].mxu0 %vm890_vm4, %v4201_v49 }
 0x30d   : > { %3918 = vmatprep.mubr.msk.bf16.mxu0 %vm890_vm4, %v4202_v27  ;;  %3949 = vmatpush3.bf16.msra.mxu0 %v4066_v44 }
 0x30e   : > { %3960 = vmatprep.subr.bf16.mxu0 %v5964_v31 }
 0x314   : > { %3919 = vmatmul.mubr.msk.bf16.gmra.mrb[28].mxu0 %vm890_vm4, %v4203_v35 }
 0x315   : > { %3922 = vmatprep.mubr.msk.bf16.mxu0 %vm890_vm4, %v4204_v14 }
 0x31c   : > { %3923 = vmatmul.mubr.msk.bf16.gmra.mrb[32].mxu0 %vm890_vm4, %v4205_v6 }
 0x31d   : > { %3926 = vmatprep.mubr.msk.bf16.mxu0 %vm890_vm4, %v4206_v11 }
 0x324   : > { %3927 = vmatmul.mubr.msk.bf16.gmra.mrb[36].mxu0 %vm890_vm4, %v4207_v20 }
 0x325   : > { %3950 = vmatprep.mubr.msk.bf16.mxu0 %vm4290_vm2, %v5964_v31 }
 0x368   : > { %v2171_v39 = vpop.f32.mrb[20].mxu1 }
 0x369   : > { %v3910_v57 = vpop.f32.mrb[21].mxu1 }
 0x36a   : > { %v2174_v17 = vpop.f32.mrb[22].mxu1 }
 0x36b   : > { %v3911_v12 = vpop.f32.mrb[23].mxu1 }
 0x3d7   : > { %v2074_v19 = vpop.f32.mrb[20].mxu0 }
 0x3d8   : > { %v2172_v4 = vadd.f32 %v2171_v39, %v2074_v19  ;;  %v3904_v3 = vpop.f32.mrb[21].mxu0 }
 0x3d9   : > { %v2077_v23 = vpop.f32.mrb[22].mxu0 }
 0x3da   : > { %v5176_v52 = vadd.f32 %v3756_v30, %v2172_v4  ;;  %v2175_v51 = vadd.f32 %v2174_v17, %v2077_v23  ;;  %v3905_v15 = vpop.f32.mrb[23].mxu0 }
 0x3dc   : > { %v5178_v7 = vadd.f32 %v3756_v30, %v2175_v51  ;;  %v5894_v53 = vmax.f32 %v5176_v52, 0.0 }
 0x3de   : > { %5965 = vst [vmem:[#allocation14_spill] sm:$0xff] %v5178_v7  ;;  %v5893_v45 = vmax.f32 %v5178_v7, 0.0 }
 0x3df   : > { %v3916_v2 = vpop.f32.mrb[24].mxu0 }
 0x3e0   : > { %v2319_v63 = vpack.c.bf16 %v5893_v45, %v5894_v53  ;;  %v2240_v13 = vpop.f32.mrb[25].mxu0  ;;  %v5191_v16 = vadd.f32 %v3916_v2, %v3757_v29 }
 0x3e1   : > { %v5189_v24 = vadd.f32 %v3757_v29, %v2240_v13  ;;  %v3917_v21 = vpop.f32.mrb[26].mxu0 }
 0x3e2   : > { %v5193_v22 = vadd.f32 %v3917_v21, %v3757_v29  ;;  %v2243_v10 = vpop.f32.mrb[27].mxu0  ;;  %3951 = vmatmul.mubr.msk.bf16.vlgmr.msra.gmra.mrb[40].mxu0 %vm1049_vm7, %v2319_v63  ;;  %v5910_v36 = vmax.f32 %v5191_v16, 0.0 }
 0x3e3   : > { %v5196_v54 = vadd.f32 %v3757_v29, %v2243_v10  ;;  %3962 = vmatprep.mubr.msk.bf16.mxu0 %vm4290_vm2, %v5964_v31  ;;  %v5909_v56 = vmax.f32 %v5189_v24, 0.0 }
 0x3e4   : > { %v5908_v33 = vmax.f32 %v5193_v22, 0.0 }
 0x3e5   : > { %v5907_v5 = vmax.f32 %v5196_v54, 0.0 }
 0x3e6   : > { %v2321_v55 = vpack.c.bf16 %v5908_v33, %v5910_v36 }
 0x3e7   : > { %v2320_v40 = vpack.c.bf16 %v5907_v5, %v5909_v56  ;;  %v3920_v37 = vpop.f32.mrb[28].mxu0 }
 0x3e8   : > { %v2256_v1 = vpop.f32.mrb[29].mxu0  ;;  %v5215_v61 = vadd.f32 %v3920_v37, %v3757_v29 }
 0x3e9   : > { %v5212_v48 = vadd.f32 %v3757_v29, %v2256_v1  ;;  %v3921_v8 = vpop.f32.mrb[30].mxu0  ;;  %3932 = vmatprep.mubr.msk.bf16.mxu1 %vm1049_vm7, %v2320_v40 }
 0x3ea   : > { %v5217_v26 = vadd.f32 %v3921_v8, %v3757_v29  ;;  %v2259_v34 = vpop.f32.mrb[31].mxu0  ;;  %3933 = vmatmul.mubr.msk.bf16.vlgmr.msra.gmra.mrb[24].mxu1 %vm1049_vm7, %v2321_v55  ;;  %v5903_v41 = vmax.f32 %v5215_v61, 0.0 }
 0x3eb   : > { %v5220_v58 = vadd.f32 %v3757_v29, %v2259_v34  ;;  %v5906_v60 = vmax.f32 %v5212_v48, 0.0 }
 0x3ec   : > { %v5902_v9 = vmax.f32 %v5217_v26, 0.0 }
 0x3ed   : > { %v5905_v0 = vmax.f32 %v5220_v58, 0.0 }
 0x3ee   : > { %v2323_v50 = vpack.c.bf16 %v5902_v9, %v5903_v41 }
 0x3ef   : > { %v2322_v46 = vpack.c.bf16 %v5905_v0, %v5906_v60  ;;  %v3924_v62 = vpop.f32.mrb[32].mxu0 }
 0x3f0   : > { %v2272_v38 = vpop.f32.mrb[33].mxu0  ;;  %v5237_v59 = vadd.f32 %v3924_v62, %v3757_v29 }
 0x3f1   : > { %v5234_v47 = vadd.f32 %v3757_v29, %v2272_v38  ;;  %v3925_v43 = vpop.f32.mrb[34].mxu0  ;;  %3936 = vmatprep.mubr.msk.bf16.mxu1 %vm1049_vm7, %v2322_v46 }
 0x3f2   : > { %v5239_v18 = vadd.f32 %v3925_v43, %v3757_v29  ;;  %v2275_v25 = vpop.f32.mrb[35].mxu0  ;;  %3937 = vmatmul.mubr.msk.bf16.gmra.mrb[28].mxu1 %vm1049_vm7, %v2323_v50  ;;  %v5904_v14 = vmax.f32 %v5237_v59, 0.0 }
 0x3f3   : > { %v5242_v44 = vadd.f32 %v3757_v29, %v2275_v25  ;;  %v5901_v27 = vmax.f32 %v5234_v47, 0.0 }
 0x3f4   : > { %v5900_v49 = vmax.f32 %v5239_v18, 0.0 }
 0x3f5   : > { %v5899_v35 = vmax.f32 %v5242_v44, 0.0 }
 0x3f6   : > { %v2325_v20 = vpack.c.bf16 %v5900_v49, %v5904_v14 }
 0x3f7   : > { %v2324_v6 = vpack.c.bf16 %v5899_v35, %v5901_v27  ;;  %v3928_v11 = vpop.f32.mrb[36].mxu0 }
 0x3f8   : > { %v2288_v32 = vpop.f32.mrb[37].mxu0  ;;  %v5259_v17 = vadd.f32 %v3928_v11, %v3757_v29 }
 0x3f9   : > { %v5256_v39 = vadd.f32 %v3757_v29, %v2288_v32  ;;  %v3929_v57 = vpop.f32.mrb[38].mxu0  ;;  %3940 = vmatprep.mubr.msk.bf16.mxu1 %vm1049_vm7, %v2324_v6 }
 0x3fa   : > { %v5261_v12 = vadd.f32 %v3929_v57, %v3757_v29  ;;  %v2291_v19 = vpop.f32.mrb[39].mxu0  ;;  %3941 = vmatmul.mubr.msk.bf16.gmra.mrb[32].mxu1 %vm1049_vm7, %v2325_v20  ;;  %v5898_v51 = vmax.f32 %v5259_v17, 0.0 }
 0x3fb   : > { %v5264_v30 = vadd.f32 %v3757_v29, %v2291_v19  ;;  %v5897_v3 = vmax.f32 %v5256_v39, 0.0 }
 0x3fc   : > { %v5896_v4 = vmax.f32 %v5261_v12, 0.0 }
 0x3fd   : > { %v5895_v23 = vmax.f32 %v5264_v30, 0.0 }
 0x3fe   : > { %v2327_v2 = vpack.c.bf16 %v5896_v4, %v5898_v51 }
 0x3ff   : > { %v2326_v15 = vpack.c.bf16 %v5895_v23, %v5897_v3 }
 0x401   : > { %3944 = vmatprep.mubr.msk.bf16.mxu1 %vm1049_vm7, %v2326_v15 }
 0x402   : > { %3945 = vmatmul.mubr.msk.bf16.gmra.mrb[36].mxu1 %vm1049_vm7, %v2327_v2 }
 0x403   : > { %3956 = vmatprep.mubr.msk.bf16.mxu1 %vm4290_vm2, %v5964_v31 }
 0x4b5   : > { %v2502_v29 = vpop.f32.mrb[40].mxu0 }
 0x4b6   : > { %v2511_v63 = vcombine.high %v2502_v29, %v2502_v29  ;;  %v2518_v13 = vrot.slane %v2502_v29, %v4642_v28  ;;  %v3952_v21 = vpop.f32.mrb[41].mxu0 }
 0x4b7   : > { %v2505_v10 = vpop.f32.mrb[42].mxu0 }
 0x4b8   : > { %v2525_v40 = vrot.slane %v2511_v63, %v4642_v28  ;;  %v2526_v37 = vcombine.high %v2518_v13, %v2518_v13  ;;  %v2534_v55 = vrot.slane %v2518_v13, %v4642_v28  ;;  %v2560_v1 = vcombine.high %v2505_v10, %v2505_v10  ;;  %v3953_v8 = vpop.f32.mrb[43].mxu0 }
 0x4b9   : > { %v2567_v34 = vrot.slane %v2505_v10, %v4642_v28 }
 0x4ba   : > { %v2527_v46 = vcombine.high %v2525_v40, %v2525_v40  ;;  %v2541_v62 = vrot.slane %v2525_v40, %v4642_v28  ;;  %v2548_v50 = vrot.slane %v2526_v37, %v4642_v28  ;;  %v5289_v38 = vrot.slane %v2560_v1, %v4642_v28 }
 0x4bb   : > { %v2575_v43 = vcombine.high %v2567_v34, %v2567_v34  ;;  %v2556_v25 = vcombine.high %v2534_v55, %v2534_v55  ;;  %v5292_v6 = vrot.slane %v2567_v34, %v4642_v28  ;;  %v2612_v19 = vrot.slane %v2534_v55, %v4645_v42 }
 0x4bc   : > { %v2558_v11 = vcombine.high %v2548_v50, %v2548_v50  ;;  %v5301_v15 = vrot.slane %v5289_v38, %v4642_v28  ;;  %v2557_v63 = vcombine.high %v2541_v62, %v2541_v62  ;;  %v2555_v13 = vrot.slane %v2527_v46, %v4642_v28 }
 0x4bd   : > { %v5295_v20 = vrot.slane %v2575_v43, %v4642_v28  ;;  %v3934_v32 = vpop.f32.mrb[24].mxu1  ;;  %v2620_v57 = vrot.slane %v2556_v25, %v4645_v42  ;;  %v2616_v37 = vrot.slane %v2548_v50, %v4645_v42  ;;  %v2628_v1 = vrot.slane %v2541_v62, %v4645_v42 }
 0x4be   : > { %v2394_v2 = vpop.f32.mrb[25].mxu1  ;;  %v2624_v29 = vrot.slane %v2558_v11, %v4645_v42  ;;  %v2605_v34 = vcombine.high %v5292_v6, %v5292_v6  ;;  %v2559_v62 = vcombine.high %v2555_v13, %v2555_v13  ;;  %v2632_v45 = vrot.slane %v2555_v13, %v4645_v42 }
 0x4bf   : > { %v5305_v21 = vadd.f32 %v3934_v32, %v2620_v57  ;;  %v5307_v10 = vadd.f32 %v2612_v19, %v2394_v2  ;;  %v3935_v40 = vpop.f32.mrb[26].mxu1  ;;  %v2607_v46 = vcombine.high %v5295_v20, %v5295_v20  ;;  %v2636_v2 = vrot.slane %v2557_v63, %v4645_v42 }
 0x4c0   : > { %v5311_v55 = vadd.f32 %v3935_v40, %v2624_v29  ;;  %v2397_v8 = vpop.f32.mrb[27].mxu1  ;;  %v2606_v53 = vcombine.high %v5301_v15, %v5301_v15  ;;  %v5334_v4 = vrot.slane %v2605_v34, %v4645_v42  ;;  %v2640_v35 = vrot.slane %v2559_v62, %v4645_v42 }
 0x4c1   : > { %v2719_v25 = vsel %vm1419_vm8, %v5305_v21, -inf  ;;  %v2705_v50 = vsel %vm1419_vm8, %v5307_v10, -inf  ;;  %v5323_v11 = vadd.f32 %v2616_v37, %v2397_v8  ;;  %v5338_v63 = vrot.slane %v2607_v46, %v4645_v42 }
 0x4c2   : > { %v2720_v32 = vrot.slane %v2719_v25, 4  ;;  %v2706_v57 = vrot.slane %v2705_v50, 4  ;;  %v2726_v19 = vsel %vm1419_vm8, %v5311_v55, -inf }
 0x4c3   : > { %v2727_v29 = vrot.slane %v2726_v19, 4  ;;  %v2712_v40 = vsel %vm1419_vm8, %v5323_v11, -inf }
 0x4c4   : > { %v2721_v23 = vmax.f32 %v2719_v25, %v2720_v32  ;;  %v2707_v37 = vmax.f32 %v2705_v50, %v2706_v57  ;;  %v2713_v8 = vrot.slane %v2712_v40, 4  ;;  %v5347_v57 = vrot.slane %v2606_v53, %v4645_v42 }
 0x4c5   : > { %v2728_v3 = vmax.f32 %v2726_v19, %v2727_v29  ;;  %v3938_v51 = vpop.f32.mrb[28].mxu1 }
 0x4c6   : > { %v2722_v13 = vrot.slane %v2721_v23, 2  ;;  %v2708_v27 = vrot.slane %v2707_v37, 2  ;;  %v2714_v9 = vmax.f32 %v2712_v40, %v2713_v8  ;;  %v5342_v41 = vadd.f32 %v3938_v51, %v2636_v2  ;;  %v2410_v25 = vpop.f32.mrb[29].mxu1 }
 0x4c7   : > { %v2729_v50 = vrot.slane %v2728_v3, 2  ;;  %v5344_v32 = vadd.f32 %v2628_v1, %v2410_v25  ;;  %v3939_v34 = vpop.f32.mrb[30].mxu1 }
 0x4c8   : > { %v2723_v62 = vmax.f32 %v2721_v23, %v2722_v13  ;;  %v2709_v19 = vmax.f32 %v2707_v37, %v2708_v27  ;;  %v2715_v29 = vrot.slane %v2714_v9, 2  ;;  %v2747_v14 = vsel %vm1419_vm8, %v5342_v41, -inf  ;;  %v2413_v40 = vpop.f32.mrb[31].mxu1 }
 0x4c9   : > { %v2730_v51 = vmax.f32 %v2728_v3, %v2729_v50  ;;  %v2748_v2 = vrot.slane %v2747_v14, 4  ;;  %v2733_v1 = vsel %vm1419_vm8, %v5344_v32, -inf  ;;  %v5355_v8 = vadd.f32 %v3939_v34, %v2640_v35 }
 0x4ca   : > { %v2724_v25 = vrot.slane %v2723_v62, 1  ;;  %v2710_v53 = vrot.slane %v2709_v19, 1  ;;  %v2716_v0 = vmax.f32 %v2714_v9, %v2715_v29  ;;  %v2734_v60 = vrot.slane %v2733_v1, 4 }
 0x4cb   : > { %v2731_v5 = vrot.slane %v2730_v51, 1  ;;  %v2749_v33 = vmax.f32 %v2747_v14, %v2748_v2  ;;  %v2754_v27 = vsel %vm1419_vm8, %v5355_v8, -inf  ;;  %v5359_v23 = vadd.f32 %v2632_v45, %v2413_v40 }
 0x4cc   : > { %v2725_v37 = vmax.f32 %v2723_v62, %v2724_v25  ;;  %v2711_v13 = vmax.f32 %v2709_v19, %v2710_v53  ;;  %v2717_v3 = vrot.slane %v2716_v0, 1  ;;  %v2735_v50 = vmax.f32 %v2733_v1, %v2734_v60 }
 0x4cd   : > { %v2732_v56 = vmax.f32 %v2730_v51, %v2731_v5  ;;  %v2750_v36 = vrot.slane %v2749_v33, 2  ;;  %v2755_v46 = vrot.slane %v2754_v27, 4  ;;  %v2740_v35 = vsel %vm1419_vm8, %v5359_v23, -inf  ;;  %v3942_v34 = vpop.f32.mrb[32].mxu1 }
 0x4ce   : > { %v2819_v9 = vsub.f32 %v5305_v21, %v2725_v37  ;;  %v2817_v14 = vsub.f32 %v5307_v10, %v2711_v13  ;;  %v2718_v29 = vmax.f32 %v2716_v0, %v2717_v3  ;;  %v2736_v2 = vrot.slane %v2735_v50, 2  ;;  %v2426_v49 = vpop.f32.mrb[33].mxu1 }
 0x4cf   : > { %v2820_v45 = vsub.f32 %v5311_v55, %v2732_v56  ;;  %v2751_v62 = vmax.f32 %v2749_v33, %v2750_v36  ;;  %v2756_v19 = vmax.f32 %v2754_v27, %v2755_v46  ;;  %v2741_v40 = vrot.slane %v2740_v35, 4  ;;  %v3943_v60 = vpop.f32.mrb[34].mxu1 }
 0x4d0   : > { %v2837_v5 = vmul.f32 1.442695, %v2819_v9  ;;  %v2833_v51 = vmul.f32 1.442695, %v2817_v14  ;;  %v2818_v1 = vsub.f32 %v5323_v11, %v2718_v29  ;;  %v2737_v25 = vmax.f32 %v2735_v50, %v2736_v2  ;;  %v2429_v53 = vpop.f32.mrb[35].mxu1 }
 0x4d1   : > { %v2839_v43 = vmul.f32 1.442695, %v2820_v45  ;;  %v2752_v7 = vrot.slane %v2751_v62, 1  ;;  %v2757_v21 = vrot.slane %v2756_v19, 2  ;;  %v2742_v37 = vmax.f32 %v2740_v35, %v2741_v40 }
 0x4d2   : > { %4136 = vpow2.f32 %v2837_v5  ;;  %v2835_v0 = vmul.f32 1.442695, %v2818_v1  ;;  %v2738_v10 = vrot.slane %v2737_v25, 1  ;;  %v5368_v13 = vadd.f32 %v3942_v34, %v5334_v4 }
 0x4d3   : > { %4138 = vpow2.f32 %v2833_v51  ;;  %v2753_v33 = vmax.f32 %v2751_v62, %v2752_v7  ;;  %v2758_v56 = vmax.f32 %v2756_v19, %v2757_v21  ;;  %v2743_v36 = vrot.slane %v2742_v37, 2 }
 0x4d4   : > { %4140 = vpow2.f32 %v2839_v43  ;;  %v2739_v55 = vmax.f32 %v2737_v25, %v2738_v10  ;;  %v2775_v11 = vsel %vm1419_vm8, %v5368_v13, -inf  ;;  %v5966_v46 = vrot.slane %v5292_v6, %v4645_v42 }
 0x4d5   : > { %4142 = vpow2.f32 %v2835_v0  ;;  %v2823_v3 = vsub.f32 %v5342_v41, %v2753_v33  ;;  %v2759_v50 = vrot.slane %v2758_v56, 1  ;;  %v2744_v4 = vmax.f32 %v2742_v37, %v2743_v36  ;;  %v3946_v35 = vpop.f32.mrb[36].mxu1 }
 0x4d6   : > { %v5375_v27 = vadd.f32 %v5966_v46, %v2426_v49  ;;  %v2821_v7 = vsub.f32 %v5344_v32, %v2739_v55  ;;  %v2776_v34 = vrot.slane %v2775_v11, 4  ;;  %v5382_v9 = vadd.f32 %v3943_v60, %v5338_v63  ;;  %v2442_v14 = vpop.f32.mrb[37].mxu1 }
 0x4d7   : > { %v2845_v29 = vmul.f32 1.442695, %v2823_v3  ;;  %v2760_v6 = vmax.f32 %v2758_v56, %v2759_v50  ;;  %v2745_v49 = vrot.slane %v2744_v4, 1  ;;  %v5384_v45 = vpop.f32.mrb[38].mxu1  ;;  %v5967_v32 = vrot.slane %v5295_v20, %v4645_v42  ;;  %v4068_v50 = vld [vmem:[%s5855_s15] sm:$0xff]  }
 0x4d8   : > { %v2761_v43 = vsel %vm1419_vm8, %v5375_v27, -inf  ;;  %v2841_v41 = vmul.f32 1.442695, %v2821_v7  ;;  %v2777_v62 = vmax.f32 %v2775_v11, %v2776_v34  ;;  %v2782_v19 = vsel %vm1419_vm8, %v5382_v9, -inf  ;;  %v5393_v5 = vpop.f32.mrb[39].mxu1  ;;  %3961 = vmatpush3.bf16.msra.mxu0 %v4068_v50 }
 0x4d9   : > { %v2762_v2 = vrot.slane %v2761_v43, 4  ;;  %v5391_v40 = vadd.f32 %v5967_v32, %v2429_v53  ;;  %4144 = vpow2.f32 %v2845_v29  ;;  %v2824_v63 = vsub.f32 %v5355_v8, %v2760_v6 }
 0x4da   : > { %v2746_v60 = vmax.f32 %v2744_v4, %v2745_v49  ;;  %4146 = vpow2.f32 %v2841_v41  ;;  %v2778_v1 = vrot.slane %v2777_v62, 2  ;;  %v2783_v25 = vrot.slane %v2782_v19, 4 }
 0x4db   : > { %v2763_v51 = vmax.f32 %v2761_v43, %v2762_v2  ;;  %v2768_v21 = vsel %vm1419_vm8, %v5391_v40, -inf  ;;  %v2847_v37 = vmul.f32 1.442695, %v2824_v63  ;;  %v5402_v36 = vadd.f32 %v3946_v35, %v5347_v57 }
 0x4dc   : > { %v2822_v0 = vsub.f32 %v5359_v23, %v2746_v60  ;;  %v2769_v20 = vrot.slane %v2768_v21, 4  ;;  %v5399_v53 = vpop.eup %4136  ;;  %v2779_v33 = vmax.f32 %v2777_v62, %v2778_v1  ;;  %v2784_v56 = vmax.f32 %v2782_v19, %v2783_v25 }
 0x4dd   : > { %v2764_v10 = vrot.slane %v2763_v51, 2  ;;  %v5968_v8 = vrot.slane %v5301_v15, %v4645_v42  ;;  %v5409_v11 = vpop.eup %4138  ;;  %v2879_v46 = vsel %vm1419_vm8, %v5399_v53, 0.0  ;;  %4148 = vpow2.f32 %v2847_v37 }
 0x4de   : > { %v2843_v23 = vmul.f32 1.442695, %v2822_v0  ;;  %v5416_v4 = vpop.eup %4140  ;;  %v2880_v57 = vrot.slane %v2879_v46, 4  ;;  %v2865_v15 = vsel %vm1419_vm8, %v5409_v11, 0.0  ;;  %v2780_v35 = vrot.slane %v2779_v33, 1 }
 0x4df   : > { %v5407_v55 = vadd.f32 %v5968_v8, %v2442_v14  ;;  %v2765_v3 = vmax.f32 %v2763_v51, %v2764_v10  ;;  %v2785_v7 = vrot.slane %v2784_v56, 2  ;;  %v5420_v34 = vpop.eup %4142  ;;  %v2866_v43 = vrot.slane %v2865_v15, 4 }
 0x4e0   : > { %v2886_v14 = vsel %vm1419_vm8, %v5416_v4, 0.0  ;;  %4150 = vpow2.f32 %v2843_v23  ;;  %v2881_v6 = vadd.f32 %v2880_v57, %v2879_v46  ;;  %v2872_v2 = vsel %vm1419_vm8, %v5420_v34, 0.0 }
 0x4e1   : > { %v2766_v29 = vrot.slane %v2765_v3, 1  ;;  %v2887_v49 = vrot.slane %v2886_v14, 4  ;;  %v2781_v41 = vmax.f32 %v2779_v33, %v2780_v35  ;;  %v2576_v62 = vcombine.high %v5289_v38, %v5289_v38 }
 0x4e2   : > { %v2867_v19 = vadd.f32 %v2866_v43, %v2865_v15  ;;  %v2873_v32 = vrot.slane %v2872_v2, 4  ;;  %v2882_v60 = vrot.slane %v2881_v6, 2  ;;  %v2786_v25 = vmax.f32 %v2784_v56, %v2785_v7  ;;  %v4069_v56 = vld [vmem:[%s5856_s16] sm:$0xff]  }
 0x4e3   : > { %v2767_v63 = vmax.f32 %v2765_v3, %v2766_v29  ;;  %v2888_v51 = vadd.f32 %v2887_v49, %v2886_v14  ;;  %v2827_v1 = vsub.f32 %v5368_v13, %v2781_v41  ;;  %v5429_v37 = vpop.eup %4144  ;;  %v2770_v46 = vmax.f32 %v2768_v21, %v2769_v20  ;;  %3955 = vmatpush3.bf16.msra.mxu1 %v4069_v56 }
 0x4e4   : > { %v2868_v0 = vrot.slane %v2867_v19, 2  ;;  %v2874_v10 = vadd.f32 %v2873_v32, %v2872_v2  ;;  %v5432_v23 = vpop.eup %4146  ;;  %v2883_v33 = vadd.f32 %v2882_v60, %v2881_v6  ;;  %v2907_v38 = vsel %vm1419_vm8, %v5429_v37, 0.0  ;;  %3966 = vmatprep.subr.bf16.mxu1 %v5964_v31 }
 0x4e5   : > { %v2825_v8 = vsub.f32 %v5375_v27, %v2767_v63  ;;  %v2889_v50 = vrot.slane %v2888_v51, 2  ;;  %v2853_v3 = vmul.f32 1.442695, %v2827_v1  ;;  %v2908_v35 = vrot.slane %v2907_v38, 4 }
 0x4e6   : > { %v2869_v57 = vadd.f32 %v2868_v0, %v2867_v19  ;;  %v2875_v15 = vrot.slane %v2874_v10, 2  ;;  %v2893_v13 = vsel %vm1419_vm8, %v5432_v23, 0.0  ;;  %v2884_v27 = vrot.slane %v2883_v33, 1 }
 0x4e7   : > { %v2890_v21 = vadd.f32 %v2889_v50, %v2888_v51  ;;  %v2894_v20 = vrot.slane %v2893_v13, 4  ;;  %4152 = vpow2.f32 %v2853_v3  ;;  %v5441_v7 = vpop.eup %4148  ;;  %v2909_v29 = vadd.f32 %v2908_v35, %v2907_v38 }
 0x4e8   : > { %v2870_v43 = vrot.slane %v2869_v57, 1  ;;  %v2876_v14 = vadd.f32 %v2875_v15, %v2874_v10  ;;  %v2787_v6 = vrot.slane %v2786_v25, 1  ;;  %v2885_v49 = vadd.f32 %v2884_v27, %v2883_v33 }
 0x4e9   : > { %v2891_v2 = vrot.slane %v2890_v21, 1  ;;  %v2895_v41 = vadd.f32 %v2894_v20, %v2893_v13  ;;  %v2914_v19 = vsel %vm1419_vm8, %v5441_v7, 0.0  ;;  %v2910_v51 = vrot.slane %v2909_v29, 2 }
 0x4ea   : > { %v5446_v32 = vpop.eup %4150  ;;  %v2871_v63 = vadd.f32 %v2870_v43, %v2869_v57  ;;  %v2877_v60 = vrot.slane %v2876_v14, 1  ;;  %v2915_v1 = vrot.slane %v2914_v19, 4  ;;  %4154 = vrcp.f32 %v2885_v49 }
 0x4eb   : > { %v2892_v0 = vadd.f32 %v2891_v2, %v2890_v21  ;;  %v2896_v10 = vrot.slane %v2895_v41, 2  ;;  %v2900_v50 = vsel %vm1419_vm8, %v5446_v32, 0.0  ;;  %v2911_v38 = vadd.f32 %v2910_v51, %v2909_v29 }
 0x4ec   : > { %4156 = vrcp.f32 %v2871_v63  ;;  %v2878_v33 = vadd.f32 %v2877_v60, %v2876_v14  ;;  %v2916_v3 = vadd.f32 %v2915_v1, %v2914_v19  ;;  %v2901_v35 = vrot.slane %v2900_v50, 4 }
 0x4ed   : > { %4158 = vrcp.f32 %v2892_v0  ;;  %v2897_v15 = vadd.f32 %v2896_v10, %v2895_v41  ;;  %v2788_v13 = vmax.f32 %v2786_v25, %v2787_v6  ;;  %v2912_v56 = vrot.slane %v2911_v38, 1 }
 0x4ee   : > { %4160 = vrcp.f32 %v2878_v33  ;;  %v2917_v57 = vrot.slane %v2916_v3, 2  ;;  %v2771_v27 = vrot.slane %v2770_v46, 2  ;;  %v2902_v43 = vadd.f32 %v2901_v35, %v2900_v50 }
 0x4ef   : > { %v2898_v20 = vrot.slane %v2897_v15, 1  ;;  %v2828_v21 = vsub.f32 %v5382_v9, %v2788_v13  ;;  %v5452_v49 = vrot.slane %v2576_v62, %v4642_v28  ;;  %v2849_v63 = vmul.f32 1.442695, %v2825_v8 }
 0x4f0   : > { %v2918_v2 = vadd.f32 %v2917_v57, %v2916_v3  ;;  %v2772_v14 = vmax.f32 %v2770_v46, %v2771_v27  ;;  %v2803_v29 = vsel %vm1419_vm8, %v5402_v36, -inf  ;;  %v2913_v25 = vadd.f32 %v2912_v56, %v2911_v38 }
 0x4f1   : > { %v5456_v41 = vpop.eup %4152  ;;  %v2899_v6 = vadd.f32 %v2898_v20, %v2897_v15  ;;  %v2903_v19 = vrot.slane %v2902_v43, 2  ;;  %v2804_v60 = vrot.slane %v2803_v29, 4  ;;  %v2855_v9 = vmul.f32 1.442695, %v2828_v21 }
 0x4f2   : > { %v2919_v51 = vrot.slane %v2918_v2, 1  ;;  %v2935_v1 = vsel %vm1419_vm8, %v5456_v41, 0.0  ;;  %v2773_v0 = vrot.slane %v2772_v14, 1  ;;  %v5462_v50 = vsel %vm1419_vm8, %v5407_v55, -inf }
 0x4f3   : > { %4162 = vrcp.f32 %v2899_v6  ;;  %v2904_v28 = vadd.f32 %v2903_v19, %v2902_v43  ;;  %v2936_v62 = vrot.slane %v2935_v1, 4  ;;  %v2805_v8 = vmax.f32 %v2803_v29, %v2804_v60 }
 0x4f4   : > { %v2920_v46 = vadd.f32 %v2919_v51, %v2918_v2  ;;  %4164 = vpow2.f32 %v2849_v63  ;;  %v2774_v10 = vmax.f32 %v2772_v14, %v2773_v0  ;;  %v4155_v33 = vpop.eup %4154  ;;  %v2608_v38 = vcombine.high %v5452_v49, %v5452_v49 }
 0x4f5   : > { %4166 = vrcp.f32 %v2913_v25  ;;  %v2995_v35 = vmul.f32 %v4155_v33, %v5399_v53  ;;  %v2905_v13 = vrot.slane %v2904_v28, 1  ;;  %v2937_v56 = vadd.f32 %v2936_v62, %v2935_v1 }
 0x4f6   : > { %v4157_v15 = vpop.eup %4156  ;;  %4168 = vpow2.f32 %v2855_v9  ;;  %v2806_v20 = vrot.slane %v2805_v8, 2  ;;  %v5969_v2 = vmax.f32 %v5191_v16, 0.0  ;;  %v2826_v53 = vsub.f32 %v5391_v40, %v2774_v10 }
 0x4f7   : > { %v4159_v57 = vpop.eup %4158  ;;  %v2993_v27 = vmul.f32 %v4157_v15, %v5409_v11  ;;  %4170 = vrcp.f32 %v2920_v46  ;;  %v3151_v14 = vsel %vm1852_vm9, %v2995_v35, 0.0  ;;  %v5970_v25 = vmax.f32 %v5189_v24, 0.0 }
 0x4f8   : > { %v4161_v21 = vpop.eup %4160  ;;  %v3011_v63 = vmul.f32 %v2995_v35, %v5969_v2  ;;  %v2996_v29 = vmul.f32 %v4159_v57, %v5416_v4  ;;  %v5481_v60 = vrot.slane %v2608_v38, %v4645_v42  ;;  %v3152_v16 = vrot.slane %v3151_v14, 4 }
 0x4f9   : > { %v3009_v6 = vmul.f32 %v2993_v27, %v5970_v25  ;;  %v3137_v19 = vsel %vm1852_vm9, %v2993_v27, 0.0  ;;  %v2994_v11 = vmul.f32 %v4161_v21, %v5420_v34  ;;  %v5971_v1 = vmax.f32 %v5193_v22, 0.0 }
 0x4fa   : > { %v3039_v51 = vsel %vm1049_vm7, %v3011_v63, 0.0  ;;  %v2906_v0 = vadd.f32 %v2905_v13, %v2904_v28  ;;  %v2938_v62 = vrot.slane %v2937_v56, 2  ;;  %v5487_v24 = vmax.f32 %v2805_v8, %v2806_v20 }
 0x4fb   : > { %v3012_v9 = vmul.f32 %v2996_v29, %v5971_v1  ;;  %v3040_v4 = vrot.slane %v3039_v51, 4  ;;  %v3025_v40 = vsel %vm1049_vm7, %v3009_v6, 0.0  ;;  %v3138_v10 = vrot.slane %v3137_v19, 4 }
 0x4fc   : > { %v3026_v46 = vrot.slane %v3025_v40, 4  ;;  %v5972_v33 = vmax.f32 %v5196_v54, 0.0  ;;  %v3158_v22 = vsel %vm1852_vm9, %v2996_v29, 0.0  ;;  %v2851_v27 = vmul.f32 1.442695, %v2826_v53 }
 0x4fd   : > { %v3046_v34 = vsel %vm1049_vm7, %v3012_v9, 0.0  ;;  %v4163_v15 = vpop.eup %4162  ;;  %v3041_v35 = vadd.f32 %v3040_v4, %v3039_v51  ;;  %v5495_v13 = vadd.f32 %v3152_v16, %v3151_v14  ;;  %v3144_v20 = vsel %vm1852_vm9, %v2994_v11, 0.0 }
 0x4fe   : > { %v3010_v38 = vmul.f32 %v2994_v11, %v5972_v33  ;;  %v3047_v57 = vrot.slane %v3046_v34, 4  ;;  %v5493_v28 = vpop.eup %4164  ;;  %v3027_v21 = vadd.f32 %v3026_v46, %v3025_v40  ;;  %v3145_v6 = vrot.slane %v3144_v20, 4 }
 0x4ff   : > { %v5499_v2 = vpop.eup %4166  ;;  %v3042_v63 = vrot.slane %v3041_v35, 2  ;;  %v3139_v29 = vadd.f32 %v3138_v10, %v3137_v19  ;;  %v2997_v53 = vmul.f32 %v4163_v15, %v5432_v23  ;;  %4172 = vrcp.f32 %v2906_v0 }
 0x500   : > { %v3032_v8 = vsel %vm1049_vm7, %v3010_v38, 0.0  ;;  %v3048_v54 = vadd.f32 %v3047_v57, %v3046_v34  ;;  %v5501_v51 = vpop.eup %4168  ;;  %v3028_v1 = vrot.slane %v3027_v21, 2  ;;  %v3159_v4 = vrot.slane %v3158_v22, 4 }
 0x501   : > { %v3033_v25 = vrot.slane %v3032_v8, 4  ;;  %v5504_v14 = vpop.eup %4170  ;;  %v3043_v16 = vadd.f32 %v3042_v63, %v3041_v35  ;;  %v3146_v46 = vadd.f32 %v3145_v6, %v3144_v20  ;;  %v5973_v33 = vmax.f32 %v5212_v48, 0.0 }
 0x502   : > { %v3049_v9 = vrot.slane %v3048_v54, 2  ;;  %v3029_v11 = vadd.f32 %v3028_v1, %v3027_v21  ;;  %v2939_v38 = vadd.f32 %v2938_v62, %v2937_v56  ;;  %v3154_v3 = vrot.slane %v5495_v13, 2 }
 0x503   : > { %v3034_v40 = vadd.f32 %v3033_v25, %v3032_v8  ;;  %v3013_v34 = vmul.f32 %v2997_v53, %v5973_v33  ;;  %v3044_v57 = vrot.slane %v3043_v16, 1  ;;  %v3140_v23 = vrot.slane %v3139_v29, 2 }
 0x504   : > { %v3050_v43 = vadd.f32 %v3049_v9, %v3048_v54  ;;  %v3030_v10 = vrot.slane %v3029_v11, 1  ;;  %v2940_v15 = vrot.slane %v2939_v38, 1  ;;  %v5511_v21 = vsel %vm1852_vm9, %v2997_v53, 0.0 }
 0x505   : > { %v3035_v19 = vrot.slane %v3034_v40, 2  ;;  %v3053_v0 = vsel %vm1049_vm7, %v3013_v34, 0.0  ;;  %v3045_v35 = vadd.f32 %v3044_v57, %v3043_v16  ;;  %v3147_v8 = vrot.slane %v3146_v46, 2 }
 0x506   : > { %v3051_v63 = vrot.slane %v3050_v43, 1  ;;  %v3054_v48 = vrot.slane %v3053_v0, 4  ;;  %v2941_v20 = vadd.f32 %v2940_v15, %v2939_v38  ;;  %v2921_v56 = vsel %vm1419_vm8, %v5493_v28, 0.0 }
 0x507   : > { %v3036_v31 = vadd.f32 %v3035_v19, %v3034_v40  ;;  %v3289_v62 = vpack.c.bf16 %v3045_v35, %v3045_v35  ;;  %v3031_v54 = vadd.f32 %v3030_v10, %v3029_v11  ;;  %v5515_v25 = vadd.f32 %v3159_v4, %v3158_v22 }
 0x508   : > { %v2922_v6 = vrot.slane %v2921_v56, 4  ;;  %v5517_v1 = vadd.f32 %v3051_v63, %v3050_v43  ;;  %v3055_v9 = vadd.f32 %v3054_v48, %v3053_v0  ;;  %4174 = vrcp.f32 %v2941_v20 }
 0x509   : > { %v2942_v16 = vsel %vm1419_vm8, %v5501_v51, 0.0  ;;  %v5521_v53 = vadd.f32 %v3140_v23, %v3139_v29  ;;  %v3037_v40 = vrot.slane %v3036_v31, 1  ;;  %v3166_v33 = vrot.slane %v5511_v21, 4  ;;  %v4173_v38 = vpop.eup %4172 }
 0x50a   : > { %v2923_v34 = vadd.f32 %v2922_v6, %v2921_v56  ;;  %v5524_v57 = vadd.f32 %v3147_v8, %v3146_v46  ;;  %v3056_v11 = vrot.slane %v3055_v9, 2  ;;  %v2943_v22 = vrot.slane %v2942_v16, 4 }
 0x50b   : > { %4176 = vpow2.f32 %v2851_v27  ;;  %v5526_v4 = vunpack.c.l.b16 %v3289_v62  ;;  %v3287_v43 = vpack.c.bf16 %v3031_v54, %v3031_v54  ;;  %v5529_v19 = vmul.f32 %v4173_v38, %v5446_v32 }
 0x50c   : > { %v2924_v10 = vrot.slane %v2923_v34, 2  ;;  %v3290_v29 = vpack.c.bf16 %v5517_v1, %v5517_v1  ;;  %v2944_v23 = vadd.f32 %v2943_v22, %v2942_v16  ;;  %v2808_v0 = vrot.slane %v5487_v24, 1 }
 0x50d   : > { %v5974_v15 = vrot.slane %v5462_v50, 4  ;;  %v3038_v35 = vadd.f32 %v3037_v40, %v3036_v31  ;;  %v5975_v27 = vmax.f32 %v5220_v58, 0.0  ;;  %v5542_v32 = vadd.f32 %v5384_v45, %v5481_v60 }
 0x50e   : > { %v2925_v8 = vadd.f32 %v2924_v10, %v2923_v34  ;;  %v3057_v48 = vadd.f32 %v3056_v11, %v3055_v9  ;;  %v2945_v20 = vrot.slane %v2944_v23, 2  ;;  %v2809_v56 = vmax.f32 %v5487_v24, %v2808_v0 }
 0x50f   : > { %v2791_v46 = vmax.f32 %v5462_v50, %v5974_v15  ;;  %v3014_v63 = vmul.f32 %v5529_v19, %v5975_v27  ;;  %v2810_v31 = vsel %vm1419_vm8, %v5542_v32, -inf  ;;  %v5976_v58 = vrot.slane %v5452_v49, %v4645_v42 }
 0x510   : > { %v2926_v6 = vrot.slane %v2925_v8, 1  ;;  %v5554_v1 = vunpack.c.l.b16 %v3287_v43  ;;  %v2946_v60 = vadd.f32 %v2945_v20, %v2944_v23  ;;  %v2831_v9 = vsub.f32 %v5402_v36, %v2809_v56 }
 0x511   : > { %v2792_v62 = vrot.slane %v2791_v46, 2  ;;  %v3060_v54 = vsel %vm1049_vm7, %v3014_v63, 0.0  ;;  %v5552_v50 = vadd.f32 %v5976_v58, %v5393_v5  ;;  %v2811_v40 = vrot.slane %v2810_v31, 4 }
 0x512   : > { %v3061_v45 = vrot.slane %v3060_v54, 4  ;;  %v2927_v24 = vadd.f32 %v2926_v6, %v2925_v8  ;;  %v4175_v38 = vpop.eup %4174  ;;  %v3058_v11 = vrot.slane %v3057_v48, 1  ;;  %v2947_v10 = vrot.slane %v2946_v60, 1 }
 0x513   : > { %v2793_v16 = vmax.f32 %v2791_v46, %v2792_v62  ;;  %v2796_v34 = vsel %vm1419_vm8, %v5552_v50, -inf  ;;  %v2861_v0 = vmul.f32 1.442695, %v2831_v9  ;;  %v3003_v42 = vmul.f32 %v4175_v38, %v5456_v41 }
 0x514   : > { %v3062_v22 = vadd.f32 %v3061_v45, %v3060_v54  ;;  %4178 = vrcp.f32 %v2927_v24  ;;  %v2812_v49 = vmax.f32 %v2810_v31, %v2811_v40  ;;  %v2948_v36 = vadd.f32 %v2947_v10, %v2946_v60 }
 0x515   : > { %v2794_v5 = vrot.slane %v2793_v16, 1  ;;  %v5560_v43 = vpop.eup %4176  ;;  %4180 = vpow2.f32 %v2861_v0  ;;  %v2797_v15 = vrot.slane %v2796_v34, 4  ;;  %v5977_v46 = vmax.f32 %v5237_v59, 0.0 }
 0x516   : > { %v3063_v23 = vrot.slane %v3062_v22, 2  ;;  %v3207_v63 = vsel %vm1852_vm9, %v3003_v42, 0.0  ;;  %v2928_v8 = vsel %vm1419_vm8, %v5560_v43, 0.0  ;;  %v3288_v56 = vpack.c.bf16 %v3038_v35, %v3038_v35 }
 0x517   : > { %v3019_v27 = vmul.f32 %v3003_v42, %v5977_v46  ;;  %v2795_v20 = vmax.f32 %v2793_v16, %v2794_v5  ;;  %v5567_v41 = vadd.f32 %v3058_v11, %v3057_v48  ;;  %4182 = vrcp.f32 %v2948_v36 }
 0x518   : > { %v2929_v62 = vrot.slane %v2928_v8, 4  ;;  %v2813_v31 = vrot.slane %v2812_v49, 2  ;;  %v2798_v58 = vmax.f32 %v2796_v34, %v2797_v15  ;;  %v5571_v45 = vadd.f32 %v3063_v23, %v3062_v22 }
 0x519   : > { %v3095_v54 = vsel %vm1049_vm7, %v3019_v27, 0.0  ;;  %v2829_v6 = vsub.f32 %v5407_v55, %v2795_v20  ;;  %v3208_v60 = vrot.slane %v3207_v63, 4  ;;  %v5575_v35 = vmul.f32 %v5499_v2, %v5429_v37 }
 0x51a   : > { %v3096_v59 = vrot.slane %v3095_v54, 4  ;;  %v2930_v9 = vadd.f32 %v2929_v62, %v2928_v8  ;;  %v2814_v40 = vmax.f32 %v2812_v49, %v2813_v31  ;;  %v2799_v38 = vrot.slane %v2798_v58, 2 }
 0x51b   : > { %v2857_v24 = vmul.f32 1.442695, %v2829_v6  ;;  %v5577_v48 = vunpack.c.l.b16 %v3290_v29  ;;  %v5581_v55 = vmul.f32 %v5504_v14, %v5441_v7  ;;  %v5978_v10 = vmax.f32 %v5215_v61, 0.0 }
 0x51c   : > { %v3097_v16 = vadd.f32 %v3096_v59, %v3095_v54  ;;  %v2931_v11 = vrot.slane %v2930_v9, 2  ;;  %v2815_v34 = vrot.slane %v2814_v40, 1  ;;  %v2800_v22 = vmax.f32 %v2798_v58, %v2799_v38 }
 0x51d   : > { %4184 = vpow2.f32 %v2857_v24  ;;  %v3015_v0 = vmul.f32 %v5575_v35, %v5978_v10  ;;  %v5586_v42 = vunpack.c.l.b16 %v3288_v56  ;;  %v3291_v37 = vpack.c.bf16 %v5567_v41, %v5567_v41 }
 0x51e   : > { %v3098_v2 = vrot.slane %v3097_v16, 2  ;;  %v2932_v29 = vadd.f32 %v2931_v11, %v2930_v9  ;;  %v4179_v5 = vpop.eup %4178  ;;  %v3065_v49 = vrot.slane %v5571_v45, 1  ;;  %v5591_v23 = vadd.f32 %v3208_v60, %v3207_v63 }
 0x51f   : > { %v2816_v7 = vmax.f32 %v2814_v40, %v2815_v34  ;;  %v2801_v14 = vrot.slane %v2800_v22, 1  ;;  %v5593_v36 = vpop.eup %4180  ;;  %v3001_v61 = vmul.f32 %v4179_v5, %v5493_v28  ;;  %v5979_v27 = vmax.f32 %v5217_v26, 0.0 }
 0x520   : > { %v3099_v15 = vadd.f32 %v3098_v2, %v3097_v16  ;;  %v2933_v46 = vrot.slane %v2932_v29, 1  ;;  %v2963_v20 = vsel %vm1419_vm8, %v5593_v36, 0.0  ;;  %v3067_v63 = vsel %vm1049_vm7, %v3015_v0, 0.0 }
 0x521   : > { %v3016_v8 = vmul.f32 %v5581_v55, %v5979_v27  ;;  %v2832_v56 = vsub.f32 %v5542_v32, %v2816_v7  ;;  %v2802_v62 = vmax.f32 %v2800_v22, %v2801_v14  ;;  %v4183_v54 = vpop.eup %4182  ;;  %v5980_v31 = vmax.f32 %v5234_v47, 0.0 }
 0x522   : > { %v3100_v6 = vrot.slane %v3099_v15, 1  ;;  %v3193_v28 = vsel %vm1852_vm9, %v3001_v61, 0.0  ;;  %v2934_v59 = vadd.f32 %v2933_v46, %v2932_v29  ;;  %v3004_v26 = vmul.f32 %v4183_v54, %v5501_v51 }
 0x523   : > { %v3017_v58 = vmul.f32 %v3001_v61, %v5980_v31  ;;  %v3194_v60 = vrot.slane %v3193_v28, 4  ;;  %v2964_v9 = vrot.slane %v2963_v20, 4  ;;  %v2863_v24 = vmul.f32 1.442695, %v2832_v56 }
 0x524   : > { %v3101_v40 = vadd.f32 %v3100_v6, %v3099_v15  ;;  %4186 = vrcp.f32 %v2934_v59  ;;  %v2830_v32 = vsub.f32 %v5552_v50, %v2802_v62  ;;  %v5981_v34 = vmax.f32 %v5239_v18, 0.0 }
 0x525   : > { %v3081_v38 = vsel %vm1049_vm7, %v3017_v58, 0.0  ;;  %v3195_v11 = vadd.f32 %v3194_v60, %v3193_v28  ;;  %v3214_v22 = vsel %vm1852_vm9, %v3004_v26, 0.0  ;;  %v2965_v10 = vadd.f32 %v2964_v9, %v2963_v20 }
 0x526   : > { %v3082_v16 = vrot.slane %v3081_v38, 4  ;;  %v3020_v47 = vmul.f32 %v3004_v26, %v5981_v34  ;;  %4188 = vpow2.f32 %v2863_v24  ;;  %v3068_v0 = vrot.slane %v3067_v63, 4 }
 0x527   : > { %v3074_v51 = vsel %vm1049_vm7, %v3016_v8, 0.0  ;;  %v5613_v2 = vpop.eup %4184  ;;  %v3196_v5 = vrot.slane %v3195_v11, 2  ;;  %v2859_v14 = vmul.f32 1.442695, %v2830_v32  ;;  %v3297_v50 = vpack.c.bf16 %v3101_v40, %v3101_v40 }
 0x528   : > { %v3083_v29 = vadd.f32 %v3082_v16, %v3081_v38  ;;  %v3102_v7 = vsel %vm1049_vm7, %v3020_v47, 0.0  ;;  %v3215_v61 = vrot.slane %v3214_v22, 4  ;;  %v2966_v46 = vrot.slane %v2965_v10, 2 }
 0x529   : > { %v3103_v15 = vrot.slane %v3102_v7, 4  ;;  %v5616_v27 = vadd.f32 %v3196_v5, %v3195_v11  ;;  %v2949_v20 = vsel %vm1419_vm8, %v5613_v2, 0.0  ;;  %4190 = vpow2.f32 %v2859_v14 }
 0x52a   : > { %v3084_v18 = vrot.slane %v3083_v29, 2  ;;  %v2967_v8 = vadd.f32 %v2966_v46, %v2965_v10  ;;  %v2950_v62 = vrot.slane %v2949_v20, 4  ;;  %v3142_v54 = vrot.slane %v5521_v53, 1 }
 0x52b   : > { %v3104_v56 = vadd.f32 %v3103_v15, %v3102_v7  ;;  %v3210_v6 = vrot.slane %v5591_v23, 2  ;;  %v3069_v58 = vadd.f32 %v3068_v0, %v3067_v63  ;;  %v3075_v28 = vrot.slane %v3074_v51, 4 }
 0x52c   : > { %v3085_v31 = vadd.f32 %v3084_v18, %v3083_v29  ;;  %v2968_v60 = vrot.slane %v2967_v8, 1  ;;  %v2951_v26 = vadd.f32 %v2950_v62, %v2949_v20  ;;  %v3149_v9 = vrot.slane %v5524_v57, 1 }
 0x52d   : > { %v3105_v59 = vrot.slane %v3104_v56, 2  ;;  %v5623_v24 = vunpack.c.l.b16 %v3297_v50  ;;  %v3198_v38 = vrot.slane %v5616_v27, 1  ;;  %v5626_v32 = vadd.f32 %v3215_v61, %v3214_v22 }
 0x52e   : > { %v3086_v40 = vrot.slane %v3085_v31, 1  ;;  %v4187_v16 = vpop.eup %4186  ;;  %v2969_v34 = vadd.f32 %v2968_v60, %v2967_v8  ;;  %v2952_v47 = vrot.slane %v2951_v26, 2  ;;  %v5629_v10 = vadd.f32 %v3142_v54, %v5521_v53 }
 0x52f   : > { %v3106_v11 = vadd.f32 %v3105_v59, %v3104_v56  ;;  %v3002_v63 = vmul.f32 %v4187_v16, %v5560_v43  ;;  %v3070_v0 = vrot.slane %v3069_v58, 2  ;;  %v3076_v29 = vadd.f32 %v3075_v28, %v3074_v51 }
 0x530   : > { %v3155_v5 = vadd.f32 %v3154_v3, %v5495_v13  ;;  %v5635_v7 = vpop.eup %4188  ;;  %v3087_v14 = vadd.f32 %v3086_v40, %v3085_v31  ;;  %4192 = vrcp.f32 %v2969_v34  ;;  %v2953_v22 = vadd.f32 %v2952_v47, %v2951_v26 }
 0x531   : > { %v5638_v50 = vadd.f32 %v3149_v9, %v5524_v57  ;;  %v5982_v15 = vmax.f32 %v5242_v44, 0.0  ;;  %v3200_v61 = vsel %vm1852_vm9, %v3002_v63, 0.0  ;;  %v2970_v43 = vsel %vm1419_vm8, %v5635_v7, 0.0 }
 0x532   : > { %v3161_v51 = vrot.slane %v5515_v25, 2  ;;  %v3107_v46 = vrot.slane %v3106_v11, 1  ;;  %v3201_v3 = vrot.slane %v3200_v61, 4  ;;  %v2954_v13 = vrot.slane %v2953_v22, 1 }
 0x533   : > { %v3018_v53 = vmul.f32 %v3002_v63, %v5982_v15  ;;  %v2971_v18 = vrot.slane %v2970_v43, 4  ;;  %v5646_v20 = vpop.eup %4190  ;;  %v5649_v57 = vadd.f32 %v3070_v0, %v3069_v58  ;;  %v3077_v8 = vrot.slane %v3076_v29, 2 }
 0x534   : > { %v3156_v44 = vrot.slane %v3155_v5, 1  ;;  %v3295_v62 = vpack.c.bf16 %v3087_v14, %v3087_v14  ;;  %v3202_v31 = vadd.f32 %v3201_v3, %v3200_v61  ;;  %v2955_v28 = vadd.f32 %v2954_v13, %v2953_v22 }
 0x535   : > { %v3088_v56 = vsel %vm1049_vm7, %v3018_v53, 0.0  ;;  %v2972_v59 = vadd.f32 %v2971_v18, %v2970_v43  ;;  %v2956_v60 = vsel %vm1419_vm8, %v5646_v20, 0.0  ;;  %v3162_v26 = vadd.f32 %v3161_v51, %v5515_v25 }
 0x536   : > { %v3089_v54 = vrot.slane %v3088_v56, 4  ;;  %v3167_v9 = vadd.f32 %v3166_v33, %v5511_v21  ;;  %v5657_v40 = vadd.f32 %v3107_v46, %v3106_v11  ;;  %v3203_v16 = vrot.slane %v3202_v31, 2 }
 0x537   : > { %4194 = vrcp.f32 %v2955_v28  ;;  %v2973_v34 = vrot.slane %v2972_v59, 2  ;;  %v2957_v47 = vrot.slane %v2956_v60, 4  ;;  %v3163_v63 = vrot.slane %v3162_v26, 1 }
 0x538   : > { %v3090_v58 = vadd.f32 %v3089_v54, %v3088_v56  ;;  %v3168_v0 = vrot.slane %v3167_v9, 2  ;;  %v5659_v14 = vunpack.c.l.b16 %v3295_v62  ;;  %v3172_v15 = vsel %vm1852_vm9, %v5529_v19, 0.0 }
 0x539   : > { %v3179_v25 = vsel %vm1852_vm9, %v5575_v35, 0.0  ;;  %v3204_v53 = vadd.f32 %v3203_v16, %v3202_v31  ;;  %v2974_v21 = vadd.f32 %v2973_v34, %v2972_v59  ;;  %v2958_v33 = vadd.f32 %v2957_v47, %v2956_v60 }
 0x53a   : > { %v3091_v22 = vrot.slane %v3090_v58, 2  ;;  %v5665_v11 = vadd.f32 %v3077_v8, %v3076_v29  ;;  %v4193_v61 = vpop.eup %4192  ;;  %v3157_v43 = vadd.f32 %v3156_v44, %v3155_v5  ;;  %v3169_v51 = vadd.f32 %v3168_v0, %v3167_v9 }
 0x53b   : > { %v3173_v46 = vrot.slane %v3172_v15, 4  ;;  %v3180_v3 = vrot.slane %v3179_v25, 4  ;;  %v3007_v13 = vmul.f32 %v4193_v61, %v5593_v36  ;;  %v2975_v18 = vrot.slane %v2974_v21, 1 }
 0x53c   : > { %v2959_v56 = vrot.slane %v2958_v33, 2  ;;  %v3164_v62 = vadd.f32 %v3163_v63, %v3162_v26  ;;  %v3092_v54 = vadd.f32 %v3091_v22, %v3090_v58  ;;  %v3186_v35 = vsel %vm1852_vm9, %v5581_v55, 0.0 }
 0x53d   : > { %v3174_v19 = vadd.f32 %v3173_v46, %v3172_v15  ;;  %v3181_v28 = vadd.f32 %v3180_v3, %v3179_v25  ;;  %v3205_v31 = vrot.slane %v3204_v53, 1  ;;  %v5983_v29 = vmax.f32 %v5259_v17, 0.0 }
 0x53e   : > { %v2976_v59 = vadd.f32 %v2975_v18, %v2974_v21  ;;  %v2960_v5 = vadd.f32 %v2959_v56, %v2958_v33  ;;  %v3170_v44 = vrot.slane %v3169_v51, 1  ;;  %v3187_v16 = vrot.slane %v3186_v35, 4 }
 0x53f   : > { %v3023_v8 = vmul.f32 %v3007_v13, %v5983_v29  ;;  %v3175_v60 = vrot.slane %v3174_v19, 2  ;;  %v3182_v9 = vrot.slane %v3181_v28, 2  ;;  %v3265_v58 = vsel %vm1981_vm10, %v5638_v50, %v5629_v10 }
 0x540   : > { %4196 = vrcp.f32 %v2976_v59  ;;  %v2961_v26 = vrot.slane %v2960_v5, 1  ;;  %v3093_v55 = vrot.slane %v3092_v54, 1  ;;  %v3188_v15 = vadd.f32 %v3187_v16, %v3186_v35 }
 0x541   : > { %v3123_v36 = vsel %vm1049_vm7, %v3023_v8, 0.0  ;;  %v4195_v34 = vpop.eup %4194  ;;  %v3176_v63 = vadd.f32 %v3175_v60, %v3174_v19  ;;  %v3183_v17 = vadd.f32 %v3182_v9, %v3181_v28  ;;  %v3266_v25 = vsel %vm1983_vm11, %v3157_v43, %v3265_v58 }
 0x542   : > { %v3124_v47 = vrot.slane %v3123_v36, 4  ;;  %v3005_v0 = vmul.f32 %v4195_v34, %v5613_v2  ;;  %v2962_v22 = vadd.f32 %v2961_v26, %v2960_v5  ;;  %v3171_v33 = vadd.f32 %v3170_v44, %v3169_v51 }
 0x543   : > { %v3177_v61 = vrot.slane %v3176_v63, 1  ;;  %v3184_v46 = vrot.slane %v3183_v17, 1  ;;  %v5984_v3 = vmax.f32 %v5256_v39, 0.0  ;;  %v3189_v50 = vrot.slane %v3188_v15, 2 }
 0x544   : > { %v3125_v21 = vadd.f32 %v3124_v47, %v3123_v36  ;;  %v3221_v10 = vsel %vm1852_vm9, %v3005_v0, 0.0  ;;  %4198 = vrcp.f32 %v2962_v22  ;;  %v5681_v56 = vadd.f32 %v3093_v55, %v3092_v54 }
 0x545   : > { %v3021_v18 = vmul.f32 %v3005_v0, %v5984_v3  ;;  %v3222_v28 = vrot.slane %v3221_v10, 4  ;;  %v3178_v2 = vadd.f32 %v3177_v61, %v3176_v63  ;;  %v3185_v29 = vadd.f32 %v3184_v46, %v3183_v17 }
 0x546   : > { %v3126_v19 = vrot.slane %v3125_v21, 2  ;;  %v3190_v43 = vadd.f32 %v3189_v50, %v3188_v15  ;;  %v3267_v51 = vsel %vm1985_vm12, %v3164_v62, %v3266_v25  ;;  %v3199_v39 = vadd.f32 %v3198_v38, %v5616_v27 }
 0x547   : > { %v3109_v35 = vsel %vm1049_vm7, %v3021_v18, 0.0  ;;  %v3268_v59 = vsel %vm1987_vm13, %v3171_v33, %v3267_v51  ;;  %v3206_v5 = vadd.f32 %v3205_v31, %v3204_v53  ;;  %v3211_v60 = vadd.f32 %v3210_v6, %v5591_v23 }
 0x548   : > { %v3110_v8 = vrot.slane %v3109_v35, 4  ;;  %v3191_v44 = vrot.slane %v3190_v43, 1  ;;  %v3269_v54 = vsel %vm1989_vm14, %v3178_v2, %v3268_v59  ;;  %v3217_v9 = vrot.slane %v5626_v32, 2 }
 0x549   : > { %v3270_v62 = vsel %vm1991_vm15, %v3185_v29, %v3269_v54  ;;  %v3223_v36 = vadd.f32 %v3222_v28, %v3221_v10  ;;  %v3235_v26 = vsel %vm1852_vm9, %v3007_v13, 0.0  ;;  %v3212_v55 = vrot.slane %v3211_v60, 1 }
 0x54a   : > { %v3111_v16 = vadd.f32 %v3110_v8, %v3109_v35  ;;  %v4197_v58 = vpop.eup %4196  ;;  %v3192_v34 = vadd.f32 %v3191_v44, %v3190_v43  ;;  %v3218_v27 = vadd.f32 %v3217_v9, %v5626_v32  ;;  %v3236_v38 = vrot.slane %v3235_v26, 4 }
 0x54b   : > { %v3008_v31 = vmul.f32 %v4197_v58, %v5635_v7  ;;  %v3224_v47 = vrot.slane %v3223_v36, 2  ;;  %v3272_v23 = vsel %vm1981_vm10, %v3206_v5, %v3199_v39  ;;  %v3213_v63 = vadd.f32 %v3212_v55, %v3211_v60 }
 0x54c   : > { %v3112_v53 = vrot.slane %v3111_v16, 2  ;;  %v3271_v6 = vsel %vm1993_vm5, %v3192_v34, %v3270_v62  ;;  %v3219_v17 = vrot.slane %v3218_v27, 1  ;;  %v3237_v0 = vadd.f32 %v3236_v38, %v3235_v26 }
 0x54d   : > { %3279 = vrot.lane.b32.xlu1 %v3271_v6, %s4292_s4  ;;  %v5985_v13 = vmax.f32 %v5261_v12, 0.0  ;;  %v3225_v25 = vadd.f32 %v3224_v47, %v3223_v36  ;;  %v3242_v32 = vsel %vm1852_vm9, %v3008_v31, 0.0  ;;  %v3273_v3 = vsel %vm1983_vm11, %v3213_v63, %v3272_v23 }
 0x54e   : > { %v3113_v22 = vadd.f32 %v3112_v53, %v3111_v16  ;;  %v4199_v33 = vpop.eup %4198  ;;  %v3220_v61 = vadd.f32 %v3219_v17, %v3218_v27  ;;  %v3238_v7 = vrot.slane %v3237_v0, 2  ;;  %v3243_v46 = vrot.slane %v3242_v32, 4 }
 0x54f   : > { %v3024_v15 = vmul.f32 %v3008_v31, %v5985_v13  ;;  %v3006_v10 = vmul.f32 %v4199_v33, %v5646_v20  ;;  %v3226_v28 = vrot.slane %v3225_v25, 1  ;;  %v3298_v2 = vpack.c.bf16 %v5657_v40, %v5657_v40 }
 0x550   : > { %v3114_v18 = vrot.slane %v3113_v22, 1  ;;  %v3244_v35 = vadd.f32 %v3243_v46, %v3242_v32  ;;  %v3274_v29 = vsel %vm1985_vm12, %v3220_v61, %v3273_v3  ;;  %v3127_v43 = vadd.f32 %v3126_v19, %v3125_v21 }
 0x551   : > { %v3130_v50 = vsel %vm1049_vm7, %v3024_v15, 0.0  ;;  %v5986_v51 = vmax.f32 %v5264_v30, 0.0  ;;  %v3227_v59 = vadd.f32 %v3226_v28, %v3225_v25  ;;  %v3228_v39 = vsel %vm1852_vm9, %v3006_v10, 0.0 }
 0x552   : > { %v3131_v12 = vrot.slane %v3130_v50, 4  ;;  %v3229_v44 = vrot.slane %v3228_v39, 4  ;;  %v3239_v20 = vadd.f32 %v3238_v7, %v3237_v0  ;;  %v3245_v54 = vrot.slane %v3244_v35, 2 }
 0x553   : > { %v3022_v8 = vmul.f32 %v3006_v10, %v5986_v51  ;;  %v3296_v60 = vpack.c.bf16 %v5681_v56, %v5681_v56  ;;  %v3115_v9 = vadd.f32 %v3114_v18, %v3113_v22  ;;  %v3275_v16 = vsel %vm1987_vm13, %v3227_v59, %v3274_v29 }
 0x554   : > { %v3132_v5 = vadd.f32 %v3131_v12, %v3130_v50  ;;  %v3230_v19 = vadd.f32 %v3229_v44, %v3228_v39  ;;  %v3066_v30 = vadd.f32 %v3065_v49, %v5571_v45  ;;  %v3246_v36 = vadd.f32 %v3245_v54, %v3244_v35 }
 0x555   : > { %v3116_v40 = vsel %vm1049_vm7, %v3022_v8, 0.0  ;;  %v3072_v26 = vrot.slane %v5649_v57, 1  ;;  %v3079_v58 = vrot.slane %v5665_v11, 1  ;;  %v3128_v34 = vrot.slane %v3127_v43, 1 }
 0x556   : > { %v3117_v62 = vrot.slane %v3116_v40, 4  ;;  %v3133_v21 = vrot.slane %v3132_v5, 2  ;;  %v3231_v27 = vrot.slane %v3230_v19, 2  ;;  %v3240_v38 = vrot.slane %v3239_v20, 1 }
 0x557   : > { %v3247_v53 = vrot.slane %v3246_v36, 1  ;;  %v3073_v31 = vadd.f32 %v3072_v26, %v5649_v57  ;;  %v3080_v47 = vadd.f32 %v3079_v58, %v5665_v11  ;;  %v3129_v23 = vadd.f32 %v3128_v34, %v3127_v43 }
 0x558   : > { %v3118_v55 = vadd.f32 %v3117_v62, %v3116_v40  ;;  %v3134_v56 = vadd.f32 %v3133_v21, %v3132_v5  ;;  %v3232_v63 = vadd.f32 %v3231_v27, %v3230_v19  ;;  %v3292_v45 = vpack.c.bf16 %v3066_v30, %v3066_v30  ;;  %v5988_v30 = vld [vmem:[#allocation14_spill] sm:$0xff] }
 0x559   : > { %v3385_v49 = vunpack.c.l.b16 %v3298_v2  ;;  %v3383_v0 = vunpack.c.l.b16 %v3296_v60  ;;  %v3299_v22 = vpack.c.bf16 %v3115_v9, %v3115_v9  ;;  %v3293_v13 = vpack.c.bf16 %v3073_v31, %v3073_v31 }
 0x55a   : > { %v3119_v6 = vrot.slane %v3118_v55, 2  ;;  %v3135_v17 = vrot.slane %v3134_v56, 1  ;;  %v3233_v25 = vrot.slane %v3232_v63, 1  ;;  %v3241_v32 = vadd.f32 %v3240_v38, %v3239_v20 }
 0x55b   : > { %v3294_v33 = vpack.c.bf16 %v3080_v47, %v3080_v47  ;;  %v3248_v61 = vadd.f32 %v3247_v53, %v3246_v36  ;;  %v3301_v46 = vpack.c.bf16 %v3129_v23, %v3129_v23  ;;  %v3378_v57 = vunpack.c.l.b16 %v3291_v37  ;;  %v3782_v47 = vld [vmem:[%s5857_s17] ss:$0 sm:$0xff] }
 0x55c   : > { %v3120_v15 = vadd.f32 %v3119_v6, %v3118_v55  ;;  %v3136_v7 = vadd.f32 %v3135_v17, %v3134_v56  ;;  %v3234_v3 = vadd.f32 %v3233_v25, %v3232_v63  ;;  %v3379_v18 = vunpack.c.l.b16 %v3292_v45  ;;  %v4070_v55 = vld [vmem:[%s5858_s18] sm:$0xff]   ;;  %v4071_v56 = vld [vmem:[%s5858_s18 + $0x8] sm:$0xff]  }
 0x55d   : > { %v3390_v10 = vsel %vm1981_vm10, %v5586_v42, %v5554_v1  ;;  %v3380_v50 = vunpack.c.l.b16 %v3293_v13  ;;  %v3386_v28 = vunpack.c.l.b16 %v3299_v22  ;;  %v3397_v12 = vsel %vm1981_vm10, %v3383_v0, %v5659_v14  ;;  %v3534_v22 = vld [vmem:[%s5860_s20] sm:$0xf] }
 0x55e   : > { %v3121_v11 = vrot.slane %v3120_v15, 1  ;;  %v3391_v2 = vsel %vm1983_vm11, %v5526_v4, %v3390_v10  ;;  %v3276_v35 = vsel %vm1989_vm14, %v3234_v3, %v3275_v16  ;;  %v3381_v41 = vunpack.c.l.b16 %v3294_v33  ;;  %v4208_v33 = vld [vmem:[%s4489_s26] sm:$0xff]   ;;  %s3796_s26 = sshll.u32 %s4279_s30, 8  ;;  %s5794_s30 = scalar_lea.sflag [#allocation3], %s725_s29 }
 0x55f   : > { %v3392_v37 = vsel %vm1985_vm12, %v5577_v48, %v3391_v2  ;;  %v3277_v43 = vsel %vm1991_vm15, %v3241_v32, %v3276_v35  ;;  %v3302_v51 = vpack.c.bf16 %v3136_v7, %v3136_v7  ;;  %v3398_v42 = vsel %vm1983_vm11, %v5623_v24, %v3397_v12  ;;  %v3787_v7 = vld [vmem:[%s5861_s21] ss:$0 sm:$0xff]  ;;  %s5790_s22 = scalar_lea.hbm %s5991_s5, %s3796_s26 }
 0x560   : > { %v3122_v29 = vadd.f32 %v3121_v11, %v3120_v15  ;;  %v3393_v1 = vsel %vm1987_vm13, %v3378_v57, %v3392_v37  ;;  %v3278_v4 = vsel %vm1993_vm5, %v3248_v61, %v3277_v43  ;;  %v3399_v59 = vsel %vm1985_vm12, %v3385_v49, %v3398_v42  ;;  %v3783_v61 = vld [vmem:[%s5859_s19] ss:$0 sm:$0xff] }
 0x561   : > { %v3394_v14 = vsel %vm1989_vm14, %v3379_v18, %v3393_v1  ;;  %3281 = vrot.lane.b32.xlu1 %v3278_v4, %s4292_s4  ;;  %v3400_v48 = vsel %vm1987_vm13, %v3386_v28, %v3399_v59  ;;  %v3388_v20 = vunpack.c.l.b16 %v3301_v46  ;;  %v3389_v54 = vunpack.c.l.b16 %v3302_v51  ;;  %s4215_s4 = scalar_lea.vmem %s4214_s3, 512 }
 0x562   : > { %v3300_v8 = vpack.c.bf16 %v3122_v29, %v3122_v29  ;;  %v3395_v39 = vsel %vm1991_vm15, %v3380_v50, %v3394_v14  ;;  %v5987_v21 = vmax.f32 %v5176_v52, 0.0  ;;  %v5989_v36 = vmax.f32 %v5988_v30, 0.0  ;;  %p4217_p2 = scmp.lt.s32.totalorder %s4215_s4, %s4209_s0 }
 0x563   : > { %v3396_v44 = vsel %vm1993_vm5, %v3381_v41, %v3395_v39  ;;  %v5990_v34 = vmov 0.0   ;;  %v3543_v25 = vsel %vm785_vm0, %v3534_v22, 0  ;;  %v3980_v46 = vadd.f32 %v3787_v7, %v3783_v61 }
 0x564   : > { %v3387_v5 = vunpack.c.l.b16 %v3300_v8  ;;  %p4218_p3 = por %p4217_p2, %p4216_p1 }
 0x566   : > { %v3401_v24 = vsel %vm1989_vm14, %v3387_v5, %v3400_v48  ;;  %p4219_p5 = pnand %p4218_p3, %p4212_p0 }
 0x567   : > { %v3402_v60 = vsel %vm1991_vm15, %v3388_v20, %v3401_v24 }
 0x568   : > { %v3403_v9 = vsel %vm1993_vm5, %v3389_v54, %v3402_v60 }
 0x569   : > { %v3404_v40 = vpack.c.b16 %v3403_v9, %v3396_v44 }
 0x56b   : > { %3963 = vmatmul.mubr.msk.bf16.vlgmr.msra.gmra.mrb[44].mxu0 %vm1049_vm7, %v3404_v40 }
 0x5bf   : > { %v3280_v16 = vpop.permute.xlu1 %3279 }
 0x5c0   : > { %v3285_v19 = vmul.f32 %v3280_v16, %v5987_v21 }
 0x5d3   : > { %v3282_v62 = vpop.permute.xlu1 %3281 }
 0x5d4   : > { %v3286_v26 = vmul.f32 %v3282_v62, %v5989_v36 }
 0x5d6   : > { %v3305_v58 = vpack.c.bf16 %v3286_v26, %v3285_v19 }
 0x5d8   : > { %3957 = vmatmul.mubr.msk.bf16.vlgmr.msra.gmra.mrb[40].mxu1 %vm1049_vm7, %v3305_v58 }
 0x5d9   : > { %3970 = vmatprep.mubr.msk.bf16.mxu1 %vm4290_vm2, %v5990_v34  ;;  %3967 = vmatpush3.bf16.msra.mxu1 %v4070_v55 }
 0x5da   : > { %3968 = vmatprep.subr.bf16.mxu1 %v5990_v34 }
 0x5dd   : > { %3969 = vmatpush3.bf16.msra.mxu1 %v4071_v56 }
 0x5de   : > { %3974 = vmatprep.subr.bf16.mxu1 %v5990_v34 }
 0x63e   : > { %v3448_v52 = vpop.f32.mrb[44].mxu0 }
 0x63f   : > { %v3964_v27 = vpop.f32.mrb[45].mxu0 }
 0x640   : > { %v3451_v38 = vpop.f32.mrb[46].mxu0 }
 0x641   : > { %v3965_v53 = vpop.f32.mrb[47].mxu0 }
 0x6ab   : > { %v3351_v31 = vpop.f32.mrb[40].mxu1 }
 0x6ac   : > { %v3449_v23 = vadd.f32 %v3448_v52, %v3351_v31  ;;  %v3958_v6 = vpop.f32.mrb[41].mxu1 }
 0x6ad   : > { %v3354_v63 = vpop.f32.mrb[42].mxu1 }
 0x6ae   : > { %v3462_v17 = vadd.f32 %v3782_v47, %v3449_v23  ;;  %v3452_v45 = vadd.f32 %v3451_v38, %v3354_v63  ;;  %v3959_v49 = vpop.f32.mrb[43].mxu1 }
 0x6b0   : > { %v3463_v0 = vadd.f32 %v3782_v47, %v3452_v45  ;;  %v3464_v13 = vmax.f32 %v3462_v17, 0.0 }
 0x6b2   : > { %v3465_v15 = vmax.f32 %v3463_v0, 0.0 }
 0x6b4   : > { %v3466_v32 = vpack.c.bf16 %v3465_v15, %v3464_v13 }
 0x6b6   : > { %3971 = vmatmul.mubr.msk.bf16.vlgmr.msra.gmra.mrb[44].mxu1 %vm1419_vm8, %v3466_v32 }
 0x6b7   : > { %3975 = vmatpush3.bf16.msra.mxu1 %v3543_v25  ;;  %3976 = vmatprep.mubr.msk.bf16.mxu1 %vm4290_vm2, %v5990_v34 }
 0x6c2   : > { %3977 = vmatmul.mubr.msk.bf16.vlgmr.msra.gmra.mrb[44].mxu1 %vm781_vm3, %v4208_v33 }
 0x795   : > { %v3579_v57 = vpop.f32.mrb[44].mxu1 }
 0x796   : > { %v3981_v11 = vadd.f32 %v3980_v46, %v3579_v57  ;;  %v3978_v3 = vpop.f32.mrb[45].mxu1 }
 0x797   : > { %v3582_v18 = vpop.f32.mrb[46].mxu1 }
 0x798   : > { %vm3588_vm0 = vcmp.ge.f32.partialorder %v3981_v11, 0.0  ;;  %v3590_v10 = vmul.f32 0.01, %v3981_v11  ;;  %v3983_v50 = vadd.f32 %v3980_v46, %v3582_v18  ;;  %v3979_v28 = vpop.f32.mrb[47].mxu1 }
 0x79a   : > { %v3592_v2 = vsel %vm3588_vm0, %v3981_v11, %v3590_v10  ;;  %vm3589_vm2 = vcmp.ge.f32.partialorder %v3983_v50, 0.0  ;;  %v3591_v12 = vmul.f32 0.01, %v3983_v50 }
 0x79b   : > { %3595 = vst.msk [vmem:[%s727_s27] sm:$0xff] %vm3594_vm1, %v3592_v2 }
 0x79c   : > { %v3593_v35 = vsel %vm3589_vm2, %v3983_v50, %v3591_v12 }
 0x79d   : > { %3596 = vst.msk [vmem:[%s727_s27 + $0x8] sm:$0xff] %vm3594_vm1, %v3593_v35 }
 0x79e   : > { %4222 = shalt.err (!%p4219_p5)
}
 0x79f   : > { %s4223_s29 = scalar_lea.hbm %s5790_s22, 256  ;;  %s4227_s26 = scalar_lea.hbm %s5991_s5, 512 }
 0x7a0   : > { %p4224_p6 = scmp.ne.s32.totalorder %s5790_s22, %s4223_s29  ;;  %p4228_p10 = scmp.lt.u32.totalorder %s5790_s22, %s5991_s5 }
 0x7a1   : > { %p4229_p11 = scmp.lt.u32.totalorder %s4227_s26, %s4223_s29  ;;  %p4231_p13 = scmp.lt.u32.totalorder %s4223_s29, %s5790_s22 }
 0x7a2   : > { %p4225_p7 = pnand %p4224_p6, %p4451_p4 }
 0x7a3   : > { %p4230_p12 = por %p4229_p11, %p4228_p10 }
 0x7a4   : > { %p4226_p9 = pneg %p4225_p7 }
 0x7a5   : > { %p4232_p0 = por %p4231_p13, %p4230_p12 }
 0x7a7   : > { %p4233_p1 = pnand %p4232_p0, %p4226_p9 }
 0x7a9   : > { %4236 = shalt.err (!%p4233_p1)
}
 0x7aa   : > { %s4294_s0 = smov 128   ;;  %s4295_s2 = smov 8  }
 0x7ab   : > { %3990 = dma.vmem_to_hbm [thread:$0]  (%p4451_p4), %s5792_s23, 256, %s5790_s22, %s5794_s30, %s4294_s0, %s4294_s0, %s4295_s2  }
 0x7ac PF: > { %s5992_s3 = sld [smem:[#allocation8_spill]]  ;;  %s5993_s4 = sld [smem:[#allocation5_spill]] }
 0x7b2   : > { %p3996_p2 = scmp.ge.s32.totalorder %s5992_s3, 2  ;;  %s3628_s27 = sand.u32 1, %s5993_s4  }
 0x7b3   : > { %s3629_s29 = scalar_lea.sflag [#allocation3], %s3628_s27 }
 0x7b4   : > { %p3993_p3 = pnand %p3996_p2, %p4458_p8 }
 0x7b6   : > { %4262 = dma.done.wait (!%p3993_p3), %s3629_s29, 256  }
 0x7b7   : > { %4264 = vsyncadd (!%p3993_p3), %s3629_s29, 4294967040  ;;  %s35_s0 = sadd.s32 1, %s5992_s3   ;;  %s5995_s26 = sld [smem:[#allocation6_spill]] }
 0x7b8   : > { %p32_p5 = scmp.ge.s32.totalorder %s35_s0, 4   ;;  %s5996_s29 = sld [smem:[#allocation11_spill]] }
 0x7b9   : > { %s5997_s30 = sld [smem:[#allocation7_spill]]  ;;  %s5998_s4 = sld [smem:[#allocation9_spill]] }
 0x7ba   : > { %s5999_s3 = smov %s4271_s28  ;;  %34 = sbr.rel (!%p32_p5) target bundleno = 13 (0xd), region = 146 }
 0x7bd   : > { %s6000_s28 = smov %s5995_s26 }
 0x7c1   :  { %3634 = vsyncpa [#allocation3], 1 }
 0x7c2   :  { %3636 = vsyncpa [#allocation3 + $0x1], 1 }

</bundles_post_ra>
